<compile_context>
chip_gen: v5e
topology: v5e:2x2
jax: 0.10.0
libtpu: 0.0.40
codegen_flags: <defaults>
</compile_context>

<pallas_src>
import functools

import jax
import jax.numpy as jnp
from jax.experimental import pallas as pl
from jax.experimental.pallas import tpu as pltpu

LANE = 128
MXU_DTYPE = jnp.bfloat16      # matmul-input dtype; accumulation is always f32


def _round_up(x, m):
    return ((x + m - 1) // m) * m


# ----------------------------------------------------------------------------
# Kernel 1: tiled linear  y = act(x @ W + b)    (used for both EquiLinears)
# ----------------------------------------------------------------------------
def _linear_kernel(*refs, has_bias, activation):
    if has_bias:
        a_ref, b_ref, bias_ref, o_ref, acc_ref = refs
    else:
        a_ref, b_ref, o_ref, acc_ref = refs

    @pl.when(pl.program_id(2) == 0)
    def _():
        acc_ref[...] = jnp.zeros_like(acc_ref)

    acc_ref[...] += jnp.dot(a_ref[...].astype(MXU_DTYPE), b_ref[...],
                            preferred_element_type=jnp.float32)

    @pl.when(pl.program_id(2) == pl.num_programs(2) - 1)
    def _():
        acc = acc_ref[...]
        if has_bias:
            acc = acc + bias_ref[...]
        if activation == "gelu":
            acc = jax.nn.gelu(acc, approximate=True)
        o_ref[...] = acc.astype(o_ref.dtype)


def pallas_linear(x, w, bias=None, activation=None, tm=256, tn=256, tk=512):
    """x:(m,k) @ w:(k,n) [+ bias], tiled with a VMEM f32 accumulator."""
    m, k = x.shape
    k2, n = w.shape
    assert k == k2

    def _pick(dim, pref):
        return pref if (dim > pref and dim % pref == 0) else dim

    tm, tn, tk = _pick(m, tm), _pick(n, tn), _pick(k, tk)
    grid = (m // tm, n // tn, k // tk)
    has_bias = bias is not None

    in_specs = [
        pl.BlockSpec((tm, tk), lambda i, j, kk: (i, kk)),
        pl.BlockSpec((tk, tn), lambda i, j, kk: (kk, j)),
    ]
    args = [x, w.astype(MXU_DTYPE)]
    if has_bias:
        in_specs.append(pl.BlockSpec((1, tn), lambda i, j, kk: (0, j)))
        args.append(bias.reshape(1, n).astype(jnp.float32))

    return pl.pallas_call(
        functools.partial(_linear_kernel, has_bias=has_bias, activation=activation),
        out_shape=jax.ShapeDtypeStruct((m, n), jnp.float32),
        grid_spec=pltpu.PrefetchScalarGridSpec(
            num_scalar_prefetch=0,
            grid=grid,
            in_specs=in_specs,
            out_specs=pl.BlockSpec((tm, tn), lambda i, j, kk: (i, j)),
            scratch_shapes=[pltpu.VMEM((tm, tn), jnp.float32)],
        ),
        compiler_params=pltpu.CompilerParams(
            dimension_semantics=("parallel", "parallel", "arbitrary")),
    )(*args)


# ----------------------------------------------------------------------------
# Kernel 2: fused pre-norm cross-attention + MLP block (single pallas_call)
# ----------------------------------------------------------------------------
def _attn_block_kernel(feat_s_ref, feat_t_ref, wq_ref, wkv_ref, wo_ref,
                       w1_ref, b1_ref, w2_ref, b2_ref, o_ref,
                       *, num_heads, d_true, eps):
    D = o_ref.shape[-1]
    dh = D // num_heads
    inv_d = 1.0 / float(d_true)          # normalize over TRUE features (pads are zero)

    def rms(x):
        ms = jnp.sum(x * x, axis=-1, keepdims=True) * inv_d
        return x * jax.lax.rsqrt(ms + eps)

    feat_s = feat_s_ref[...]             # (n, D)  all source tokens
    feat_t = feat_t_ref[...]             # (tm, D) this tile of target tokens

    h_s = rms(feat_s).astype(MXU_DTYPE)
    h_t = rms(feat_t).astype(MXU_DTYPE)

    # fused projections: one matmul for q (scale pre-folded into wq), one for k|v
    q = jnp.dot(h_t, wq_ref[...], preferred_element_type=jnp.float32).astype(MXU_DTYPE)
    kv = jnp.dot(h_s, wkv_ref[...], preferred_element_type=jnp.float32)
    k = kv[:, :D].astype(MXU_DTYPE)
    v = kv[:, D:].astype(MXU_DTYPE)

    # multi-head attention; heads are lane-aligned slices (dh is a multiple of 128)
    heads = []
    for h in range(num_heads):
        sl = slice(h * dh, (h + 1) * dh)
        s = jax.lax.dot_general(q[:, sl], k[:, sl], (((1,), (1,)), ((), ())),
                                preferred_element_type=jnp.float32)      # (tm, n)
        s = s - jnp.max(s, axis=-1, keepdims=True)
        p = jnp.exp(s)
        denom = jnp.sum(p, axis=-1, keepdims=True)
        acc = jnp.dot(p.astype(MXU_DTYPE), v[:, sl],
                      preferred_element_type=jnp.float32)                # (tm, dh)
        heads.append(acc * pl.reciprocal(denom, approx=True))
    attn = jnp.concatenate(heads, axis=-1).astype(MXU_DTYPE)             # (tm, D)

    feat1 = feat_t + jnp.dot(attn, wo_ref[...], preferred_element_type=jnp.float32)

    # MLP sub-block (GELU fused; tanh approximation)
    # TODO(synk): PyTorch nn.GELU defaults to the exact erf form.
    hidden = jnp.dot(rms(feat1).astype(MXU_DTYPE), w1_ref[...],
                     preferred_element_type=jnp.float32) + b1_ref[...]
    hidden = jax.nn.gelu(hidden, approximate=True).astype(MXU_DTYPE)
    mlp = jnp.dot(hidden, w2_ref[...], preferred_element_type=jnp.float32) + b2_ref[...]

    o_ref[...] = feat1 + mlp


def fused_cross_attention_block(feat_s, feat_t, p, num_heads, d_true):
    """feat_s: (n, D) source features, feat_t: (m, D) target features -> (m, D)."""
    n, D = feat_s.shape
    m, _ = feat_t.shape
    hm = p["w1"].shape[1]
    assert D % num_heads == 0
    # TODO(synk): all n source tokens are held in VMEM per tile; very large n
    # would need FlashAttention-style KV chunking with an online softmax.
    tm = m if (m <= 128 or m % 128) else 128
    grid = (m // tm,)

    kernel = functools.partial(_attn_block_kernel, num_heads=num_heads,
                               d_true=d_true, eps=1e-6)
    return pl.pallas_call(
        kernel,
        out_shape=jax.ShapeDtypeStruct((m, D), jnp.float32),
        grid_spec=pltpu.PrefetchScalarGridSpec(
            num_scalar_prefetch=0,
            grid=grid,
            in_specs=[
                pl.BlockSpec((n, D), lambda i: (0, 0)),       # all source tokens
                pl.BlockSpec((tm, D), lambda i: (i, 0)),      # target tile
                pl.BlockSpec((D, D), lambda i: (0, 0)),       # wq  (1/sqrt(dh) folded)
                pl.BlockSpec((D, 2 * D), lambda i: (0, 0)),   # wk|wv fused
                pl.BlockSpec((D, D), lambda i: (0, 0)),       # wo
                pl.BlockSpec((D, hm), lambda i: (0, 0)),      # w1
                pl.BlockSpec((1, hm), lambda i: (0, 0)),      # b1
                pl.BlockSpec((hm, D), lambda i: (0, 0)),      # w2
                pl.BlockSpec((1, D), lambda i: (0, 0)),       # b2
            ],
            out_specs=pl.BlockSpec((tm, D), lambda i: (i, 0)),
        ),
        compiler_params=pltpu.CompilerParams(dimension_semantics=("parallel",)),
    )(feat_s, feat_t, p["wq"], p["wkv"], p["wo"], p["w1"], p["b1"], p["w2"], p["b2"])


# ----------------------------------------------------------------------------
# Forward pass (glue in plain JAX: gather, reference mean, packing/unpacking)
# ----------------------------------------------------------------------------
def cross_attention_tokeniser_forward(mv, scalars, pos, sampling_index, params,
                                      *, num_heads, c_lat, d_model):
    # geometric_algebra_interface.embed(data) -> identity (interface-specific glue)
    del pos  # cached as 'pos' in the torch module, never part of this forward's output
    n_tok, c_in, _ = mv.shape
    s_in = scalars.shape[-1]
    d_in_true = c_in * 16 + s_in
    d_in = _round_up(d_in_true, LANE)
    d_true = c_lat * 16 + s_in
    d_out_true = d_model * 16 + s_in

    # construct_reference_multivector, batch=None branch:
    #   x.mean(dim=(0,1)).expand(x.size(0), 1, -1)
    reference = jnp.broadcast_to(mv.mean(axis=(0, 1)), (n_tok, 1, 16))
    ref_target = reference[sampling_index]

    # lane-dense packed input feature: [mv_flat | scalars | zero pad]
    feat = jnp.concatenate(
        [mv.reshape(n_tok, c_in * 16).astype(jnp.float32),
         scalars.astype(jnp.float32),
         jnp.zeros((n_tok, d_in - d_in_true), jnp.float32)], axis=-1)

    # shared input EquiLinear: ONE fused matmul (channel mix + s->blade0 + scalar head).
    # Source/target input layers are shared and target tokens are a subset of the
    # source tokens, so the target projection is exactly a gather of the source one.
    lat_src = pallas_linear(feat, params["w_in"], params["b_in"])        # (n, D)
    lat_tgt = lat_src[sampling_index]                                    # (m, D)

    # fused pre-norm cross-attention + MLP (single Pallas kernel)
    # TODO(synk): GATr's CrossAttentionBlock uses equivariant LayerNorm and a gated
    # geometric-product MLP consuming reference_mv; simplified to RMS-norm + MLP here.
    feat_t = fused_cross_attention_block(lat_src, lat_tgt, params, num_heads, d_true)

    # output EquiLinear: one fused matmul, then unpack
    out = pallas_linear(feat_t, params["w_out"], params["b_out"])        # (m, D_out_pad)
    mv_out = out[:, :d_model * 16].reshape(-1, d_model, 16)
    s_out = out[:, d_model * 16:d_out_true]
    return mv_out, s_out, ref_target


# ----------------------------------------------------------------------------
# Deterministic parameter init (fused / lane-padded weight construction)
# ----------------------------------------------------------------------------
def init_params(key, c_in, s_in, c_lat, d_model, num_heads, mlp_mult=2):
    d_true = c_lat * 16 + s_in
    D = _round_up(d_true, LANE)               # lane-dense attention feature width
    d_in_true = c_in * 16 + s_in
    d_in = _round_up(d_in_true, LANE)
    d_out = _round_up(d_model * 16 + s_in, LANE)
    hm = mlp_mult * D
    assert D % num_heads == 0
    dh = D // num_heads

    keys = iter(jax.random.split(key, 16))

    def dense(fi, fo):
        return (jax.random.normal(next(keys), (fi, fo), jnp.float32)
                / jnp.sqrt(float(fi)))

    def equi_weight(c_i, c_o, s_i, s_o, di_pad, do_pad):
        """EquiLinear folded into one dense (di_pad, do_pad) matrix + bias.
        TODO(synk): full GATr EquiLinear uses the 9-element Pin(3,0,1)-equivariant
        basis of 16x16 maps; only blade-wise channel mixing is implemented."""
        w_mv = dense(c_i, c_o)                       # blade-wise channel mixing
        w_s2mv = dense(s_i, c_o)                     # scalars -> blade-0 of each out channel
        w_s = dense(s_i + c_i, s_o)                  # scalar head from [scalars, mv blade-0]
        b_s = jnp.zeros((s_o,), jnp.float32)
        W = jnp.zeros((di_pad, do_pad), jnp.float32)
        W = W.at[:c_i * 16, :c_o * 16].set(jnp.kron(w_mv, jnp.eye(16, dtype=jnp.float32)))
        r_s = c_i * 16 + jnp.arange(s_i)             # scalar input rows
        c_b0 = jnp.arange(c_o) * 16                  # blade-0 output columns
        c_s = c_o * 16 + jnp.arange(s_o)             # scalar output columns
        W = W.at[r_s[:, None], c_b0[None, :]].set(w_s2mv)
        W = W.at[r_s[:, None], c_s[None, :]].set(w_s[:s_i])
        r_b0 = jnp.arange(c_i) * 16                  # blade-0 input rows
        W = W.at[r_b0[:, None], c_s[None, :]].set(w_s[s_i:])
        b = jnp.zeros((do_pad,), jnp.float32).at[c_s].set(b_s)
        return W, b

    w_in, b_in = equi_weight(c_in, c_lat, s_in, s_in, d_in, D)        # shared input layer
    w_out, b_out = equi_weight(c_lat, d_model, s_in, s_in, D, d_out)  # output layer

    # attention block weights on the lane-padded feature width D
    # TODO(synk): heads partition the padded D (dh multiple of 128) rather than the
    # raw (c_lat*16 + s_in) feature, so the per-head split differs from d_feat/num_heads.
    in_mask = (jnp.arange(D) < d_true).astype(jnp.float32)[:, None]   # padded inputs don't leak
    out_mask = (jnp.arange(D) < d_true).astype(jnp.float32)[None, :]  # padded outputs stay zero

    wq = dense(D, D) * in_mask / jnp.sqrt(float(dh))   # softmax scale folded into wq
    wk = dense(D, D) * in_mask
    wv = dense(D, D) * in_mask
    wo = dense(D, D) * out_mask
    w1 = dense(D, hm) * in_mask
    w2 = dense(hm, D) * out_mask

    return {
        "w_in": w_in.astype(MXU_DTYPE), "b_in": b_in,
        "w_out": w_out.astype(MXU_DTYPE), "b_out": b_out,
        "wq": wq.astype(MXU_DTYPE),
        "wkv": jnp.concatenate([wk, wv], axis=1).astype(MXU_DTYPE),
        "wo": wo.astype(MXU_DTYPE),
        "w1": w1.astype(MXU_DTYPE), "b1": jnp.zeros((1, hm), jnp.float32),
        "w2": w2.astype(MXU_DTYPE), "b2": jnp.zeros((1, D), jnp.float32),
    }


# ----------------------------------------------------------------------------
# Demo
# ----------------------------------------------------------------------------
if __name__ == "__main__":
    N_POINTS = 16          # source points
    N_SAMPLED = 8          # |scale0_sampling_index|
    C_IN = 4               # num_input_channels (multivector channels)
    S_IN = 4               # num_input_scalars
    D_MODEL = 8            # d_model
    C_LAT = 8              # num_latent_channels
    NUM_HEADS = 2

    key = jax.random.PRNGKey(0)
    k_mv, k_s, k_pos, k_p = jax.random.split(key, 4)

    multivectors = jax.random.normal(k_mv, (N_POINTS, C_IN, 16), jnp.float32)
    scalars = jax.random.normal(k_s, (N_POINTS, S_IN), jnp.float32)
    pos = jax.random.normal(k_pos, (N_POINTS, 3), jnp.float32)
    scale0_sampling_index = jnp.arange(0, N_POINTS, 2, dtype=jnp.int32)   # (8,)

    params = init_params(k_p, C_IN, S_IN, C_LAT, D_MODEL, NUM_HEADS)

    fwd = jax.jit(functools.partial(cross_attention_tokeniser_forward,
                                    num_heads=NUM_HEADS, c_lat=C_LAT, d_model=D_MODEL))
    mv_out, s_out, ref_out = fwd(multivectors, scalars, pos,
                                 scale0_sampling_index, params)
    jax.block_until_ready((mv_out, s_out, ref_out))

    assert mv_out.shape == (N_SAMPLED, D_MODEL, 16)
    assert s_out.shape == (N_SAMPLED, S_IN)
    assert ref_out.shape == (N_SAMPLED, 1, 16)
    assert bool(jnp.all(jnp.isfinite(mv_out))) and bool(jnp.all(jnp.isfinite(s_out)))
    print("KERNEL_OK")
</pallas_src>

<mosaic_0001>
module attributes {stable_mosaic.version = 11 : i64} {
  func.func @_attn_block_kernel(%arg0: i32, %arg1: memref<16x256xf32, #tpu.memory_space<vmem>>, %arg2: memref<8x256xf32, #tpu.memory_space<vmem>>, %arg3: memref<256x256xbf16, #tpu.memory_space<vmem>>, %arg4: memref<256x512xbf16, #tpu.memory_space<vmem>>, %arg5: memref<256x256xbf16, #tpu.memory_space<vmem>>, %arg6: memref<256x512xbf16, #tpu.memory_space<vmem>>, %arg7: memref<1x512xf32, #tpu.memory_space<vmem>>, %arg8: memref<512x256xbf16, #tpu.memory_space<vmem>>, %arg9: memref<1x256xf32, #tpu.memory_space<vmem>>, %arg10: memref<8x256xf32, #tpu.memory_space<vmem>>) attributes {dimension_semantics = [#tpu.dimension_semantics<parallel>], iteration_bounds = array<i64: 1>, scalar_prefetch = 0 : i64, scratch_operands = 0 : i64, tpu.core_type = #tpu.core_type<tc>, window_params = [{pipeline_mode = #tpu.pipeline_mode<synchronous>, transform_indices = @transform_0, window_bounds = array<i64: 16, 256>}, {transform_indices = @transform_1, window_bounds = array<i64: 8, 256>}, {pipeline_mode = #tpu.pipeline_mode<synchronous>, transform_indices = @transform_2, window_bounds = array<i64: 256, 256>}, {pipeline_mode = #tpu.pipeline_mode<synchronous>, transform_indices = @transform_3, window_bounds = array<i64: 256, 512>}, {pipeline_mode = #tpu.pipeline_mode<synchronous>, transform_indices = @transform_4, window_bounds = array<i64: 256, 256>}, {pipeline_mode = #tpu.pipeline_mode<synchronous>, transform_indices = @transform_5, window_bounds = array<i64: 256, 512>}, {pipeline_mode = #tpu.pipeline_mode<synchronous>, transform_indices = @transform_6, window_bounds = array<i64: 1, 512>}, {pipeline_mode = #tpu.pipeline_mode<synchronous>, transform_indices = @transform_7, window_bounds = array<i64: 512, 256>}, {pipeline_mode = #tpu.pipeline_mode<synchronous>, transform_indices = @transform_8, window_bounds = array<i64: 1, 256>}, {transform_indices = @transform_9, window_bounds = array<i64: 8, 256>}]} {
    %c0 = arith.constant 0 : index
    %c0_0 = arith.constant 0 : index
    %0 = vector.load %arg1[%c0, %c0_0] : memref<16x256xf32, #tpu.memory_space<vmem>>, vector<16x256xf32>
    %c0_1 = arith.constant 0 : index
    %c0_2 = arith.constant 0 : index
    %1 = vector.load %arg2[%c0_1, %c0_2] : memref<8x256xf32, #tpu.memory_space<vmem>>, vector<8x256xf32>
    %2 = arith.mulf %0, %0 : vector<16x256xf32>
    %cst = arith.constant dense<0.000000e+00> : vector<16xf32>
    %3 = vector.multi_reduction <add>, %2, %cst [1] : vector<16x256xf32> to vector<16xf32>
    %4 = vector.shape_cast %3 : vector<16xf32> to vector<16x1xf32>
    %cst_3 = arith.constant 0.0075757578 : f32
    %5 = vector.broadcast %cst_3 : f32 to vector<16x1xf32>
    %6 = arith.mulf %4, %5 : vector<16x1xf32>
    %cst_4 = arith.constant 9.99999997E-7 : f32
    %7 = vector.broadcast %cst_4 : f32 to vector<16x1xf32>
    %8 = arith.addf %6, %7 : vector<16x1xf32>
    %9 = math.rsqrt %8 : vector<16x1xf32>
    %10 = vector.broadcast %9 : vector<16x1xf32> to vector<16x256xf32>
    %11 = arith.mulf %0, %10 : vector<16x256xf32>
    %12 = arith.truncf %11 : vector<16x256xf32> to vector<16x256xbf16>
    %13 = arith.mulf %1, %1 : vector<8x256xf32>
    %cst_5 = arith.constant dense<0.000000e+00> : vector<8xf32>
    %14 = vector.multi_reduction <add>, %13, %cst_5 [1] : vector<8x256xf32> to vector<8xf32>
    %15 = vector.shape_cast %14 : vector<8xf32> to vector<8x1xf32>
    %cst_6 = arith.constant 0.0075757578 : f32
    %16 = vector.broadcast %cst_6 : f32 to vector<8x1xf32>
    %17 = arith.mulf %15, %16 : vector<8x1xf32>
    %cst_7 = arith.constant 9.99999997E-7 : f32
    %18 = vector.broadcast %cst_7 : f32 to vector<8x1xf32>
    %19 = arith.addf %17, %18 : vector<8x1xf32>
    %20 = math.rsqrt %19 : vector<8x1xf32>
    %21 = vector.broadcast %20 : vector<8x1xf32> to vector<8x256xf32>
    %22 = arith.mulf %1, %21 : vector<8x256xf32>
    %23 = arith.truncf %22 : vector<8x256xf32> to vector<8x256xbf16>
    %c0_8 = arith.constant 0 : index
    %c0_9 = arith.constant 0 : index
    %24 = vector.load %arg3[%c0_8, %c0_9] : memref<256x256xbf16, #tpu.memory_space<vmem>>, vector<256x256xbf16>
    %cst_10 = arith.constant dense<0.000000e+00> : vector<8x256xf32>
    %25 = tpu.matmul %23, %24, %cst_10 {dimension_numbers = #tpu.dot_dimension_numbers<[1], [0], [0], [1], [0, 0, 1, 1], [], []>} : vector<8x256xbf16>, vector<256x256xbf16>, vector<8x256xf32> -> vector<8x256xf32>
    %26 = arith.truncf %25 : vector<8x256xf32> to vector<8x256xbf16>
    %c0_11 = arith.constant 0 : index
    %c0_12 = arith.constant 0 : index
    %27 = vector.load %arg4[%c0_11, %c0_12] : memref<256x512xbf16, #tpu.memory_space<vmem>>, vector<256x512xbf16>
    %cst_13 = arith.constant dense<0.000000e+00> : vector<16x512xf32>
    %28 = tpu.matmul %12, %27, %cst_13 {dimension_numbers = #tpu.dot_dimension_numbers<[1], [0], [0], [1], [0, 0, 1, 1], [], []>} : vector<16x256xbf16>, vector<256x512xbf16>, vector<16x512xf32> -> vector<16x512xf32>
    %29 = vector.extract_strided_slice %28 {offsets = [0, 0], sizes = [16, 256], strides = [1, 1]} : vector<16x512xf32> to vector<16x256xf32>
    %30 = arith.truncf %29 : vector<16x256xf32> to vector<16x256xbf16>
    %31 = vector.extract_strided_slice %28 {offsets = [0, 256], sizes = [16, 256], strides = [1, 1]} : vector<16x512xf32> to vector<16x256xf32>
    %32 = arith.truncf %31 : vector<16x256xf32> to vector<16x256xbf16>
    %33 = vector.extract_strided_slice %26 {offsets = [0, 0], sizes = [8, 128], strides = [1, 1]} : vector<8x256xbf16> to vector<8x128xbf16>
    %34 = vector.extract_strided_slice %30 {offsets = [0, 0], sizes = [16, 128], strides = [1, 1]} : vector<16x256xbf16> to vector<16x128xbf16>
    %cst_14 = arith.constant dense<0.000000e+00> : vector<8x16xf32>
    %35 = tpu.matmul %33, %34, %cst_14 {dimension_numbers = #tpu.dot_dimension_numbers<[1], [1], [0], [0], [0, 0, 1, 0], [], []>} : vector<8x128xbf16>, vector<16x128xbf16>, vector<8x16xf32> -> vector<8x16xf32>
    %cst_15 = arith.constant dense<0xFF800000> : vector<8xf32>
    %36 = vector.multi_reduction <maximumf>, %35, %cst_15 [1] : vector<8x16xf32> to vector<8xf32>
    %37 = vector.shape_cast %36 : vector<8xf32> to vector<8x1xf32>
    %38 = vector.broadcast %37 : vector<8x1xf32> to vector<8x16xf32>
    %39 = arith.subf %35, %38 : vector<8x16xf32>
    %40 = math.exp %39 : vector<8x16xf32>
    %cst_16 = arith.constant dense<0.000000e+00> : vector<8xf32>
    %41 = vector.multi_reduction <add>, %40, %cst_16 [1] : vector<8x16xf32> to vector<8xf32>
    %42 = vector.shape_cast %41 : vector<8xf32> to vector<8x1xf32>
    %43 = arith.truncf %40 : vector<8x16xf32> to vector<8x16xbf16>
    %44 = vector.extract_strided_slice %32 {offsets = [0, 0], sizes = [16, 128], strides = [1, 1]} : vector<16x256xbf16> to vector<16x128xbf16>
    %cst_17 = arith.constant dense<0.000000e+00> : vector<8x128xf32>
    %45 = tpu.matmul %43, %44, %cst_17 {dimension_numbers = #tpu.dot_dimension_numbers<[1], [0], [0], [1], [0, 0, 1, 1], [], []>} : vector<8x16xbf16>, vector<16x128xbf16>, vector<8x128xf32> -> vector<8x128xf32>
    %46 = tpu.reciprocal %42 {approx = true} : vector<8x1xf32> -> vector<8x1xf32>
    %47 = vector.broadcast %46 : vector<8x1xf32> to vector<8x128xf32>
    %48 = arith.mulf %45, %47 : vector<8x128xf32>
    %49 = vector.extract_strided_slice %26 {offsets = [0, 128], sizes = [8, 128], strides = [1, 1]} : vector<8x256xbf16> to vector<8x128xbf16>
    %50 = vector.extract_strided_slice %30 {offsets = [0, 128], sizes = [16, 128], strides = [1, 1]} : vector<16x256xbf16> to vector<16x128xbf16>
    %cst_18 = arith.constant dense<0.000000e+00> : vector<8x16xf32>
    %51 = tpu.matmul %49, %50, %cst_18 {dimension_numbers = #tpu.dot_dimension_numbers<[1], [1], [0], [0], [0, 0, 1, 0], [], []>} : vector<8x128xbf16>, vector<16x128xbf16>, vector<8x16xf32> -> vector<8x16xf32>
    %cst_19 = arith.constant dense<0xFF800000> : vector<8xf32>
    %52 = vector.multi_reduction <maximumf>, %51, %cst_19 [1] : vector<8x16xf32> to vector<8xf32>
    %53 = vector.shape_cast %52 : vector<8xf32> to vector<8x1xf32>
    %54 = vector.broadcast %53 : vector<8x1xf32> to vector<8x16xf32>
    %55 = arith.subf %51, %54 : vector<8x16xf32>
    %56 = math.exp %55 : vector<8x16xf32>
    %cst_20 = arith.constant dense<0.000000e+00> : vector<8xf32>
    %57 = vector.multi_reduction <add>, %56, %cst_20 [1] : vector<8x16xf32> to vector<8xf32>
    %58 = vector.shape_cast %57 : vector<8xf32> to vector<8x1xf32>
    %59 = arith.truncf %56 : vector<8x16xf32> to vector<8x16xbf16>
    %60 = vector.extract_strided_slice %32 {offsets = [0, 128], sizes = [16, 128], strides = [1, 1]} : vector<16x256xbf16> to vector<16x128xbf16>
    %cst_21 = arith.constant dense<0.000000e+00> : vector<8x128xf32>
    %61 = tpu.matmul %59, %60, %cst_21 {dimension_numbers = #tpu.dot_dimension_numbers<[1], [0], [0], [1], [0, 0, 1, 1], [], []>} : vector<8x16xbf16>, vector<16x128xbf16>, vector<8x128xf32> -> vector<8x128xf32>
    %62 = tpu.reciprocal %58 {approx = true} : vector<8x1xf32> -> vector<8x1xf32>
    %63 = vector.broadcast %62 : vector<8x1xf32> to vector<8x128xf32>
    %64 = arith.mulf %61, %63 : vector<8x128xf32>
    %65 = tpu.concatenate %48, %64 in 1 : vector<8x128xf32>, vector<8x128xf32> -> vector<8x256xf32>
    %66 = arith.truncf %65 : vector<8x256xf32> to vector<8x256xbf16>
    %c0_22 = arith.constant 0 : index
    %c0_23 = arith.constant 0 : index
    %67 = vector.load %arg5[%c0_22, %c0_23] : memref<256x256xbf16, #tpu.memory_space<vmem>>, vector<256x256xbf16>
    %cst_24 = arith.constant dense<0.000000e+00> : vector<8x256xf32>
    %68 = tpu.matmul %66, %67, %cst_24 {dimension_numbers = #tpu.dot_dimension_numbers<[1], [0], [0], [1], [0, 0, 1, 1], [], []>} : vector<8x256xbf16>, vector<256x256xbf16>, vector<8x256xf32> -> vector<8x256xf32>
    %69 = arith.addf %1, %68 : vector<8x256xf32>
    %70 = arith.mulf %69, %69 : vector<8x256xf32>
    %cst_25 = arith.constant dense<0.000000e+00> : vector<8xf32>
    %71 = vector.multi_reduction <add>, %70, %cst_25 [1] : vector<8x256xf32> to vector<8xf32>
    %72 = vector.shape_cast %71 : vector<8xf32> to vector<8x1xf32>
    %cst_26 = arith.constant 0.0075757578 : f32
    %73 = vector.broadcast %cst_26 : f32 to vector<8x1xf32>
    %74 = arith.mulf %72, %73 : vector<8x1xf32>
    %cst_27 = arith.constant 9.99999997E-7 : f32
    %75 = vector.broadcast %cst_27 : f32 to vector<8x1xf32>
    %76 = arith.addf %74, %75 : vector<8x1xf32>
    %77 = math.rsqrt %76 : vector<8x1xf32>
    %78 = vector.broadcast %77 : vector<8x1xf32> to vector<8x256xf32>
    %79 = arith.mulf %69, %78 : vector<8x256xf32>
    %80 = arith.truncf %79 : vector<8x256xf32> to vector<8x256xbf16>
    %c0_28 = arith.constant 0 : index
    %c0_29 = arith.constant 0 : index
    %81 = vector.load %arg6[%c0_28, %c0_29] : memref<256x512xbf16, #tpu.memory_space<vmem>>, vector<256x512xbf16>
    %cst_30 = arith.constant dense<0.000000e+00> : vector<8x512xf32>
    %82 = tpu.matmul %80, %81, %cst_30 {dimension_numbers = #tpu.dot_dimension_numbers<[1], [0], [0], [1], [0, 0, 1, 1], [], []>} : vector<8x256xbf16>, vector<256x512xbf16>, vector<8x512xf32> -> vector<8x512xf32>
    %c0_31 = arith.constant 0 : index
    %c0_32 = arith.constant 0 : index
    %83 = vector.load %arg7[%c0_31, %c0_32] : memref<1x512xf32, #tpu.memory_space<vmem>>, vector<1x512xf32>
    %84 = vector.broadcast %83 : vector<1x512xf32> to vector<8x512xf32>
    %85 = arith.addf %82, %84 : vector<8x512xf32>
    %86 = arith.mulf %85, %85 : vector<8x512xf32>
    %87 = arith.mulf %85, %86 : vector<8x512xf32>
    %cst_33 = arith.constant 4.471500e-02 : f32
    %88 = vector.broadcast %cst_33 : f32 to vector<8x512xf32>
    %89 = arith.mulf %88, %87 : vector<8x512xf32>
    %90 = arith.addf %85, %89 : vector<8x512xf32>
    %cst_34 = arith.constant 0.797884583 : f32
    %91 = vector.broadcast %cst_34 : f32 to vector<8x512xf32>
    %92 = arith.mulf %91, %90 : vector<8x512xf32>
    %93 = math.tanh %92 : vector<8x512xf32>
    %cst_35 = arith.constant 1.000000e+00 : f32
    %94 = vector.broadcast %cst_35 : f32 to vector<8x512xf32>
    %95 = arith.addf %94, %93 : vector<8x512xf32>
    %cst_36 = arith.constant 5.000000e-01 : f32
    %96 = vector.broadcast %cst_36 : f32 to vector<8x512xf32>
    %97 = arith.mulf %96, %95 : vector<8x512xf32>
    %98 = arith.mulf %85, %97 : vector<8x512xf32>
    %99 = arith.truncf %98 : vector<8x512xf32> to vector<8x512xbf16>
    %c0_37 = arith.constant 0 : index
    %c0_38 = arith.constant 0 : index
    %100 = vector.load %arg8[%c0_37, %c0_38] : memref<512x256xbf16, #tpu.memory_space<vmem>>, vector<512x256xbf16>
    %cst_39 = arith.constant dense<0.000000e+00> : vector<8x256xf32>
    %101 = tpu.matmul %99, %100, %cst_39 {dimension_numbers = #tpu.dot_dimension_numbers<[1], [0], [0], [1], [0, 0, 1, 1], [], []>} : vector<8x512xbf16>, vector<512x256xbf16>, vector<8x256xf32> -> vector<8x256xf32>
    %c0_40 = arith.constant 0 : index
    %c0_41 = arith.constant 0 : index
    %102 = vector.load %arg9[%c0_40, %c0_41] : memref<1x256xf32, #tpu.memory_space<vmem>>, vector<1x256xf32>
    %103 = vector.broadcast %102 : vector<1x256xf32> to vector<8x256xf32>
    %104 = arith.addf %101, %103 : vector<8x256xf32>
    %105 = arith.addf %69, %104 : vector<8x256xf32>
    %c0_42 = arith.constant 0 : index
    %c0_43 = arith.constant 0 : index
    %106 = vector.load %arg10[%c0_42, %c0_43] : memref<8x256xf32, #tpu.memory_space<vmem>>, vector<8x256xf32>
    tpu.vector_store %arg10[%c0_42, %c0_43], %105 {strides = array<i32>} : memref<8x256xf32, #tpu.memory_space<vmem>>, vector<8x256xf32>,
    return
  }
  func.func @transform_0(%arg0: i32) -> (i32, i32) {
    %c0_i32 = arith.constant 0 : i32
    %c0_i32_0 = arith.constant 0 : i32
    %c0_i32_1 = arith.constant 0 : i32
    return %c0_i32, %c0_i32_0 : i32, i32
  }
  func.func @transform_1(%arg0: i32) -> (i32, i32) {
    %c0_i32 = arith.constant 0 : i32
    %c0_i32_0 = arith.constant 0 : i32
    return %arg0, %c0_i32 : i32, i32
  }
  func.func @transform_2(%arg0: i32) -> (i32, i32) {
    %c0_i32 = arith.constant 0 : i32
    %c0_i32_0 = arith.constant 0 : i32
    %c0_i32_1 = arith.constant 0 : i32
    return %c0_i32, %c0_i32_0 : i32, i32
  }
  func.func @transform_3(%arg0: i32) -> (i32, i32) {
    %c0_i32 = arith.constant 0 : i32
    %c0_i32_0 = arith.constant 0 : i32
    %c0_i32_1 = arith.constant 0 : i32
    return %c0_i32, %c0_i32_0 : i32, i32
  }
  func.func @transform_4(%arg0: i32) -> (i32, i32) {
    %c0_i32 = arith.constant 0 : i32
    %c0_i32_0 = arith.constant 0 : i32
    %c0_i32_1 = arith.constant 0 : i32
    return %c0_i32, %c0_i32_0 : i32, i32
  }
  func.func @transform_5(%arg0: i32) -> (i32, i32) {
    %c0_i32 = arith.constant 0 : i32
    %c0_i32_0 = arith.constant 0 : i32
    %c0_i32_1 = arith.constant 0 : i32
    return %c0_i32, %c0_i32_0 : i32, i32
  }
  func.func @transform_6(%arg0: i32) -> (i32, i32) {
    %c0_i32 = arith.constant 0 : i32
    %c0_i32_0 = arith.constant 0 : i32
    %c0_i32_1 = arith.constant 0 : i32
    return %c0_i32, %c0_i32_0 : i32, i32
  }
  func.func @transform_7(%arg0: i32) -> (i32, i32) {
    %c0_i32 = arith.constant 0 : i32
    %c0_i32_0 = arith.constant 0 : i32
    %c0_i32_1 = arith.constant 0 : i32
    return %c0_i32, %c0_i32_0 : i32, i32
  }
  func.func @transform_8(%arg0: i32) -> (i32, i32) {
    %c0_i32 = arith.constant 0 : i32
    %c0_i32_0 = arith.constant 0 : i32
    %c0_i32_1 = arith.constant 0 : i32
    return %c0_i32, %c0_i32_0 : i32, i32
  }
  func.func @transform_9(%arg0: i32) -> (i32, i32) {
    %c0_i32 = arith.constant 0 : i32
    %c0_i32_0 = arith.constant 0 : i32
    return %arg0, %c0_i32 : i32, i32
  }
}

module attributes {stable_mosaic.version = 11 : i64} {
  func.func @_linear_kernel(%arg0: i32, %arg1: i32, %arg2: i32, %arg3: memref<8x256xf32, #tpu.memory_space<vmem>>, %arg4: memref<256x256xbf16, #tpu.memory_space<vmem>>, %arg5: memref<1x256xf32, #tpu.memory_space<vmem>>, %arg6: memref<8x256xf32, #tpu.memory_space<vmem>>, %arg7: memref<8x256xf32, #tpu.memory_space<vmem>>) attributes {dimension_semantics = [#tpu.dimension_semantics<parallel>, #tpu.dimension_semantics<parallel>, #tpu.dimension_semantics<arbitrary>], iteration_bounds = array<i64: 1, 1, 1>, scalar_prefetch = 0 : i64, scratch_operands = 1 : i64, tpu.core_type = #tpu.core_type<tc>, window_params = [{transform_indices = @transform_0, window_bounds = array<i64: 8, 256>}, {transform_indices = @transform_1, window_bounds = array<i64: 256, 256>}, {transform_indices = @transform_2, window_bounds = array<i64: 1, 256>}, {transform_indices = @transform_3, window_bounds = array<i64: 8, 256>}]} {
    %c0_i32 = arith.constant 0 : i32
    %0 = arith.cmpi eq, %arg2, %c0_i32 : i32
    %1 = arith.extui %0 : i1 to i32
    %c0_i32_0 = arith.constant 0 : i32
    %2 = arith.cmpi ne, %1, %c0_i32_0 : i32
    scf.if %2 {
      %cst_10 = arith.constant 0.000000e+00 : f32
      %13 = vector.broadcast %cst_10 : f32 to vector<8x256xf32>
      %c0_11 = arith.constant 0 : index
      %c0_12 = arith.constant 0 : index
      %14 = vector.load %arg7[%c0_11, %c0_12] : memref<8x256xf32, #tpu.memory_space<vmem>>, vector<8x256xf32>
      tpu.vector_store %arg7[%c0_11, %c0_12], %13 {strides = array<i32>} : memref<8x256xf32, #tpu.memory_space<vmem>>, vector<8x256xf32>,
    } else {
    }
    %c0 = arith.constant 0 : index
    %c0_1 = arith.constant 0 : index
    %3 = vector.load %arg7[%c0, %c0_1] : memref<8x256xf32, #tpu.memory_space<vmem>>, vector<8x256xf32>
    %c0_2 = arith.constant 0 : index
    %c0_3 = arith.constant 0 : index
    %4 = vector.load %arg3[%c0_2, %c0_3] : memref<8x256xf32, #tpu.memory_space<vmem>>, vector<8x256xf32>
    %5 = arith.truncf %4 : vector<8x256xf32> to vector<8x256xbf16>
    %c0_4 = arith.constant 0 : index
    %c0_5 = arith.constant 0 : index
    %6 = vector.load %arg4[%c0_4, %c0_5] : memref<256x256xbf16, #tpu.memory_space<vmem>>, vector<256x256xbf16>
    %cst = arith.constant dense<0.000000e+00> : vector<8x256xf32>
    %7 = tpu.matmul %5, %6, %cst {dimension_numbers = #tpu.dot_dimension_numbers<[1], [0], [0], [1], [0, 0, 1, 1], [], []>} : vector<8x256xbf16>, vector<256x256xbf16>, vector<8x256xf32> -> vector<8x256xf32>
    %8 = arith.addf %3, %7 : vector<8x256xf32>
    %c0_6 = arith.constant 0 : index
    %c0_7 = arith.constant 0 : index
    %9 = vector.load %arg7[%c0_6, %c0_7] : memref<8x256xf32, #tpu.memory_space<vmem>>, vector<8x256xf32>
    tpu.vector_store %arg7[%c0_6, %c0_7], %8 {strides = array<i32>} : memref<8x256xf32, #tpu.memory_space<vmem>>, vector<8x256xf32>,
    %c0_i32_8 = arith.constant 0 : i32
    %10 = arith.cmpi eq, %arg2, %c0_i32_8 : i32
    %11 = arith.extui %10 : i1 to i32
    %c0_i32_9 = arith.constant 0 : i32
    %12 = arith.cmpi ne, %11, %c0_i32_9 : i32
    scf.if %12 {
      %c0_10 = arith.constant 0 : index
      %c0_11 = arith.constant 0 : index
      %13 = vector.load %arg7[%c0_10, %c0_11] : memref<8x256xf32, #tpu.memory_space<vmem>>, vector<8x256xf32>
      %c0_12 = arith.constant 0 : index
      %c0_13 = arith.constant 0 : index
      %14 = vector.load %arg5[%c0_12, %c0_13] : memref<1x256xf32, #tpu.memory_space<vmem>>, vector<1x256xf32>
      %15 = vector.broadcast %14 : vector<1x256xf32> to vector<8x256xf32>
      %16 = arith.addf %13, %15 : vector<8x256xf32>
      %c0_14 = arith.constant 0 : index
      %c0_15 = arith.constant 0 : index
      %17 = vector.load %arg6[%c0_14, %c0_15] : memref<8x256xf32, #tpu.memory_space<vmem>>, vector<8x256xf32>
      tpu.vector_store %arg6[%c0_14, %c0_15], %16 {strides = array<i32>} : memref<8x256xf32, #tpu.memory_space<vmem>>, vector<8x256xf32>,
    } else {
    }
    return
  }
  func.func @transform_0(%arg0: i32, %arg1: i32, %arg2: i32) -> (i32, i32) {
    %c0_i32 = arith.constant 0 : i32
    return %arg0, %arg2 : i32, i32
  }
  func.func @transform_1(%arg0: i32, %arg1: i32, %arg2: i32) -> (i32, i32) {
    %c0_i32 = arith.constant 0 : i32
    return %arg2, %arg1 : i32, i32
  }
  func.func @transform_2(%arg0: i32, %arg1: i32, %arg2: i32) -> (i32, i32) {
    %c0_i32 = arith.constant 0 : i32
    %c0_i32_0 = arith.constant 0 : i32
    return %c0_i32, %arg1 : i32, i32
  }
  func.func @transform_3(%arg0: i32, %arg1: i32, %arg2: i32) -> (i32, i32) {
    %c0_i32 = arith.constant 0 : i32
    return %arg0, %arg1 : i32, i32
  }
}

module attributes {stable_mosaic.version = 11 : i64} {
  func.func @_linear_kernel(%arg0: i32, %arg1: i32, %arg2: i32, %arg3: memref<16x128xf32, #tpu.memory_space<vmem>>, %arg4: memref<128x256xbf16, #tpu.memory_space<vmem>>, %arg5: memref<1x256xf32, #tpu.memory_space<vmem>>, %arg6: memref<16x256xf32, #tpu.memory_space<vmem>>, %arg7: memref<16x256xf32, #tpu.memory_space<vmem>>) attributes {dimension_semantics = [#tpu.dimension_semantics<parallel>, #tpu.dimension_semantics<parallel>, #tpu.dimension_semantics<arbitrary>], iteration_bounds = array<i64: 1, 1, 1>, scalar_prefetch = 0 : i64, scratch_operands = 1 : i64, tpu.core_type = #tpu.core_type<tc>, window_params = [{transform_indices = @transform_0, window_bounds = array<i64: 16, 128>}, {transform_indices = @transform_1, window_bounds = array<i64: 128, 256>}, {transform_indices = @transform_2, window_bounds = array<i64: 1, 256>}, {transform_indices = @transform_3, window_bounds = array<i64: 16, 256>}]} {
    %c0_i32 = arith.constant 0 : i32
    %0 = arith.cmpi eq, %arg2, %c0_i32 : i32
    %1 = arith.extui %0 : i1 to i32
    %c0_i32_0 = arith.constant 0 : i32
    %2 = arith.cmpi ne, %1, %c0_i32_0 : i32
    scf.if %2 {
      %cst_10 = arith.constant 0.000000e+00 : f32
      %13 = vector.broadcast %cst_10 : f32 to vector<16x256xf32>
      %c0_11 = arith.constant 0 : index
      %c0_12 = arith.constant 0 : index
      %14 = vector.load %arg7[%c0_11, %c0_12] : memref<16x256xf32, #tpu.memory_space<vmem>>, vector<16x256xf32>
      tpu.vector_store %arg7[%c0_11, %c0_12], %13 {strides = array<i32>} : memref<16x256xf32, #tpu.memory_space<vmem>>, vector<16x256xf32>,
    } else {
    }
    %c0 = arith.constant 0 : index
    %c0_1 = arith.constant 0 : index
    %3 = vector.load %arg7[%c0, %c0_1] : memref<16x256xf32, #tpu.memory_space<vmem>>, vector<16x256xf32>
    %c0_2 = arith.constant 0 : index
    %c0_3 = arith.constant 0 : index
    %4 = vector.load %arg3[%c0_2, %c0_3] : memref<16x128xf32, #tpu.memory_space<vmem>>, vector<16x128xf32>
    %5 = arith.truncf %4 : vector<16x128xf32> to vector<16x128xbf16>
    %c0_4 = arith.constant 0 : index
    %c0_5 = arith.constant 0 : index
    %6 = vector.load %arg4[%c0_4, %c0_5] : memref<128x256xbf16, #tpu.memory_space<vmem>>, vector<128x256xbf16>
    %cst = arith.constant dense<0.000000e+00> : vector<16x256xf32>
    %7 = tpu.matmul %5, %6, %cst {dimension_numbers = #tpu.dot_dimension_numbers<[1], [0], [0], [1], [0, 0, 1, 1], [], []>} : vector<16x128xbf16>, vector<128x256xbf16>, vector<16x256xf32> -> vector<16x256xf32>
    %8 = arith.addf %3, %7 : vector<16x256xf32>
    %c0_6 = arith.constant 0 : index
    %c0_7 = arith.constant 0 : index
    %9 = vector.load %arg7[%c0_6, %c0_7] : memref<16x256xf32, #tpu.memory_space<vmem>>, vector<16x256xf32>
    tpu.vector_store %arg7[%c0_6, %c0_7], %8 {strides = array<i32>} : memref<16x256xf32, #tpu.memory_space<vmem>>, vector<16x256xf32>,
    %c0_i32_8 = arith.constant 0 : i32
    %10 = arith.cmpi eq, %arg2, %c0_i32_8 : i32
    %11 = arith.extui %10 : i1 to i32
    %c0_i32_9 = arith.constant 0 : i32
    %12 = arith.cmpi ne, %11, %c0_i32_9 : i32
    scf.if %12 {
      %c0_10 = arith.constant 0 : index
      %c0_11 = arith.constant 0 : index
      %13 = vector.load %arg7[%c0_10, %c0_11] : memref<16x256xf32, #tpu.memory_space<vmem>>, vector<16x256xf32>
      %c0_12 = arith.constant 0 : index
      %c0_13 = arith.constant 0 : index
      %14 = vector.load %arg5[%c0_12, %c0_13] : memref<1x256xf32, #tpu.memory_space<vmem>>, vector<1x256xf32>
      %15 = vector.broadcast %14 : vector<1x256xf32> to vector<16x256xf32>
      %16 = arith.addf %13, %15 : vector<16x256xf32>
      %c0_14 = arith.constant 0 : index
      %c0_15 = arith.constant 0 : index
      %17 = vector.load %arg6[%c0_14, %c0_15] : memref<16x256xf32, #tpu.memory_space<vmem>>, vector<16x256xf32>
      tpu.vector_store %arg6[%c0_14, %c0_15], %16 {strides = array<i32>} : memref<16x256xf32, #tpu.memory_space<vmem>>, vector<16x256xf32>,
    } else {
    }
    return
  }
  func.func @transform_0(%arg0: i32, %arg1: i32, %arg2: i32) -> (i32, i32) {
    %c0_i32 = arith.constant 0 : i32
    return %arg0, %arg2 : i32, i32
  }
  func.func @transform_1(%arg0: i32, %arg1: i32, %arg2: i32) -> (i32, i32) {
    %c0_i32 = arith.constant 0 : i32
    return %arg2, %arg1 : i32, i32
  }
  func.func @transform_2(%arg0: i32, %arg1: i32, %arg2: i32) -> (i32, i32) {
    %c0_i32 = arith.constant 0 : i32
    %c0_i32_0 = arith.constant 0 : i32
    return %c0_i32, %arg1 : i32, i32
  }
  func.func @transform_3(%arg0: i32, %arg1: i32, %arg2: i32) -> (i32, i32) {
    %c0_i32 = arith.constant 0 : i32
    return %arg0, %arg1 : i32, i32
  }
}

</mosaic_0001>

<bundles_post_ra>
// kernel: cross_attention_tokeniser_forward.3
= control target key start
LH: loop header
LB: loop body
LE: loop exit
PB: predicated region body
PF: predicated region fallthrough
CT: control target
= control target key end

     0   :  { %8 = vsyncpa [#allocation4], 0  ;;  %s312_s15 = smov [#allocation3]   ;;  %s313_s17 = smov 128   ;;  %s359_s0 = inlined_call_operand.vmem [shape: f32[16,128], index: 0, kind: input, shape index: {}]   ;;  %s360_s1 = inlined_call_operand.hbm [shape: bf16[128,256], index: 1, kind: input, shape index: {}]   ;;  %s361_s2 = inlined_call_operand.vmem [shape: f32[1,256], index: 2, kind: input, shape index: {}]   ;;  %s362_s3 = inlined_call_operand.vmem [shape: f32[16,256], index: 3, kind: output, shape index: {}]  }
   0x1   :  { %s15_s14 = sshll.u32 %s360_s1, 4  ;;  %s17_s16 = sshll.u32 %s312_s15, 4  ;;  %s16_s14 = int_to_ptr.hbm [resolvable:$true] %s15_s14  ;;  %s18_s16 = int_to_ptr.vmem [resolvable:$true] %s17_s16 }
   0x2   :  { %s314_s18 = smov 8  }
   0x3   :  { %23 = dma.hbm_to_vmem [thread:$0]  %s16_s14, 2048, %s18_s16, [#allocation4], %s313_s17, %s313_s17, %s314_s18  }
   0x4   :  { %310 = dma.done.wait [#allocation4], 2048  }
   0x5   :  { %311 = vsyncadd [#allocation4], 4294965248  ;;  %v261_v0 = vld [vmem:[#allocation3 + $0x70] sm:$0xf]  ;;  %v282_v1 = vld [vmem:[#allocation3 + $0x74] sm:$0xf0] }
   0x6   :  { %v281_v2 = vld [vmem:[#allocation3 + $0x74] sm:$0xf]  ;;  %v262_v3 = vor.u32 %v282_v1, %v261_v0  ;;  %v263_v4 = vld [vmem:[#allocation3 + $0x78] sm:$0xf0]  ;;  %v253_v5 = vld [vmem:[#allocation3 + $0x60] sm:$0xf] }
   0x7   :  { %v280_v6 = vld [vmem:[#allocation3 + $0x64] sm:$0xf0]  ;;  %v266_v7 = vor.u32 %v281_v2, %v263_v4  ;;  %v279_v8 = vld [vmem:[#allocation3 + $0x64] sm:$0xf]  ;;  %v255_v9 = vld [vmem:[#allocation3 + $0x68] sm:$0xf0] }
   0x8   :  { %141 = vmatpush.bf16.msra.mxu0 %v262_v3  ;;  %v254_v10 = vor.u32 %v280_v6, %v253_v5  ;;  %v258_v11 = vor.u32 %v279_v8, %v255_v9  ;;  %v245_v12 = vld [vmem:[#allocation3 + $0x50] sm:$0xf]  ;;  %v278_v13 = vld [vmem:[#allocation3 + $0x54] sm:$0xf0]  ;;  %v277_v14 = vld [vmem:[#allocation3 + $0x54] sm:$0xf] }
   0x9   :  { %155 = vmatpush.bf16.msra.mxu1 %v266_v7  ;;  %v247_v15 = vld [vmem:[#allocation3 + $0x58] sm:$0xf0]  ;;  %v246_v16 = vor.u32 %v278_v13, %v245_v12  ;;  %v237_v18 = vld [vmem:[#allocation3 + $0x40] sm:$0xf]  ;;  %v276_v19 = vld [vmem:[#allocation3 + $0x44] sm:$0xf0] }
   0xa   :  { %v250_v17 = vor.u32 %v277_v14, %v247_v15  ;;  %v275_v20 = vld [vmem:[#allocation3 + $0x44] sm:$0xf]  ;;  %v239_v21 = vld [vmem:[#allocation3 + $0x48] sm:$0xf0]  ;;  %v238_v22 = vor.u32 %v276_v19, %v237_v18  ;;  %v229_v24 = vld [vmem:[#allocation3 + $0x30] sm:$0xf] }
   0xb   :  { %v242_v23 = vor.u32 %v275_v20, %v239_v21  ;;  %v274_v25 = vld [vmem:[#allocation3 + $0x34] sm:$0xf0]  ;;  %v273_v26 = vld [vmem:[#allocation3 + $0x34] sm:$0xf]  ;;  %v231_v27 = vld [vmem:[#allocation3 + $0x38] sm:$0xf0] }
   0xc   :  { %142 = vmatpush.bf16.msra.mxu0 %v254_v10  ;;  %v230_v28 = vor.u32 %v274_v25, %v229_v24  ;;  %v234_v29 = vor.u32 %v273_v26, %v231_v27  ;;  %v221_v30 = vld [vmem:[#allocation3 + $0x20] sm:$0xf]  ;;  %v272_v31 = vld [vmem:[#allocation3 + $0x24] sm:$0xf0]  ;;  %v271_v32 = vld [vmem:[#allocation3 + $0x24] sm:$0xf] }
   0xd   :  { %156 = vmatpush.bf16.msra.mxu1 %v258_v11  ;;  %v223_v33 = vld [vmem:[#allocation3 + $0x28] sm:$0xf0]  ;;  %v222_v34 = vor.u32 %v272_v31, %v221_v30  ;;  %v213_v36 = vld [vmem:[#allocation3 + $0x10] sm:$0xf]  ;;  %v270_v37 = vld [vmem:[#allocation3 + $0x14] sm:$0xf0] }
   0xe   :  { %v226_v35 = vor.u32 %v271_v32, %v223_v33  ;;  %v269_v38 = vld [vmem:[#allocation3 + $0x14] sm:$0xf]  ;;  %v215_v39 = vld [vmem:[#allocation3 + $0x18] sm:$0xf0]  ;;  %v214_v40 = vor.u32 %v270_v37, %v213_v36  ;;  %v205_v42 = vld [vmem:[#allocation3] sm:$0xf] }
   0xf   :  { %v218_v41 = vor.u32 %v269_v38, %v215_v39  ;;  %v268_v43 = vld [vmem:[#allocation3 + $0x4] sm:$0xf0]  ;;  %v267_v44 = vld [vmem:[#allocation3 + $0x4] sm:$0xf]  ;;  %v207_v45 = vld [vmem:[#allocation3 + $0x8] sm:$0xf0] }
  0x10   :  { %143 = vmatpush.bf16.msra.mxu0 %v246_v16  ;;  %v206_v46 = vor.u32 %v268_v43, %v205_v42  ;;  %v42_v47 = vld [vmem:[%s359_s0] sm:$0xff]  ;;  %v43_v48 = vld [vmem:[%s359_s0 + $0x8] sm:$0xff]  ;;  %v210_v49 = vor.u32 %v267_v44, %v207_v45 }
  0x11   :  { %157 = vmatpush.bf16.msra.mxu1 %v250_v17  ;;  %v44_v50 = vpack.c.bf16 %v43_v48, %v42_v47  ;;  %v184_v51 = vld [vmem:[%s361_s2] sm:$0x3] }
  0x12   :  { %v186_v52 = vperm.slane %v184_v51, 0  ;;  %v187_v53 = vperm.slane %v184_v51, 1 }
  0x14   :  { %144 = vmatpush.bf16.msra.mxu0 %v238_v22 }
  0x15   :  { %158 = vmatpush.bf16.msra.mxu1 %v242_v23 }
  0x18   :  { %145 = vmatpush.bf16.msra.mxu0 %v230_v28 }
  0x19   :  { %159 = vmatpush.bf16.msra.mxu1 %v234_v29 }
  0x1c   :  { %146 = vmatpush.bf16.msra.mxu0 %v222_v34 }
  0x1d   :  { %160 = vmatpush.bf16.msra.mxu1 %v226_v35 }
  0x20   :  { %147 = vmatpush.bf16.msra.mxu0 %v214_v40 }
  0x21   :  { %161 = vmatpush.bf16.msra.mxu1 %v218_v41 }
  0x24   :  { %148 = vmatpush.bf16.msra.mxu0 %v206_v46 }
  0x25   :  { %162 = vmatpush.bf16.msra.mxu1 %v210_v49 }
  0x27   :  { %149 = vmatmul.bf16.vlgmr.msra.gmra.mxu0 %v44_v50 }
  0x28   :  { %163 = vmatmul.bf16.vlgmr.msra.gmra.mxu1 %v44_v50 }
  0xa4   :  { %v150_v54 = vpop.f32.mrf.mxu0 }
  0xa5   :  { %v190_v55 = vadd.f32 %v186_v52, %v150_v54  ;;  %v164_v56 = vpop.f32.mrf.mxu1 }
  0xa6   :  { %v191_v57 = vadd.f32 %v187_v53, %v164_v56 }
  0xa7   :  { %194 = vst [vmem:[%s362_s3] sm:$0xff] %v190_v55 }
  0xa8   :  { %195 = vst [vmem:[%s362_s3 + $0x8] sm:$0xff] %v191_v57 }
  0xac   :  { %v152_v58 = vpop.f32.mrf.mxu0 }
  0xad   :  { %v192_v59 = vadd.f32 %v186_v52, %v152_v58  ;;  %v166_v60 = vpop.f32.mrf.mxu1 }
  0xae   :  { %v193_v61 = vadd.f32 %v187_v53, %v166_v60 }
  0xaf   :  { %196 = vst [vmem:[%s362_s3 + $0x10] sm:$0xff] %v192_v59 }
  0xb0   :  { %197 = vst [vmem:[%s362_s3 + $0x18] sm:$0xff] %v193_v61 }
  0xb1   :  { %202 = vsyncpa [#allocation4], 1 }

// kernel: cross_attention_tokeniser_forward.5
= control target key start
LH: loop header
LB: loop body
LE: loop exit
PB: predicated region body
PF: predicated region fallthrough
CT: control target
= control target key end

     0   :  { %8 = vsyncpa [#allocation4], 0  ;;  %s499_s15 = smov [#allocation3]   ;;  %s500_s17 = smov 128   ;;  %s540_s0 = inlined_call_operand.vmem [shape: f32[8,256], index: 0, kind: input, shape index: {}]   ;;  %s541_s1 = inlined_call_operand.hbm [shape: bf16[256,256], index: 1, kind: input, shape index: {}]   ;;  %s542_s2 = inlined_call_operand.vmem [shape: f32[1,256], index: 2, kind: input, shape index: {}]   ;;  %s543_s3 = inlined_call_operand.vmem [shape: f32[8,256], index: 3, kind: output, shape index: {}]  }
   0x1   :  { %s15_s14 = sshll.u32 %s541_s1, 4  ;;  %s17_s16 = sshll.u32 %s499_s15, 4  ;;  %s16_s14 = int_to_ptr.hbm [resolvable:$true] %s15_s14  ;;  %s18_s16 = int_to_ptr.vmem [resolvable:$true] %s17_s16 }
   0x2   :  { %s501_s18 = smov 8  }
   0x3   :  { %23 = dma.hbm_to_vmem [thread:$0]  %s16_s14, 4096, %s18_s16, [#allocation4], %s500_s17, %s500_s17, %s501_s18  }
   0x4   :  { %497 = dma.done.wait [#allocation4], 4096  }
   0x5   :  { %498 = vsyncadd [#allocation4], 4294963200  ;;  %v368_v0 = vld [vmem:[#allocation3 + $0x70] sm:$0xf]  ;;  %v453_v1 = vld [vmem:[#allocation3 + $0x74] sm:$0xf0] }
   0x6   :  { %v432_v2 = vld [vmem:[#allocation3 + $0xf0] sm:$0xf]  ;;  %v369_v3 = vor.u32 %v453_v1, %v368_v0  ;;  %v469_v4 = vld [vmem:[#allocation3 + $0xf4] sm:$0xf0]  ;;  %v452_v5 = vld [vmem:[#allocation3 + $0x74] sm:$0xf] }
   0x7   :  { %v370_v6 = vld [vmem:[#allocation3 + $0x78] sm:$0xf0]  ;;  %v433_v7 = vor.u32 %v469_v4, %v432_v2  ;;  %v468_v9 = vld [vmem:[#allocation3 + $0xf4] sm:$0xf]  ;;  %v360_v11 = vld [vmem:[#allocation3 + $0x60] sm:$0xf] }
   0x8   :  { %v373_v8 = vor.u32 %v452_v5, %v370_v6  ;;  %v434_v10 = vld [vmem:[#allocation3 + $0xf8] sm:$0xf0]  ;;  %234 = vmatpush.bf16.msra.mxu0 %v369_v3  ;;  %v451_v13 = vld [vmem:[#allocation3 + $0x64] sm:$0xf0]  ;;  %v424_v14 = vld [vmem:[#allocation3 + $0xe0] sm:$0xf] }
   0x9   :  { %v437_v12 = vor.u32 %v468_v9, %v434_v10  ;;  %v467_v15 = vld [vmem:[#allocation3 + $0xe4] sm:$0xf0]  ;;  %247 = vmatpush.bf16.msra.mxu1 %v433_v7  ;;  %v361_v16 = vor.u32 %v451_v13, %v360_v11  ;;  %v450_v18 = vld [vmem:[#allocation3 + $0x64] sm:$0xf]  ;;  %v362_v19 = vld [vmem:[#allocation3 + $0x68] sm:$0xf0] }
   0xa   :  { %260 = vmatpush.bf16.msra.mxu2 %v373_v8  ;;  %v425_v17 = vor.u32 %v467_v15, %v424_v14  ;;  %v466_v20 = vld [vmem:[#allocation3 + $0xe4] sm:$0xf]  ;;  %v365_v21 = vor.u32 %v450_v18, %v362_v19  ;;  %v426_v22 = vld [vmem:[#allocation3 + $0xe8] sm:$0xf0]  ;;  %v352_v23 = vld [vmem:[#allocation3 + $0x50] sm:$0xf] }
   0xb   :  { %273 = vmatpush.bf16.msra.mxu3 %v437_v12  ;;  %v449_v24 = vld [vmem:[#allocation3 + $0x54] sm:$0xf0]  ;;  %v429_v25 = vor.u32 %v466_v20, %v426_v22  ;;  %v416_v26 = vld [vmem:[#allocation3 + $0xd0] sm:$0xf]  ;;  %v448_v28 = vld [vmem:[#allocation3 + $0x54] sm:$0xf] }
   0xc   :  { %v465_v27 = vld [vmem:[#allocation3 + $0xd4] sm:$0xf0]  ;;  %235 = vmatpush.bf16.msra.mxu0 %v361_v16  ;;  %v353_v29 = vor.u32 %v449_v24, %v352_v23  ;;  %v354_v30 = vld [vmem:[#allocation3 + $0x58] sm:$0xf0]  ;;  %v464_v31 = vld [vmem:[#allocation3 + $0xd4] sm:$0xf] }
   0xd   :  { %v418_v32 = vld [vmem:[#allocation3 + $0xd8] sm:$0xf0]  ;;  %248 = vmatpush.bf16.msra.mxu1 %v425_v17  ;;  %v417_v33 = vor.u32 %v465_v27, %v416_v26  ;;  %v357_v34 = vor.u32 %v448_v28, %v354_v30  ;;  %v344_v35 = vld [vmem:[#allocation3 + $0x40] sm:$0xf]  ;;  %v447_v36 = vld [vmem:[#allocation3 + $0x44] sm:$0xf0] }
   0xe   :  { %261 = vmatpush.bf16.msra.mxu2 %v365_v21  ;;  %v408_v37 = vld [vmem:[#allocation3 + $0xc0] sm:$0xf]  ;;  %v421_v38 = vor.u32 %v464_v31, %v418_v32  ;;  %v463_v39 = vld [vmem:[#allocation3 + $0xc4] sm:$0xf0]  ;;  %v446_v40 = vld [vmem:[#allocation3 + $0x44] sm:$0xf]  ;;  %v345_v44 = vor.u32 %v447_v36, %v344_v35 }
   0xf   :  { %274 = vmatpush.bf16.msra.mxu3 %v429_v25  ;;  %v346_v41 = vld [vmem:[#allocation3 + $0x48] sm:$0xf0]  ;;  %v462_v42 = vld [vmem:[#allocation3 + $0xc4] sm:$0xf]  ;;  %v409_v45 = vor.u32 %v463_v39, %v408_v37  ;;  %v336_v47 = vld [vmem:[#allocation3 + $0x30] sm:$0xf] }
  0x10   :  { %v410_v43 = vld [vmem:[#allocation3 + $0xc8] sm:$0xf0]  ;;  %236 = vmatpush.bf16.msra.mxu0 %v353_v29  ;;  %v349_v46 = vor.u32 %v446_v40, %v346_v41  ;;  %v445_v48 = vld [vmem:[#allocation3 + $0x34] sm:$0xf0]  ;;  %v400_v49 = vld [vmem:[#allocation3 + $0xb0] sm:$0xf] }
  0x11   :  { %249 = vmatpush.bf16.msra.mxu1 %v417_v33  ;;  %v413_v50 = vor.u32 %v462_v42, %v410_v43  ;;  %v461_v51 = vld [vmem:[#allocation3 + $0xb4] sm:$0xf0]  ;;  %v444_v52 = vld [vmem:[#allocation3 + $0x34] sm:$0xf]  ;;  %v338_v53 = vld [vmem:[#allocation3 + $0x38] sm:$0xf0]  ;;  %v337_v56 = vor.u32 %v445_v48, %v336_v47 }
  0x12   :  { %262 = vmatpush.bf16.msra.mxu2 %v357_v34  ;;  %v460_v54 = vld [vmem:[#allocation3 + $0xb4] sm:$0xf]  ;;  %v402_v55 = vld [vmem:[#allocation3 + $0xb8] sm:$0xf0]  ;;  %v401_v57 = vor.u32 %v461_v51, %v400_v49  ;;  %v341_v58 = vor.u32 %v444_v52, %v338_v53  ;;  %v328_v59 = vld [vmem:[#allocation3 + $0x20] sm:$0xf] }
  0x13   :  { %275 = vmatpush.bf16.msra.mxu3 %v421_v38  ;;  %v443_v60 = vld [vmem:[#allocation3 + $0x24] sm:$0xf0]  ;;  %v392_v61 = vld [vmem:[#allocation3 + $0xa0] sm:$0xf]  ;;  %v405_v62 = vor.u32 %v460_v54, %v402_v55  ;;  %v442_v0 = vld [vmem:[#allocation3 + $0x24] sm:$0xf] }
  0x14   :  { %237 = vmatpush.bf16.msra.mxu0 %v345_v44  ;;  %v459_v63 = vld [vmem:[#allocation3 + $0xa4] sm:$0xf0]  ;;  %v330_v1 = vld [vmem:[#allocation3 + $0x28] sm:$0xf0]  ;;  %v458_v2 = vld [vmem:[#allocation3 + $0xa4] sm:$0xf]  ;;  %v329_v4 = vor.u32 %v443_v60, %v328_v59 }
  0x15   :  { %250 = vmatpush.bf16.msra.mxu1 %v409_v45  ;;  %v394_v3 = vld [vmem:[#allocation3 + $0xa8] sm:$0xf0]  ;;  %v393_v5 = vor.u32 %v459_v63, %v392_v61  ;;  %v333_v6 = vor.u32 %v442_v0, %v330_v1  ;;  %v320_v7 = vld [vmem:[#allocation3 + $0x10] sm:$0xf]  ;;  %v441_v8 = vld [vmem:[#allocation3 + $0x14] sm:$0xf0] }
  0x16   :  { %263 = vmatpush.bf16.msra.mxu2 %v349_v46  ;;  %v384_v9 = vld [vmem:[#allocation3 + $0x90] sm:$0xf]  ;;  %v397_v10 = vor.u32 %v458_v2, %v394_v3  ;;  %v457_v11 = vld [vmem:[#allocation3 + $0x94] sm:$0xf0]  ;;  %v440_v12 = vld [vmem:[#allocation3 + $0x14] sm:$0xf]  ;;  %v321_v16 = vor.u32 %v441_v8, %v320_v7 }
  0x17   :  { %276 = vmatpush.bf16.msra.mxu3 %v413_v50  ;;  %v322_v13 = vld [vmem:[#allocation3 + $0x18] sm:$0xf0]  ;;  %v456_v14 = vld [vmem:[#allocation3 + $0x94] sm:$0xf]  ;;  %v385_v17 = vor.u32 %v457_v11, %v384_v9  ;;  %v312_v19 = vld [vmem:[#allocation3] sm:$0xf] }
  0x18   :  { %238 = vmatpush.bf16.msra.mxu0 %v337_v56  ;;  %v386_v15 = vld [vmem:[#allocation3 + $0x98] sm:$0xf0]  ;;  %v325_v18 = vor.u32 %v440_v12, %v322_v13  ;;  %v439_v20 = vld [vmem:[#allocation3 + $0x4] sm:$0xf0]  ;;  %v376_v21 = vld [vmem:[#allocation3 + $0x80] sm:$0xf] }
  0x19   :  { %251 = vmatpush.bf16.msra.mxu1 %v401_v57  ;;  %v389_v22 = vor.u32 %v456_v14, %v386_v15  ;;  %v455_v23 = vld [vmem:[#allocation3 + $0x84] sm:$0xf0]  ;;  %v438_v24 = vld [vmem:[#allocation3 + $0x4] sm:$0xf]  ;;  %v314_v25 = vld [vmem:[#allocation3 + $0x8] sm:$0xf0]  ;;  %v313_v28 = vor.u32 %v439_v20, %v312_v19 }
  0x1a   :  { %264 = vmatpush.bf16.msra.mxu2 %v341_v58  ;;  %v454_v26 = vld [vmem:[#allocation3 + $0x84] sm:$0xf]  ;;  %v378_v27 = vld [vmem:[#allocation3 + $0x88] sm:$0xf0]  ;;  %v377_v30 = vor.u32 %v455_v23, %v376_v21  ;;  %v317_v31 = vor.u32 %v438_v24, %v314_v25  ;;  %v295_v36 = vld [vmem:[%s542_s2] sm:$0x3] }
  0x1b   :  { %277 = vmatpush.bf16.msra.mxu3 %v405_v62  ;;  %v38_v29 = vld [vmem:[%s540_s0] sm:$0xff]  ;;  %v39_v32 = vld [vmem:[%s540_s0 + $0x8] sm:$0xff]  ;;  %v381_v33 = vor.u32 %v454_v26, %v378_v27  ;;  %v297_v38 = vperm.slane %v295_v36, 0  ;;  %v298_v43 = vperm.slane %v295_v36, 1 }
  0x1c   :  { %239 = vmatpush.bf16.msra.mxu0 %v329_v4  ;;  %v40_v34 = vpack.c.bf16 %v38_v29, %v38_v29  ;;  %v41_v35 = vpack.c.bf16 %v39_v32, %v39_v32 }
  0x1d   :  { %252 = vmatpush.bf16.msra.mxu1 %v393_v5 }
  0x1e   :  { %265 = vmatpush.bf16.msra.mxu2 %v333_v6 }
  0x1f   :  { %278 = vmatpush.bf16.msra.mxu3 %v397_v10 }
  0x20   :  { %240 = vmatpush.bf16.msra.mxu0 %v321_v16 }
  0x21   :  { %253 = vmatpush.bf16.msra.mxu1 %v385_v17 }
  0x22   :  { %266 = vmatpush.bf16.msra.mxu2 %v325_v18 }
  0x23   :  { %279 = vmatpush.bf16.msra.mxu3 %v389_v22 }
  0x24   :  { %241 = vmatpush.bf16.msra.mxu0 %v313_v28 }
  0x25   :  { %254 = vmatpush.bf16.msra.mxu1 %v377_v30 }
  0x26   :  { %267 = vmatpush.bf16.msra.mxu2 %v317_v31 }
  0x27   :  { %280 = vmatpush.bf16.msra.mxu3 %v381_v33  ;;  %242 = vmatmul.bf16.vlgmr.msra.gmra.mxu0 %v40_v34 }
  0x28   :  { %255 = vmatmul.bf16.vlgmr.msra.gmra.mxu1 %v41_v35 }
  0x29   :  { %268 = vmatmul.bf16.vlgmr.msra.gmra.mxu2 %v40_v34 }
  0x2a   :  { %281 = vmatmul.bf16.vlgmr.msra.gmra.mxu3 %v41_v35 }
  0xa4   :  { %v243_v37 = vpop.f32.mrf.mxu0 }
  0xa5   :  { %v256_v39 = vpop.f32.mrf.mxu1 }
  0xa6   :  { %v257_v40 = vadd.f32 %v256_v39, %v243_v37 }
  0xa8   :  { %v301_v41 = vadd.f32 %v297_v38, %v257_v40 }
  0xaa   :  { %303 = vst [vmem:[%s543_s3] sm:$0xff] %v301_v41 }
  0xac   :  { %v269_v42 = vpop.f32.mrf.mxu2  ;;  %v245_v45 = vpop.f32.mrf.mxu0 }
  0xad   :  { %v282_v44 = vpop.f32.mrf.mxu3  ;;  %v258_v47 = vpop.f32.mrf.mxu1 }
  0xae   :  { %v283_v46 = vadd.f32 %v282_v44, %v269_v42 }
  0xb0   :  { %v302_v48 = vadd.f32 %v298_v43, %v283_v46 }
  0xb2   :  { %304 = vst [vmem:[%s543_s3 + $0x8] sm:$0xff] %v302_v48 }
  0xb4   :  { %v271_v49 = vpop.f32.mrf.mxu2 }
  0xb5   :  { %v284_v50 = vpop.f32.mrf.mxu3 }
  0xb6   :  { %309 = vsyncpa [#allocation4], 1 }

// kernel: cross_attention_tokeniser_forward.4
= control target key start
LH: loop header
LB: loop body
LE: loop exit
PB: predicated region body
PF: predicated region fallthrough
CT: control target
= control target key end

     0   :  { %14 = vsyncpa [#allocation3], 0  ;;  %s4164_s0 = inlined_call_operand.vmem [shape: f32[16,256], index: 0, kind: input, shape index: {}]   ;;  %s4165_s1 = inlined_call_operand.vmem [shape: f32[8,256], index: 1, kind: input, shape index: {}]   ;;  %s4166_s2 = inlined_call_operand.vmem [shape: bf16[256,256], index: 2, kind: input, shape index: {}]   ;;  %s4167_s3 = inlined_call_operand.hbm [shape: bf16[256,512], index: 3, kind: input, shape index: {}]   ;;  %s4168_s4 = inlined_call_operand.hbm [shape: bf16[256,256], index: 4, kind: input, shape index: {}]   ;;  %s4169_s5 = inlined_call_operand.hbm [shape: bf16[256,512], index: 5, kind: input, shape index: {}]   ;;  %s4170_s6 = inlined_call_operand.vmem [shape: f32[1,512], index: 6, kind: input, shape index: {}]   ;;  %s4171_s7 = inlined_call_operand.hbm [shape: bf16[512,256], index: 7, kind: input, shape index: {}]   ;;  %s4172_s8 = inlined_call_operand.vmem [shape: f32[1,256], index: 8, kind: input, shape index: {}]   ;;  %s4173_s9 = inlined_call_operand.vmem [shape: f32[8,256], index: 9, kind: output, shape index: {}]  }
   0x1   :  { %15 = vsyncpa [#allocation5], 0  ;;  %s40_s11 = sshll.u32 %s4168_s4, 4  ;;  %s41_s11 = int_to_ptr.hbm [resolvable:$true] %s40_s11 }
   0x2   :  { %16 = vsyncpa [#allocation8], 0  ;;  %s3745_s12 = smov [#allocation4]   ;;  %s27_s16 = sshll.u32 %s4167_s3, 4  ;;  %s28_s16 = int_to_ptr.hbm [resolvable:$true] %s27_s16 }
   0x3   :  { %s42_s13 = sshll.u32 %s3745_s12, 4  ;;  %s3746_s17 = smov 128   ;;  %s43_s13 = int_to_ptr.vmem [resolvable:$true] %s42_s13 }
   0x4   :  { %s3747_s18 = smov 8   ;;  %s3748_s19 = smov [#allocation2]  }
   0x5   :  { %48 = dma.hbm_to_vmem [thread:$0]  %s41_s11, 4096, %s43_s13, [#allocation5], %s3746_s17, %s3746_s17, %s3747_s18  }
   0x6   :  { %s29_s20 = sshll.u32 %s3748_s19, 4  ;;  %s3749_s21 = smov 256   ;;  %s30_s20 = int_to_ptr.vmem [resolvable:$true] %s29_s20 }
   0x7   :  { %s3750_s22 = smov 16   ;;  %s53_s24 = sshll.u32 %s4169_s5, 4  ;;  %s54_s24 = int_to_ptr.hbm [resolvable:$true] %s53_s24 }
   0x8   :  { %35 = dma.hbm_to_vmem [thread:$0]  %s28_s16, 8192, %s30_s20, [#allocation3], %s3749_s21, %s3749_s21, %s3750_s22  }
   0x9   :  { %s3751_s25 = smov [#allocation6]   ;;  %s68_s28 = sshll.u32 %s4171_s7, 4  ;;  %s69_s28 = int_to_ptr.hbm [resolvable:$true] %s68_s28 }
   0xa   :  { %s55_s26 = sshll.u32 %s3751_s25, 4  ;;  %s3752_s29 = smov [#allocation7]   ;;  %s56_s26 = int_to_ptr.vmem [resolvable:$true] %s55_s26 }
   0xb   :  { %61 = dma.hbm_to_vmem [thread:$0]  %s54_s24, 8192, %s56_s26, [#allocation5], %s3749_s21, %s3749_s21, %s3750_s22  }
   0xc   :  { %s70_s30 = sshll.u32 %s3752_s29, 4  ;;  %s71_s30 = int_to_ptr.vmem [resolvable:$true] %s70_s30 }
   0xd   :  { %76 = dma.hbm_to_vmem [thread:$0]  %s69_s28, 8192, %s71_s30, [#allocation8], %s3746_s17, %s3746_s17, %s3747_s18  }
   0xe   :  { %3739 = dma.done.wait [#allocation3], 8192  }
   0xf   :  { %3740 = vsyncadd [#allocation3], 4294959104 }
  0x10   :  { %3741 = dma.done.wait [#allocation5], 12288  }
  0x11   :  { %3742 = vsyncadd [#allocation5], 4294955008 }
  0x12   :  { %3743 = dma.done.wait [#allocation8], 8192  }
  0x13   :  { %3744 = vsyncadd [#allocation8], 4294959104  ;;  %v3818_v0 = vld [vmem:[%s4165_s1] sm:$0xff]  ;;  %v3823_v1 = vld [vmem:[%s4165_s1 + $0x8] sm:$0xff]  ;;  %vm927_vm9 = vcmask 130048  }
  0x14   :  { %v3828_v2 = vld [vmem:[%s4164_s0 + $0x10] sm:$0xff]  ;;  %v142_v3 = vmul.f32 %v3818_v0, %v3818_v0  ;;  %v143_v4 = vmul.f32 %v3823_v1, %v3823_v1  ;;  %v3837_v5 = vld [vmem:[%s4164_s0 + $0x18] sm:$0xff]  ;;  %v3844_v7 = vld [vmem:[%s4164_s0] sm:$0xff] }
  0x15   :  { %v104_v6 = vmul.f32 %v3828_v2, %v3828_v2  ;;  %v3849_v8 = vld [vmem:[%s4164_s0 + $0x8] sm:$0xff]  ;;  %v105_v9 = vmul.f32 %v3837_v5, %v3837_v5  ;;  %v2385_v10 = vld [vmem:[%s4166_s2 + $0x70] sm:$0xf]  ;;  %v3368_v11 = vld [vmem:[%s4166_s2 + $0x74] sm:$0xf0]  ;;  %v102_v24 = vmul.f32 %v3844_v7, %v3844_v7 }
  0x16   :  { %v2449_v12 = vld [vmem:[%s4166_s2 + $0xf0] sm:$0xf]  ;;  %v144_v13 = vadd.f32 %v143_v4, %v142_v3  ;;  %v2386_v14 = vor.u32 %v3368_v11, %v2385_v10  ;;  %v3384_v15 = vld [vmem:[%s4166_s2 + $0xf4] sm:$0xf0]  ;;  %v3367_v16 = vld [vmem:[%s4166_s2 + $0x74] sm:$0xf]  ;;  %v103_v25 = vmul.f32 %v3849_v8, %v3849_v8 }
  0x17   :  { %v2387_v17 = vld [vmem:[%s4166_s2 + $0x78] sm:$0xf0]  ;;  %v109_v18 = vadd.f32 %v105_v9, %v104_v6  ;;  %v2450_v19 = vor.u32 %v3384_v15, %v2449_v12  ;;  %v3383_v21 = vld [vmem:[%s4166_s2 + $0xf4] sm:$0xf]  ;;  %v2377_v23 = vld [vmem:[%s4166_s2 + $0x60] sm:$0xf] }
  0x18   :  { %v2390_v20 = vor.u32 %v3367_v16, %v2387_v17  ;;  %v2451_v22 = vld [vmem:[%s4166_s2 + $0xf8] sm:$0xf0]  ;;  %145 = vadd.xlane.f32.xlu0 %v144_v13  ;;  %355 = vmatpush.bf16.msra.mxu0 %v2386_v14  ;;  %v3366_v27 = vld [vmem:[%s4166_s2 + $0x64] sm:$0xf0]  ;;  %v2441_v28 = vld [vmem:[%s4166_s2 + $0xe0] sm:$0xf]  ;;  %v106_v43 = vadd.f32 %v103_v25, %v102_v24 }
  0x19   :  { %v2454_v26 = vor.u32 %v3383_v21, %v2451_v22  ;;  %v3382_v29 = vld [vmem:[%s4166_s2 + $0xe4] sm:$0xf0]  ;;  %110 = vadd.xlane.f32.xlu1 %v109_v18  ;;  %368 = vmatpush.bf16.msra.mxu1 %v2450_v19  ;;  %v2378_v30 = vor.u32 %v3366_v27, %v2377_v23  ;;  %v3365_v32 = vld [vmem:[%s4166_s2 + $0x64] sm:$0xf]  ;;  %v2379_v33 = vld [vmem:[%s4166_s2 + $0x68] sm:$0xf0] }
  0x1a   :  { %v2442_v31 = vor.u32 %v3382_v29, %v2441_v28  ;;  %v3381_v34 = vld [vmem:[%s4166_s2 + $0xe4] sm:$0xf]  ;;  %381 = vmatpush.bf16.msra.mxu2 %v2390_v20  ;;  %v2382_v35 = vor.u32 %v3365_v32, %v2379_v33  ;;  %v2443_v36 = vld [vmem:[%s4166_s2 + $0xe8] sm:$0xf0]  ;;  %v2369_v37 = vld [vmem:[%s4166_s2 + $0x50] sm:$0xf] }
  0x1b   :  { %394 = vmatpush.bf16.msra.mxu3 %v2454_v26  ;;  %v3364_v38 = vld [vmem:[%s4166_s2 + $0x54] sm:$0xf0]  ;;  %v2446_v39 = vor.u32 %v3381_v34, %v2443_v36  ;;  %v2433_v40 = vld [vmem:[%s4166_s2 + $0xd0] sm:$0xf]  ;;  %v3363_v42 = vld [vmem:[%s4166_s2 + $0x54] sm:$0xf] }
  0x1c   :  { %v3380_v41 = vld [vmem:[%s4166_s2 + $0xd4] sm:$0xf0]  ;;  %356 = vmatpush.bf16.msra.mxu0 %v2378_v30  ;;  %v2370_v44 = vor.u32 %v3364_v38, %v2369_v37  ;;  %v2371_v45 = vld [vmem:[%s4166_s2 + $0x58] sm:$0xf0]  ;;  %v3379_v46 = vld [vmem:[%s4166_s2 + $0xd4] sm:$0xf] }
  0x1d   :  { %v2435_v47 = vld [vmem:[%s4166_s2 + $0xd8] sm:$0xf0]  ;;  %369 = vmatpush.bf16.msra.mxu1 %v2442_v31  ;;  %v2434_v48 = vor.u32 %v3380_v41, %v2433_v40  ;;  %v2361_v49 = vld [vmem:[%s4166_s2 + $0x40] sm:$0xf]  ;;  %v3362_v50 = vld [vmem:[%s4166_s2 + $0x44] sm:$0xf0]  ;;  %v2374_v51 = vor.u32 %v3363_v42, %v2371_v45 }
  0x1e   :  { %382 = vmatpush.bf16.msra.mxu2 %v2382_v35  ;;  %v2438_v52 = vor.u32 %v3379_v46, %v2435_v47  ;;  %v2425_v53 = vld [vmem:[%s4166_s2 + $0xc0] sm:$0xf]  ;;  %v3378_v54 = vld [vmem:[%s4166_s2 + $0xc4] sm:$0xf0]  ;;  %v3361_v55 = vld [vmem:[%s4166_s2 + $0x44] sm:$0xf]  ;;  %v2362_v59 = vor.u32 %v3362_v50, %v2361_v49 }
  0x1f   :  { %395 = vmatpush.bf16.msra.mxu3 %v2446_v39  ;;  %v2363_v56 = vld [vmem:[%s4166_s2 + $0x48] sm:$0xf0]  ;;  %v3377_v57 = vld [vmem:[%s4166_s2 + $0xc4] sm:$0xf]  ;;  %v2426_v60 = vor.u32 %v3378_v54, %v2425_v53  ;;  %v2353_v61 = vld [vmem:[%s4166_s2 + $0x30] sm:$0xf] }
  0x20   :  { %v2427_v58 = vld [vmem:[%s4166_s2 + $0xc8] sm:$0xf0]  ;;  %107 = vadd.xlane.f32.xlu0 %v106_v43  ;;  %357 = vmatpush.bf16.msra.mxu0 %v2370_v44  ;;  %v3360_v62 = vld [vmem:[%s4166_s2 + $0x34] sm:$0xf0]  ;;  %v2366_v63 = vor.u32 %v3361_v55, %v2363_v56  ;;  %v2417_v4 = vld [vmem:[%s4166_s2 + $0xb0] sm:$0xf] }
  0x21   :  { %370 = vmatpush.bf16.msra.mxu1 %v2434_v48  ;;  %v2430_v3 = vor.u32 %v3377_v57, %v2427_v58  ;;  %v3376_v6 = vld [vmem:[%s4166_s2 + $0xb4] sm:$0xf0]  ;;  %v3359_v9 = vld [vmem:[%s4166_s2 + $0x34] sm:$0xf]  ;;  %v2355_v10 = vld [vmem:[%s4166_s2 + $0x38] sm:$0xf0]  ;;  %v2354_v13 = vor.u32 %v3360_v62, %v2353_v61 }
  0x22   :  { %383 = vmatpush.bf16.msra.mxu2 %v2374_v51  ;;  %v3375_v11 = vld [vmem:[%s4166_s2 + $0xb4] sm:$0xf]  ;;  %v2419_v12 = vld [vmem:[%s4166_s2 + $0xb8] sm:$0xf0]  ;;  %v2418_v14 = vor.u32 %v3376_v6, %v2417_v4  ;;  %v2345_v15 = vld [vmem:[%s4166_s2 + $0x20] sm:$0xf]  ;;  %v2358_v17 = vor.u32 %v3359_v9, %v2355_v10 }
  0x23   :  { %396 = vmatpush.bf16.msra.mxu3 %v2438_v52  ;;  %v3358_v16 = vld [vmem:[%s4166_s2 + $0x24] sm:$0xf0]  ;;  %v2422_v18 = vor.u32 %v3375_v11, %v2419_v12  ;;  %v2409_v19 = vld [vmem:[%s4166_s2 + $0xa0] sm:$0xf]  ;;  %v3357_v21 = vld [vmem:[%s4166_s2 + $0x24] sm:$0xf] }
  0x24   :  { %358 = vmatpush.bf16.msra.mxu0 %v2362_v59  ;;  %v3374_v20 = vld [vmem:[%s4166_s2 + $0xa4] sm:$0xf0]  ;;  %v2347_v22 = vld [vmem:[%s4166_s2 + $0x28] sm:$0xf0]  ;;  %v3373_v23 = vld [vmem:[%s4166_s2 + $0xa4] sm:$0xf]  ;;  %v2346_v25 = vor.u32 %v3358_v16, %v2345_v15 }
  0x25   :  { %371 = vmatpush.bf16.msra.mxu1 %v2426_v60  ;;  %v2411_v24 = vld [vmem:[%s4166_s2 + $0xa8] sm:$0xf0]  ;;  %v2410_v26 = vor.u32 %v3374_v20, %v2409_v19  ;;  %v2337_v27 = vld [vmem:[%s4166_s2 + $0x10] sm:$0xf]  ;;  %v3356_v28 = vld [vmem:[%s4166_s2 + $0x14] sm:$0xf0]  ;;  %v2350_v29 = vor.u32 %v3357_v21, %v2347_v22 }
  0x26   :  { %384 = vmatpush.bf16.msra.mxu2 %v2366_v63  ;;  %v2414_v30 = vor.u32 %v3373_v23, %v2411_v24  ;;  %v2401_v31 = vld [vmem:[%s4166_s2 + $0x90] sm:$0xf]  ;;  %v3372_v32 = vld [vmem:[%s4166_s2 + $0x94] sm:$0xf0]  ;;  %v3355_v33 = vld [vmem:[%s4166_s2 + $0x14] sm:$0xf]  ;;  %v2338_v37 = vor.u32 %v3356_v28, %v2337_v27 }
  0x27   :  { %397 = vmatpush.bf16.msra.mxu3 %v2430_v3  ;;  %v2339_v34 = vld [vmem:[%s4166_s2 + $0x18] sm:$0xf0]  ;;  %v3371_v35 = vld [vmem:[%s4166_s2 + $0x94] sm:$0xf]  ;;  %v2329_v38 = vld [vmem:[%s4166_s2] sm:$0xf]  ;;  %v2402_v40 = vor.u32 %v3372_v32, %v2401_v31 }
  0x28   :  { %359 = vmatpush.bf16.msra.mxu0 %v2354_v13  ;;  %v2403_v36 = vld [vmem:[%s4166_s2 + $0x98] sm:$0xf0]  ;;  %v3354_v39 = vld [vmem:[%s4166_s2 + $0x4] sm:$0xf0]  ;;  %v2393_v41 = vld [vmem:[%s4166_s2 + $0x80] sm:$0xf]  ;;  %v2342_v44 = vor.u32 %v3355_v33, %v2339_v34 }
  0x29   :  { %372 = vmatpush.bf16.msra.mxu1 %v2418_v14  ;;  %v3370_v42 = vld [vmem:[%s4166_s2 + $0x84] sm:$0xf0]  ;;  %v3353_v43 = vld [vmem:[%s4166_s2 + $0x4] sm:$0xf]  ;;  %v2406_v45 = vor.u32 %v3371_v35, %v2403_v36  ;;  %v2331_v46 = vld [vmem:[%s4166_s2 + $0x8] sm:$0xf0]  ;;  %v2330_v52 = vor.u32 %v3354_v39, %v2329_v38 }
  0x2a   :  { %385 = vmatpush.bf16.msra.mxu2 %v2358_v17  ;;  %v2569_v47 = vld [vmem:[#allocation2 + $0xe0] sm:$0xf]  ;;  %v3415_v48 = vld [vmem:[#allocation2 + $0xec] sm:$0xf0]  ;;  %v3369_v49 = vld [vmem:[%s4166_s2 + $0x84] sm:$0xf]  ;;  %v2394_v56 = vor.u32 %v3370_v42, %v2393_v41  ;;  %v2334_v60 = vor.u32 %v3353_v43, %v2331_v46 }
  0x2b   :  { %398 = vmatpush.bf16.msra.mxu3 %v2422_v18  ;;  %v2395_v50 = vld [vmem:[%s4166_s2 + $0x88] sm:$0xf0]  ;;  %v2697_v51 = vld [vmem:[#allocation2 + $0x1e0] sm:$0xf]  ;;  %v3447_v53 = vld [vmem:[#allocation2 + $0x1ec] sm:$0xf0]  ;;  %v2570_v57 = vor.u32 %v3415_v48, %v2569_v47 }
  0x2c   :  { %360 = vmatpush.bf16.msra.mxu0 %v2346_v25  ;;  %v3413_v54 = vld [vmem:[#allocation2 + $0xe4] sm:$0xf]  ;;  %v2571_v55 = vld [vmem:[#allocation2 + $0xf0] sm:$0xf0]  ;;  %v2398_v61 = vor.u32 %v3369_v49, %v2395_v50  ;;  %v2698_v62 = vor.u32 %v3447_v53, %v2697_v51  ;;  %v2553_v4 = vld [vmem:[#allocation2 + $0xc0] sm:$0xf] }
  0x2d   :  { %373 = vmatpush.bf16.msra.mxu1 %v2410_v26  ;;  %v3445_v58 = vld [vmem:[#allocation2 + $0x1e4] sm:$0xf]  ;;  %v2699_v59 = vld [vmem:[#allocation2 + $0x1f0] sm:$0xf0]  ;;  %v2574_v63 = vor.u32 %v3413_v54, %v2571_v55  ;;  %v3411_v6 = vld [vmem:[#allocation2 + $0xcc] sm:$0xf0] }
  0x2e   :  { %386 = vmatpush.bf16.msra.mxu2 %v2350_v29  ;;  %v2702_v3 = vor.u32 %v3445_v58, %v2699_v59  ;;  %v2681_v9 = vld [vmem:[#allocation2 + $0x1c0] sm:$0xf]  ;;  %v2554_v10 = vor.u32 %v3411_v6, %v2553_v4  ;;  %v3443_v11 = vld [vmem:[#allocation2 + $0x1cc] sm:$0xf0]  ;;  %v3409_v12 = vld [vmem:[#allocation2 + $0xc4] sm:$0xf] }
  0x2f   :  { %399 = vmatpush.bf16.msra.mxu3 %v2414_v30  ;;  %v2555_v13 = vld [vmem:[#allocation2 + $0xd0] sm:$0xf0]  ;;  %v2682_v14 = vor.u32 %v3443_v11, %v2681_v9  ;;  %v3441_v16 = vld [vmem:[#allocation2 + $0x1c4] sm:$0xf]  ;;  %v2537_v19 = vld [vmem:[#allocation2 + $0xa0] sm:$0xf] }
  0x30   :  { %361 = vmatpush.bf16.msra.mxu0 %v2338_v37  ;;  %v2558_v15 = vor.u32 %v3409_v12, %v2555_v13  ;;  %v2683_v17 = vld [vmem:[#allocation2 + $0x1d0] sm:$0xf0]  ;;  %v3407_v20 = vld [vmem:[#allocation2 + $0xac] sm:$0xf0]  ;;  %v2665_v21 = vld [vmem:[#allocation2 + $0x1a0] sm:$0xf] }
  0x31   :  { %374 = vmatpush.bf16.msra.mxu1 %v2402_v40  ;;  %v2686_v18 = vor.u32 %v3441_v16, %v2683_v17  ;;  %v2538_v22 = vor.u32 %v3407_v20, %v2537_v19  ;;  %v3439_v23 = vld [vmem:[#allocation2 + $0x1ac] sm:$0xf0]  ;;  %v3405_v24 = vld [vmem:[#allocation2 + $0xa4] sm:$0xf]  ;;  %v2539_v25 = vld [vmem:[#allocation2 + $0xb0] sm:$0xf0] }
  0x32   :  { %387 = vmatpush.bf16.msra.mxu2 %v2342_v44  ;;  %v2666_v26 = vor.u32 %v3439_v23, %v2665_v21  ;;  %v2542_v27 = vor.u32 %v3405_v24, %v2539_v25  ;;  %v3437_v28 = vld [vmem:[#allocation2 + $0x1a4] sm:$0xf]  ;;  %v2667_v29 = vld [vmem:[#allocation2 + $0x1b0] sm:$0xf0]  ;;  %v2521_v31 = vld [vmem:[#allocation2 + $0x80] sm:$0xf] }
  0x33   :  { %400 = vmatpush.bf16.msra.mxu3 %v2406_v45  ;;  %v2670_v30 = vor.u32 %v3437_v28, %v2667_v29  ;;  %v3403_v32 = vld [vmem:[#allocation2 + $0x8c] sm:$0xf0]  ;;  %v2649_v33 = vld [vmem:[#allocation2 + $0x180] sm:$0xf]  ;;  %v3401_v36 = vld [vmem:[#allocation2 + $0x84] sm:$0xf] }
  0x34   :  { %362 = vmatpush.bf16.msra.mxu0 %v2330_v52  ;;  %v2522_v34 = vor.u32 %v3403_v32, %v2521_v31  ;;  %v3435_v35 = vld [vmem:[#allocation2 + $0x18c] sm:$0xf0]  ;;  %v2523_v37 = vld [vmem:[#allocation2 + $0x90] sm:$0xf0]  ;;  %v3433_v40 = vld [vmem:[#allocation2 + $0x184] sm:$0xf] }
  0x35   :  { %375 = vmatpush.bf16.msra.mxu1 %v2394_v56  ;;  %v2650_v38 = vor.u32 %v3435_v35, %v2649_v33  ;;  %v2526_v39 = vor.u32 %v3401_v36, %v2523_v37  ;;  %v2651_v41 = vld [vmem:[#allocation2 + $0x190] sm:$0xf0]  ;;  %v2505_v43 = vld [vmem:[#allocation2 + $0x60] sm:$0xf]  ;;  %v3399_v44 = vld [vmem:[#allocation2 + $0x6c] sm:$0xf0] }
  0x36   :  { %388 = vmatpush.bf16.msra.mxu2 %v2334_v60  ;;  %v2654_v42 = vor.u32 %v3433_v40, %v2651_v41  ;;  %v2633_v45 = vld [vmem:[#allocation2 + $0x160] sm:$0xf]  ;;  %v2506_v46 = vor.u32 %v3399_v44, %v2505_v43  ;;  %v3431_v47 = vld [vmem:[#allocation2 + $0x16c] sm:$0xf0]  ;;  %v3397_v48 = vld [vmem:[#allocation2 + $0x64] sm:$0xf] }
  0x37   :  { %401 = vmatpush.bf16.msra.mxu3 %v2398_v61  ;;  %v2507_v49 = vld [vmem:[#allocation2 + $0x70] sm:$0xf0]  ;;  %v2634_v50 = vor.u32 %v3431_v47, %v2633_v45  ;;  %v3429_v52 = vld [vmem:[#allocation2 + $0x164] sm:$0xf]  ;;  %v2489_v55 = vld [vmem:[#allocation2 + $0x40] sm:$0xf] }
  0x38   :  { %792 = vmatpush.bf16.msrb.mxu0 %v2570_v57  ;;  %v2510_v51 = vor.u32 %v3397_v48, %v2507_v49  ;;  %v2635_v53 = vld [vmem:[#allocation2 + $0x170] sm:$0xf0]  ;;  %v3395_v56 = vld [vmem:[#allocation2 + $0x4c] sm:$0xf0]  ;;  %v2617_v57 = vld [vmem:[#allocation2 + $0x140] sm:$0xf] }
  0x39   :  { %806 = vmatpush.bf16.msrb.mxu1 %v2698_v62  ;;  %v2638_v54 = vor.u32 %v3429_v52, %v2635_v53  ;;  %v2490_v58 = vor.u32 %v3395_v56, %v2489_v55  ;;  %v3427_v59 = vld [vmem:[#allocation2 + $0x14c] sm:$0xf0]  ;;  %v3393_v60 = vld [vmem:[#allocation2 + $0x44] sm:$0xf]  ;;  %v2491_v61 = vld [vmem:[#allocation2 + $0x50] sm:$0xf0] }
  0x3a   :  { %820 = vmatpush.bf16.msrb.mxu2 %v2574_v63  ;;  %v2618_v62 = vor.u32 %v3427_v59, %v2617_v57  ;;  %v2494_v63 = vor.u32 %v3393_v60, %v2491_v61  ;;  %v2619_v4 = vld [vmem:[#allocation2 + $0x150] sm:$0xf0]  ;;  %v2473_v9 = vld [vmem:[#allocation2 + $0x20] sm:$0xf]  ;;  %v3423_v13 = vld [vmem:[#allocation2 + $0x12c] sm:$0xf0] }
  0x3b   :  { %834 = vmatpush.bf16.msrb.mxu3 %v2702_v3  ;;  %v3425_v3 = vld [vmem:[#allocation2 + $0x144] sm:$0xf]  ;;  %v2601_v11 = vld [vmem:[#allocation2 + $0x120] sm:$0xf]  ;;  %v2603_v19 = vld [vmem:[#allocation2 + $0x130] sm:$0xf0] }
  0x3c   :  { %793 = vmatpush.bf16.msrb.mxu0 %v2554_v10  ;;  %v2622_v6 = vor.u32 %v3425_v3, %v2619_v4  ;;  %v3391_v10 = vld [vmem:[#allocation2 + $0x2c] sm:$0xf0]  ;;  %v2602_v16 = vor.u32 %v3423_v13, %v2601_v11  ;;  %v2457_v21 = vld [vmem:[#allocation2] sm:$0xf]  ;;  %v2587_v31 = vld [vmem:[#allocation2 + $0x110] sm:$0xf0] }
  0x3d   :  { %807 = vmatpush.bf16.msrb.mxu1 %v2682_v14  ;;  %v2474_v12 = vor.u32 %v3391_v10, %v2473_v9  ;;  %v3389_v14 = vld [vmem:[#allocation2 + $0x24] sm:$0xf]  ;;  %v2585_v23 = vld [vmem:[#allocation2 + $0x100] sm:$0xf]  ;;  %v3419_v25 = vld [vmem:[#allocation2 + $0x10c] sm:$0xf0] }
  0x3e   :  { %821 = vmatpush.bf16.msrb.mxu2 %v2558_v15  ;;  %v2475_v15 = vld [vmem:[#allocation2 + $0x30] sm:$0xf0]  ;;  %v2586_v28 = vor.u32 %v3419_v25, %v2585_v23  ;;  %v2577_v53 = vld [vmem:[#allocation2 + $0xe8] sm:$0xf]  ;;  %v3414_v59 = vld [vmem:[#allocation2 + $0xec] sm:$0xf] }
  0x3f   :  { %835 = vmatpush.bf16.msrb.mxu3 %v2686_v18  ;;  %v2478_v17 = vor.u32 %v3389_v14, %v2475_v15  ;;  %v3421_v18 = vld [vmem:[#allocation2 + $0x124] sm:$0xf]  ;;  %v2705_v57 = vld [vmem:[#allocation2 + $0x1e8] sm:$0xf]  ;;  %v2707_v3 = vld [vmem:[#allocation2 + $0x1f8] sm:$0xf0] }
  0x40   :  { %794 = vmatpush.bf16.msrb.mxu0 %v2538_v22  ;;  %v2606_v20 = vor.u32 %v3421_v18, %v2603_v19  ;;  %v3387_v22 = vld [vmem:[#allocation2 + $0xc] sm:$0xf0]  ;;  %v2561_v9 = vld [vmem:[#allocation2 + $0xc8] sm:$0xf]  ;;  %v3412_v14 = vld [vmem:[#allocation2 + $0xd4] sm:$0xf0] }
  0x41   :  { %808 = vmatpush.bf16.msrb.mxu1 %v2666_v26  ;;  %v2458_v24 = vor.u32 %v3387_v22, %v2457_v21  ;;  %v3385_v26 = vld [vmem:[#allocation2 + $0x4] sm:$0xf]  ;;  %v2689_v15 = vld [vmem:[#allocation2 + $0x1c8] sm:$0xf]  ;;  %v2691_v21 = vld [vmem:[#allocation2 + $0x1d8] sm:$0xf0]  ;;  %v2562_v23 = vor.u32 %v3412_v14, %v2561_v9 }
  0x42   :  { %822 = vmatpush.bf16.msrb.mxu2 %v2542_v27  ;;  %v2459_v27 = vld [vmem:[#allocation2 + $0x10] sm:$0xf0]  ;;  %v2643_v9 = vld [vmem:[#allocation2 + $0x178] sm:$0xf0] }
  0x43   :  { %836 = vmatpush.bf16.msrb.mxu3 %v2670_v30  ;;  %v2462_v29 = vor.u32 %v3385_v26, %v2459_v27  ;;  %v3417_v30 = vld [vmem:[#allocation2 + $0x104] sm:$0xf]  ;;  %v2545_v26 = vld [vmem:[#allocation2 + $0xa8] sm:$0xf]  ;;  %v3408_v27 = vld [vmem:[#allocation2 + $0xb4] sm:$0xf0] }
  0x44   :  { %795 = vmatpush.bf16.msrb.mxu0 %v2522_v34  ;;  %v2590_v32 = vor.u32 %v3417_v30, %v2587_v31  ;;  %v2673_v30 = vld [vmem:[#allocation2 + $0x1a8] sm:$0xf]  ;;  %v3440_v31 = vld [vmem:[#allocation2 + $0x1b4] sm:$0xf0] }
  0x45   :  { %809 = vmatpush.bf16.msrb.mxu1 %v2650_v38 }
  0x46   :  { %823 = vmatpush.bf16.msrb.mxu2 %v2526_v39 }
  0x47   :  { %837 = vmatpush.bf16.msrb.mxu3 %v2654_v42 }
  0x48   :  { %796 = vmatpush.bf16.msrb.mxu0 %v2506_v46 }
  0x49   :  { %810 = vmatpush.bf16.msrb.mxu1 %v2634_v50 }
  0x4a   :  { %824 = vmatpush.bf16.msrb.mxu2 %v2510_v51 }
  0x4b   :  { %838 = vmatpush.bf16.msrb.mxu3 %v2638_v54  ;;  %v3416_v54 = vld [vmem:[#allocation2 + $0xf4] sm:$0xf0] }
  0x4c   :  { %797 = vmatpush.bf16.msrb.mxu0 %v2490_v58  ;;  %v3448_v58 = vld [vmem:[#allocation2 + $0x1f4] sm:$0xf0] }
  0x4d   :  { %811 = vmatpush.bf16.msrb.mxu1 %v2618_v62  ;;  %v2579_v62 = vld [vmem:[#allocation2 + $0xf8] sm:$0xf0]  ;;  %v2706_v13 = vor.u32 %v3448_v58, %v2705_v57  ;;  %v2513_v57 = vld [vmem:[#allocation2 + $0x68] sm:$0xf]  ;;  %v3400_v58 = vld [vmem:[#allocation2 + $0x74] sm:$0xf0] }
  0x4e   :  { %825 = vmatpush.bf16.msrb.mxu2 %v2494_v63  ;;  %v3446_v63 = vld [vmem:[#allocation2 + $0x1ec] sm:$0xf]  ;;  %v2582_v18 = vor.u32 %v3414_v59, %v2579_v62  ;;  %v3432_v62 = vld [vmem:[#allocation2 + $0x174] sm:$0xf0] }
  0x4f   :  { %839 = vmatpush.bf16.msrb.mxu3 %v2622_v6  ;;  %v2710_v19 = vor.u32 %v3446_v63, %v2707_v3  ;;  %v3398_v63 = vld [vmem:[#allocation2 + $0x6c] sm:$0xf] }
  0x50   :  { %798 = vmatpush.bf16.msrb.mxu0 %v2474_v12  ;;  %v2578_v12 = vor.u32 %v3416_v54, %v2577_v53 }
  0x51   :  { %812 = vmatpush.bf16.msrb.mxu1 %v2602_v16  ;;  %v3444_v16 = vld [vmem:[#allocation2 + $0x1d4] sm:$0xf0] }
  0x52   :  { %826 = vmatpush.bf16.msrb.mxu2 %v2478_v17 }
  0x53   :  { %840 = vmatpush.bf16.msrb.mxu3 %v2606_v20  ;;  %v3410_v20 = vld [vmem:[#allocation2 + $0xcc] sm:$0xf] }
  0x54   :  { %799 = vmatpush.bf16.msrb.mxu0 %v2458_v24  ;;  %v2690_v24 = vor.u32 %v3444_v16, %v2689_v15  ;;  %v3428_v16 = vld [vmem:[#allocation2 + $0x154] sm:$0xf0] }
  0x55   :  { %813 = vmatpush.bf16.msrb.mxu1 %v2586_v28 }
  0x56   :  { %827 = vmatpush.bf16.msrb.mxu2 %v2462_v29 }
  0x57   :  { %841 = vmatpush.bf16.msrb.mxu3 %v2590_v32  ;;  %v3406_v32 = vld [vmem:[#allocation2 + $0xac] sm:$0xf] }
  0x8b   :  { %v146_v33 = vpop.xlane.xlu0 %145 }
  0x8c   :  { %v147_v34 = vmul.f32 0.007575758, %v146_v33  ;;  %v111_v35 = vpop.xlane.xlu1 %110  ;;  %v2547_v33 = vld [vmem:[#allocation2 + $0xb8] sm:$0xf0] }
  0x8d   :  { %v113_v36 = vmul.f32 0.007575758, %v111_v35  ;;  %v2675_v35 = vld [vmem:[#allocation2 + $0x1b8] sm:$0xf0] }
  0x8e   :  { %v148_v37 = vadd.f32 1e-06, %v147_v34  ;;  %v3438_v34 = vld [vmem:[#allocation2 + $0x1ac] sm:$0xf] }
  0x8f   :  { %v4049_v38 = vadd.f32 1e-06, %v113_v36 }
  0x90   :  { %3617 = vrsqrt.f32 %v148_v37  ;;  %vm155_vm1 = vweird.f32 %v148_v37 }
  0x91   :  { %3619 = vrsqrt.f32 %v4049_v38  ;;  %vm132_vm3 = vweird.f32 %v4049_v38 }
  0x93   :  { %v108_v39 = vpop.xlane.xlu0 %107 }
  0x94   :  { %v112_v40 = vmul.f32 0.007575758, %v108_v39  ;;  %v2546_v39 = vor.u32 %v3408_v27, %v2545_v26  ;;  %v3390_v26 = vld [vmem:[#allocation2 + $0x2c] sm:$0xf]  ;;  %v2483_v27 = vld [vmem:[#allocation2 + $0x38] sm:$0xf0] }
  0x96   :  { %v3618_v41 = vpop.eup %3617  ;;  %v4052_v42 = vadd.f32 1e-06, %v112_v40  ;;  %v2674_v40 = vor.u32 %v3440_v31, %v2673_v30 }
  0x97   :  { %v150_v43 = vmul.f32 %v3618_v41, %v148_v37  ;;  %v4054_v44 = vpop.eup %3619  ;;  %vm156_vm0 = vweird.f32 %v3618_v41  ;;  %v3420_v37 = vld [vmem:[#allocation2 + $0x114] sm:$0xf0] }
  0x98   :  { %3621 = vrsqrt.f32 %v4052_v42  ;;  %v127_v47 = vmul.f32 %v4054_v44, %v4049_v38  ;;  %vm157_vm2 = vmor %vm155_vm1, %vm156_vm0  ;;  %vm133_vm4 = vweird.f32 %v4054_v44  ;;  %vm122_vm5 = vweird.f32 %v4052_v42  ;;  %v3402_v38 = vld [vmem:[#allocation2 + $0x8c] sm:$0xf] }
  0x99   :  { %v151_v45 = vmul.f32 %v3618_v41, %v150_v43  ;;  %vm4077_vm7 = vmor %vm132_vm3, %vm133_vm4 }
  0x9a   :  { %v128_v50 = vmul.f32 %v4054_v44, %v127_v47  ;;  %v2657_v47 = vld [vmem:[#allocation2 + $0x188] sm:$0xf] }
  0x9b   :  { %v152_v46 = vmul.f32 0.5, %v151_v45  ;;  %v2550_v45 = vor.u32 %v3406_v32, %v2547_v33  ;;  %v2465_v32 = vld [vmem:[#allocation2 + $0x8] sm:$0xf]  ;;  %v3388_v33 = vld [vmem:[#allocation2 + $0x14] sm:$0xf0] }
  0x9c   :  { %v129_v4 = vmul.f32 0.5, %v128_v50  ;;  %v2531_v50 = vld [vmem:[#allocation2 + $0x98] sm:$0xf0] }
  0x9d   :  { %v153_v48 = vsub.f32 1.5, %v152_v46  ;;  %v2678_v46 = vor.u32 %v3438_v34, %v2675_v35  ;;  %v2534_v59 = vor.u32 %v3402_v38, %v2531_v50  ;;  %v2486_v34 = vor.u32 %v3390_v26, %v2483_v27 }
  0x9e   :  { %v4059_v49 = vpop.eup %3621  ;;  %v130_v22 = vsub.f32 1.5, %v129_v4  ;;  %v2515_v4 = vld [vmem:[#allocation2 + $0x78] sm:$0xf0] }
  0x9f   :  { %v117_v51 = vmul.f32 %v4059_v49, %v4052_v42  ;;  %v154_v52 = vmul.f32 %v3618_v41, %v153_v48  ;;  %vm123_vm6 = vweird.f32 %v4059_v49  ;;  %v3404_v42 = vld [vmem:[#allocation2 + $0x94] sm:$0xf0]  ;;  %v2518_v14 = vor.u32 %v3398_v63, %v2515_v4 }
  0xa0   :  { %v131_v36 = vmul.f32 %v4054_v44, %v130_v22  ;;  %vm124_vm8 = vmor %vm122_vm5, %vm123_vm6  ;;  %v3436_v48 = vld [vmem:[#allocation2 + $0x194] sm:$0xf0] }
  0xa1   :  { %v118_v55 = vmul.f32 %v4059_v49, %v117_v51  ;;  %v158_v56 = vsel %vm157_vm2, %v3618_v41, %v154_v52  ;;  %v2529_v41 = vld [vmem:[#allocation2 + $0x88] sm:$0xf]  ;;  %v3434_v51 = vld [vmem:[#allocation2 + $0x18c] sm:$0xf]  ;;  %v2659_v52 = vld [vmem:[#allocation2 + $0x198] sm:$0xf0] }
  0xa2   :  { %v159_v60 = vmul.f32 %v158_v56, %v3818_v0  ;;  %v160_v61 = vmul.f32 %v158_v56, %v3823_v1  ;;  %v2563_v0 = vld [vmem:[#allocation2 + $0xd8] sm:$0xf0]  ;;  %v3442_v1 = vld [vmem:[#allocation2 + $0x1cc] sm:$0xf]  ;;  %v135_v53 = vsel %vm4077_vm7, %v4054_v44, %v131_v36  ;;  %v2530_v54 = vor.u32 %v3404_v42, %v2529_v41  ;;  %v2593_v36 = vld [vmem:[#allocation2 + $0x108] sm:$0xf] }
  0xa3   :  { %v119_v6 = vmul.f32 0.5, %v118_v55  ;;  %v2566_v25 = vor.u32 %v3410_v20, %v2563_v0  ;;  %v2694_v29 = vor.u32 %v3442_v1, %v2691_v21  ;;  %v2658_v55 = vor.u32 %v3436_v48, %v2657_v47  ;;  %v2481_v1 = vld [vmem:[#allocation2 + $0x28] sm:$0xf]  ;;  %v3392_v21 = vld [vmem:[#allocation2 + $0x34] sm:$0xf0] }
  0xa4   :  { %v161_v10 = vpack.c.bf16 %v159_v60, %v159_v60  ;;  %v162_v11 = vpack.c.bf16 %v160_v61, %v160_v61  ;;  %v2662_v60 = vor.u32 %v3434_v51, %v2659_v52  ;;  %v2641_v61 = vld [vmem:[#allocation2 + $0x168] sm:$0xf]  ;;  %v138_v3 = vmul.f32 %v135_v53, %v3828_v2  ;;  %v3418_v41 = vld [vmem:[#allocation2 + $0x10c] sm:$0xf]  ;;  %v2595_v42 = vld [vmem:[#allocation2 + $0x118] sm:$0xf0] }
  0xa5   :  { %v120_v17 = vsub.f32 1.5, %v119_v6  ;;  %v139_v44 = vmul.f32 %v135_v53, %v3837_v5  ;;  %v3430_v6 = vld [vmem:[#allocation2 + $0x16c] sm:$0xf]  ;;  %v2625_v2 = vld [vmem:[#allocation2 + $0x148] sm:$0xf]  ;;  %v2482_v30 = vor.u32 %v3392_v21, %v2481_v1  ;;  %v2598_v47 = vor.u32 %v3418_v41, %v2595_v42 }
  0xa6   :  { %363 = vmatmul.bf16.vlgmr.msra.gmra.mxu0 %v161_v10  ;;  %376 = vmatmul.bf16.vlgmr.msra.gmra.mxu1 %v162_v11  ;;  %v2646_v15 = vor.u32 %v3430_v6, %v2643_v9  ;;  %v3394_v5 = vld [vmem:[#allocation2 + $0x4c] sm:$0xf]  ;;  %v2626_v0 = vor.u32 %v3428_v16, %v2625_v2  ;;  %v2771_v42 = vld [vmem:[#allocation4 + $0x70] sm:$0xf] }
  0xa7   :  { %389 = vmatmul.bf16.vlgmr.msra.gmra.mxu2 %v161_v10  ;;  %402 = vmatmul.bf16.vlgmr.msra.gmra.mxu3 %v162_v11  ;;  %v121_v28 = vmul.f32 %v4059_v49, %v120_v17  ;;  %v2514_v10 = vor.u32 %v3400_v58, %v2513_v57  ;;  %v2642_v11 = vor.u32 %v3432_v62, %v2641_v61  ;;  %v2499_v17 = vld [vmem:[#allocation2 + $0x58] sm:$0xf0] }
  0xa8   :  { %848 = vmatpush.bf16.msra.mxu0 %v2578_v12  ;;  %862 = vmatpush.bf16.msra.mxu1 %v2706_v13  ;;  %v2497_v12 = vld [vmem:[#allocation2 + $0x48] sm:$0xf]  ;;  %v3396_v13 = vld [vmem:[#allocation2 + $0x54] sm:$0xf0]  ;;  %v2502_v22 = vor.u32 %v3394_v5, %v2499_v17 }
  0xa9   :  { %876 = vmatpush.bf16.msra.mxu2 %v2582_v18  ;;  %890 = vmatpush.bf16.msra.mxu3 %v2710_v19  ;;  %v125_v43 = vsel %vm124_vm8, %v4059_v49, %v121_v28  ;;  %v3426_v18 = vld [vmem:[#allocation2 + $0x14c] sm:$0xf]  ;;  %v2627_v19 = vld [vmem:[#allocation2 + $0x158] sm:$0xf0]  ;;  %v2498_v20 = vor.u32 %v3396_v13, %v2497_v12 }
  0xaa   :  { %v136_v49 = vmul.f32 %v125_v43, %v3844_v7  ;;  %v137_v56 = vmul.f32 %v125_v43, %v3849_v8  ;;  %v3422_v28 = vld [vmem:[#allocation2 + $0x12c] sm:$0xf]  ;;  %v2466_v43 = vor.u32 %v3388_v33, %v2465_v32 }
  0xac   :  { %849 = vmatpush.bf16.msra.mxu0 %v2562_v23  ;;  %863 = vmatpush.bf16.msra.mxu1 %v2690_v24  ;;  %v4089_v7 = vpack.c.bf16 %v138_v3, %v136_v49  ;;  %v4091_v8 = vpack.c.bf16 %v139_v44, %v137_v56  ;;  %v2630_v23 = vor.u32 %v3426_v18, %v2627_v19  ;;  %v2609_v24 = vld [vmem:[#allocation2 + $0x128] sm:$0xf] }
  0xad   :  { %877 = vmatpush.bf16.msra.mxu2 %v2566_v25  ;;  %891 = vmatpush.bf16.msra.mxu3 %v2694_v29  ;;  %v3424_v25 = vld [vmem:[#allocation2 + $0x134] sm:$0xf0]  ;;  %v2611_v29 = vld [vmem:[#allocation2 + $0x138] sm:$0xf0] }
  0xae   :  { %v2610_v31 = vor.u32 %v3424_v25, %v2609_v24  ;;  %v2614_v35 = vor.u32 %v3422_v28, %v2611_v29 }
  0xb0   :  { %850 = vmatpush.bf16.msra.mxu0 %v2546_v39  ;;  %864 = vmatpush.bf16.msra.mxu1 %v2674_v40  ;;  %v3386_v39 = vld [vmem:[#allocation2 + $0xc] sm:$0xf]  ;;  %v2467_v40 = vld [vmem:[#allocation2 + $0x18] sm:$0xf0] }
  0xb1   :  { %878 = vmatpush.bf16.msra.mxu2 %v2550_v45  ;;  %892 = vmatpush.bf16.msra.mxu3 %v2678_v46  ;;  %v2594_v45 = vor.u32 %v3420_v37, %v2593_v36  ;;  %v2470_v46 = vor.u32 %v3386_v39, %v2467_v40 }
  0xb4   :  { %851 = vmatpush.bf16.msra.mxu0 %v2530_v54  ;;  %865 = vmatpush.bf16.msra.mxu1 %v2658_v55 }
  0xb5   :  { %879 = vmatpush.bf16.msra.mxu2 %v2534_v59  ;;  %893 = vmatpush.bf16.msra.mxu3 %v2662_v60 }
  0xb6   :  { %800 = vmatmul.bf16.vlgmr.msrb.gmra.mxu0 %v4089_v7  ;;  %814 = vmatmul.bf16.vlgmr.msrb.gmra.mxu1 %v4091_v8 }
  0xb7   :  { %828 = vmatmul.bf16.vlgmr.msrb.gmra.mxu2 %v4089_v7  ;;  %842 = vmatmul.bf16.vlgmr.msrb.gmra.mxu3 %v4091_v8 }
  0xb8   :  { %852 = vmatpush.bf16.msra.mxu0 %v2514_v10  ;;  %866 = vmatpush.bf16.msra.mxu1 %v2642_v11 }
  0xb9   :  { %880 = vmatpush.bf16.msra.mxu2 %v2518_v14  ;;  %894 = vmatpush.bf16.msra.mxu3 %v2646_v15 }
  0xbc   :  { %853 = vmatpush.bf16.msra.mxu0 %v2498_v20  ;;  %867 = vmatpush.bf16.msra.mxu1 %v2626_v0 }
  0xbd   :  { %881 = vmatpush.bf16.msra.mxu2 %v2502_v22  ;;  %895 = vmatpush.bf16.msra.mxu3 %v2630_v23 }
  0xc0   :  { %854 = vmatpush.bf16.msra.mxu0 %v2482_v30  ;;  %868 = vmatpush.bf16.msra.mxu1 %v2610_v31 }
  0xc1   :  { %882 = vmatpush.bf16.msra.mxu2 %v2486_v34  ;;  %896 = vmatpush.bf16.msra.mxu3 %v2614_v35 }
  0xc4   :  { %855 = vmatpush.bf16.msra.mxu0 %v2466_v43  ;;  %869 = vmatpush.bf16.msra.mxu1 %v2594_v45  ;;  %v3464_v43 = vld [vmem:[#allocation4 + $0x74] sm:$0xf0]  ;;  %v3463_v45 = vld [vmem:[#allocation4 + $0x74] sm:$0xf] }
  0xc5   :  { %883 = vmatpush.bf16.msra.mxu2 %v2470_v46  ;;  %897 = vmatpush.bf16.msra.mxu3 %v2598_v47  ;;  %v2772_v46 = vor.u32 %v3464_v43, %v2771_v42  ;;  %v2773_v47 = vld [vmem:[#allocation4 + $0x78] sm:$0xf0] }
  0xc6   :  { %v2821_v42 = vld [vmem:[#allocation4 + $0xd8] sm:$0xf0] }
  0xc7   :  { %856 = vmatmul.bf16.vlgmr.msra.gmra.mxu0 %v4089_v7  ;;  %870 = vmatmul.bf16.vlgmr.msra.gmra.mxu1 %v4091_v8 }
  0xc8   :  { %884 = vmatmul.bf16.vlgmr.msra.gmra.mxu2 %v4089_v7  ;;  %898 = vmatmul.bf16.vlgmr.msra.gmra.mxu3 %v4091_v8 }
 0x123   :  { %v364_v48 = vpop.f32.mrf.mxu0  ;;  %v377_v38 = vpop.f32.mrf.mxu1 }
 0x124   :  { %v378_v7 = vadd.f32 %v377_v38, %v364_v48  ;;  %v2763_v48 = vld [vmem:[#allocation4 + $0x60] sm:$0xf]  ;;  %v3462_v38 = vld [vmem:[#allocation4 + $0x64] sm:$0xf0] }
 0x12a   :  { %v390_v50 = vpop.f32.mrf.mxu2  ;;  %v403_v51 = vpop.f32.mrf.mxu3 }
 0x12b   :  { %v366_v52 = vpop.f32.mrf.mxu0  ;;  %v379_v53 = vpop.f32.mrf.mxu1  ;;  %v404_v9 = vadd.f32 %v403_v51, %v390_v50  ;;  %v2776_v50 = vor.u32 %v3463_v45, %v2773_v47  ;;  %v3461_v51 = vld [vmem:[#allocation4 + $0x64] sm:$0xf]  ;;  %v2723_v45 = vld [vmem:[#allocation4 + $0x10] sm:$0xf]  ;;  %v2811_v47 = vld [vmem:[#allocation4 + $0xc0] sm:$0xf] }
 0x12c   :  { %v2765_v52 = vld [vmem:[#allocation4 + $0x68] sm:$0xf0]  ;;  %v2764_v53 = vor.u32 %v3462_v38, %v2763_v48  ;;  %v3474_v38 = vld [vmem:[#allocation4 + $0xc4] sm:$0xf0] }
 0x12d   :  { %v407_v2 = vpack.c.bf16 %v404_v9, %v378_v7  ;;  %v3457_v9 = vld [vmem:[#allocation4 + $0x44] sm:$0xf] }
 0x12f   :  { %v963_v19 = vunpack.c.h.b16 %v407_v2 }
 0x131   :  { %v964_v20 = vpack.c.b16 %v963_v19, %v963_v19 }
 0x132   :  { %v392_v54 = vpop.f32.mrf.mxu2  ;;  %v405_v55 = vpop.f32.mrf.mxu3 }
 0x133   :  { %v801_v49 = vpop.f32.mrf.mxu0  ;;  %v815_v56 = vpop.f32.mrf.mxu1  ;;  %v2768_v54 = vor.u32 %v3461_v51, %v2765_v52  ;;  %v2755_v55 = vld [vmem:[#allocation4 + $0x50] sm:$0xf]  ;;  %v2725_v51 = vld [vmem:[#allocation4 + $0x18] sm:$0xf0]  ;;  %v2812_v52 = vor.u32 %v3474_v38, %v2811_v47  ;;  %v3067_v38 = vld [vmem:[#allocation6 + $0x1c0] sm:$0xf] }
 0x134   :  { %v816_v62 = vadd.f32 %v815_v56, %v801_v49  ;;  %v3460_v49 = vld [vmem:[#allocation4 + $0x54] sm:$0xf0]  ;;  %v2835_v56 = vld [vmem:[#allocation4 + $0xf0] sm:$0xf] }
 0x13a   :  { %v829_v57 = vpop.f32.mrf.mxu2  ;;  %v843_v58 = vpop.f32.mrf.mxu3 }
 0x13b   :  { %v803_v59 = vpop.f32.mrf.mxu0  ;;  %v817_v60 = vpop.f32.mrf.mxu1  ;;  %v844_v61 = vadd.f32 %v843_v58, %v829_v57  ;;  %v3459_v57 = vld [vmem:[#allocation4 + $0x54] sm:$0xf]  ;;  %v2757_v58 = vld [vmem:[#allocation4 + $0x58] sm:$0xf0] }
 0x13c   :  { %v818_v4 = vadd.f32 %v817_v60, %v803_v59  ;;  %v3480_v59 = vld [vmem:[#allocation4 + $0xf4] sm:$0xf0] }
 0x13d   :  { %v904_v44 = vpack.c.bf16 %v844_v61, %v816_v62  ;;  %v2836_v60 = vor.u32 %v3480_v59, %v2835_v56  ;;  %v3479_v61 = vld [vmem:[#allocation4 + $0xf4] sm:$0xf]  ;;  %v2837_v62 = vld [vmem:[#allocation4 + $0xf8] sm:$0xf0]  ;;  %v2715_v56 = vld [vmem:[#allocation4] sm:$0xf] }
 0x13f   :  { %v910_v8 = vunpack.c.l.b16 %v904_v44  ;;  %v966_v11 = vunpack.c.h.b16 %v904_v44  ;;  %v2760_v44 = vor.u32 %v3459_v57, %v2757_v58  ;;  %v3450_v57 = vld [vmem:[#allocation4 + $0x4] sm:$0xf0]  ;;  %v2803_v58 = vld [vmem:[#allocation4 + $0xb0] sm:$0xf] }
 0x140   :  { %v2716_v59 = vor.u32 %v3450_v57, %v2715_v56  ;;  %v3069_v57 = vld [vmem:[#allocation6 + $0x1d0] sm:$0xf0] }
 0x142   :  { %v831_v63 = vpop.f32.mrf.mxu2  ;;  %v845_v3 = vpop.f32.mrf.mxu3 }
 0x143   :  { %v846_v6 = vadd.f32 %v845_v3, %v831_v63  ;;  %v2756_v63 = vor.u32 %v3460_v49, %v2755_v55  ;;  %v2840_v3 = vor.u32 %v3479_v61, %v2837_v62  ;;  %v2813_v55 = vld [vmem:[#allocation4 + $0xc8] sm:$0xf0]  ;;  %v3449_v61 = vld [vmem:[#allocation4 + $0x4] sm:$0xf] }
 0x144   :  { %v857_v14 = vpop.f32.mrf.mxu0  ;;  %v871_v15 = vpop.f32.mrf.mxu1  ;;  %v2717_v62 = vld [vmem:[#allocation4 + $0x8] sm:$0xf0] }
 0x145   :  { %v905_v10 = vpack.c.bf16 %v846_v6, %v818_v4  ;;  %v872_v22 = vadd.f32 %v871_v15, %v857_v14  ;;  %v2747_v4 = vld [vmem:[#allocation4 + $0x40] sm:$0xf]  ;;  %v3458_v6 = vld [vmem:[#allocation4 + $0x44] sm:$0xf0] }
 0x146   :  { %v2748_v7 = vor.u32 %v3458_v6, %v2747_v4  ;;  %v2805_v4 = vld [vmem:[#allocation4 + $0xb8] sm:$0xf0] }
 0x147   :  { %v911_v12 = vunpack.c.l.b16 %v905_v10  ;;  %v967_v13 = vunpack.c.h.b16 %v905_v10  ;;  %v2749_v10 = vld [vmem:[#allocation4 + $0x48] sm:$0xf0] }
 0x149   :  { %v912_v16 = vpack.c.b16 %v911_v12, %v910_v8  ;;  %v968_v5 = vpack.c.b16 %v967_v13, %v966_v11  ;;  %v2752_v11 = vor.u32 %v3457_v9, %v2749_v10  ;;  %v2795_v9 = vld [vmem:[#allocation4 + $0xa0] sm:$0xf]  ;;  %v3470_v10 = vld [vmem:[#allocation4 + $0xa4] sm:$0xf0] }
 0x14b   :  { %v885_v17 = vpop.f32.mrf.mxu2  ;;  %v899_v18 = vpop.f32.mrf.mxu3  ;;  %921 = vmatpush.bf16.xpose.msrb.mxu0 %v912_v16  ;;  %977 = vmatpush.bf16.xpose.msrb.mxu2 %v968_v5 }
 0x14c   :  { %v900_v0 = vadd.f32 %v899_v18, %v885_v17  ;;  %v859_v1 = vpop.f32.mrf.mxu0  ;;  %v873_v21 = vpop.f32.mrf.mxu1 }
 0x14d   :  { %v874_v26 = vadd.f32 %v873_v21, %v859_v1  ;;  %v3456_v1 = vld [vmem:[#allocation4 + $0x34] sm:$0xf0]  ;;  %v2827_v21 = vld [vmem:[#allocation4 + $0xe0] sm:$0xf] }
 0x14e   :  { %v906_v25 = vpack.c.bf16 %v900_v0, %v872_v22  ;;  %v2739_v0 = vld [vmem:[#allocation4 + $0x30] sm:$0xf] }
 0x14f   :  { %v2740_v22 = vor.u32 %v3456_v1, %v2739_v0  ;;  %v2781_v0 = vld [vmem:[#allocation4 + $0x88] sm:$0xf0] }
 0x150   :  { %v940_v29 = vunpack.c.l.b16 %v906_v25  ;;  %v993_v30 = vunpack.c.h.b16 %v906_v25  ;;  %v2741_v25 = vld [vmem:[#allocation4 + $0x38] sm:$0xf0] }
 0x152   :  { %922 = vmatmul.bf16.vlgmr.msrb.gmra.mxu0 %v407_v2  ;;  %978 = vmatmul.bf16.vlgmr.msrb.gmra.mxu2 %v964_v20 }
 0x153   :  { %v887_v23 = vpop.f32.mrf.mxu2  ;;  %v901_v24 = vpop.f32.mrf.mxu3  ;;  %1209 = vmatpush.bf16.msra.mxu0 %v2772_v46  ;;  %1235 = vmatpush.bf16.msra.mxu2 %v2776_v50  ;;  %v3452_v46 = vld [vmem:[#allocation4 + $0x14] sm:$0xf0]  ;;  %v3451_v50 = vld [vmem:[#allocation4 + $0x14] sm:$0xf] }
 0x154   :  { %v902_v27 = vadd.f32 %v901_v24, %v887_v23  ;;  %v3478_v23 = vld [vmem:[#allocation4 + $0xe4] sm:$0xf0]  ;;  %v3455_v24 = vld [vmem:[#allocation4 + $0x34] sm:$0xf]  ;;  %v2724_v48 = vor.u32 %v3452_v46, %v2723_v45  ;;  %v2939_v46 = vld [vmem:[#allocation6 + $0xc0] sm:$0xf] }
 0x155   :  { %v3085_v45 = vld [vmem:[#allocation6 + $0x1f0] sm:$0xf0] }
 0x156   :  { %v907_v28 = vpack.c.bf16 %v902_v27, %v874_v26  ;;  %v2828_v26 = vor.u32 %v3478_v23, %v2827_v21  ;;  %v2744_v27 = vor.u32 %v3455_v24, %v2741_v25 }
 0x157   :  { %1210 = vmatpush.bf16.msra.mxu0 %v2764_v53  ;;  %1236 = vmatpush.bf16.msra.mxu2 %v2768_v54  ;;  %v2728_v53 = vor.u32 %v3451_v50, %v2725_v51  ;;  %v3473_v54 = vld [vmem:[#allocation4 + $0xc4] sm:$0xf]  ;;  %v3539_v50 = vld [vmem:[#allocation6 + $0x1cc] sm:$0xf0] }
 0x158   :  { %v941_v31 = vunpack.c.l.b16 %v907_v28  ;;  %v994_v32 = vunpack.c.h.b16 %v907_v28  ;;  %v3477_v28 = vld [vmem:[#allocation4 + $0xe4] sm:$0xf]  ;;  %v2816_v49 = vor.u32 %v3473_v54, %v2813_v55  ;;  %v2941_v54 = vld [vmem:[#allocation6 + $0xd0] sm:$0xf0] }
 0x159   :  { %v3537_v55 = vld [vmem:[#allocation6 + $0x1c4] sm:$0xf] }
 0x15a   :  { %v942_v33 = vpack.c.b16 %v941_v31, %v940_v29  ;;  %v995_v34 = vpack.c.b16 %v994_v32, %v993_v30  ;;  %v2829_v29 = vld [vmem:[#allocation4 + $0xe8] sm:$0xf0]  ;;  %v2731_v30 = vld [vmem:[#allocation4 + $0x20] sm:$0xf]  ;;  %v3454_v32 = vld [vmem:[#allocation4 + $0x24] sm:$0xf0] }
 0x15b   :  { %1211 = vmatpush.bf16.msra.mxu0 %v2756_v63  ;;  %1237 = vmatpush.bf16.msra.mxu2 %v2760_v44  ;;  %v2832_v31 = vor.u32 %v3477_v28, %v2829_v29  ;;  %v3471_v44 = vld [vmem:[#allocation4 + $0xb4] sm:$0xf] }
 0x15c   :  { %954 = vmatpush.bf16.msrb.mxu1 %v942_v33  ;;  %1007 = vmatpush.bf16.msrb.mxu3 %v995_v34  ;;  %v2819_v33 = vld [vmem:[#allocation4 + $0xd0] sm:$0xf]  ;;  %v3476_v34 = vld [vmem:[#allocation4 + $0xd4] sm:$0xf0]  ;;  %v2808_v6 = vor.u32 %v3471_v44, %v2805_v4  ;;  %v2925_v44 = vld [vmem:[#allocation6 + $0xb0] sm:$0xf0] }
 0x15d   :  { %v3533_v4 = vld [vmem:[#allocation6 + $0x1a4] sm:$0xf] }
 0x15f   :  { %1212 = vmatpush.bf16.msra.mxu0 %v2748_v7  ;;  %1238 = vmatpush.bf16.msra.mxu2 %v2752_v11  ;;  %v3469_v7 = vld [vmem:[#allocation4 + $0xa4] sm:$0xf]  ;;  %v2797_v11 = vld [vmem:[#allocation4 + $0xa8] sm:$0xf0] }
 0x160   :  { %1222 = vmatpush.bf16.msra.mxu1 %v2836_v60  ;;  %1248 = vmatpush.bf16.msra.mxu3 %v2840_v3  ;;  %v3472_v60 = vld [vmem:[#allocation4 + $0xb4] sm:$0xf0]  ;;  %v2720_v3 = vor.u32 %v3449_v61, %v2717_v62  ;;  %v3051_v61 = vld [vmem:[#allocation6 + $0x1a0] sm:$0xf]  ;;  %v3535_v62 = vld [vmem:[#allocation6 + $0x1ac] sm:$0xf0] }
 0x161   :  { %v2804_v63 = vor.u32 %v3472_v60, %v2803_v58  ;;  %v2923_v58 = vld [vmem:[#allocation6 + $0xa0] sm:$0xf]  ;;  %v3072_v60 = vor.u32 %v3537_v55, %v3069_v57  ;;  %v3005_v57 = vld [vmem:[#allocation6 + $0x150] sm:$0xf0] }
 0x163   :  { %1213 = vmatpush.bf16.msra.mxu0 %v2740_v22  ;;  %1239 = vmatpush.bf16.msra.mxu2 %v2744_v27 }
 0x164   :  { %1223 = vmatpush.bf16.msra.mxu1 %v2828_v26  ;;  %1249 = vmatpush.bf16.msra.mxu3 %v2832_v31 }
 0x1cf   :  { %v923_v35 = vpop.f32.mrf.mxu0 }
 0x1d0   :  { %v928_v36 = vsel %vm927_vm9, %v923_v35, -inf }
 0x1d1   :  { %929 = vmax.xlane.f32.xlu2 %v928_v36  ;;  %v2820_v36 = vor.u32 %v3476_v34, %v2819_v33  ;;  %v2955_v33 = vld [vmem:[#allocation6 + $0xe0] sm:$0xf]  ;;  %v3511_v34 = vld [vmem:[#allocation6 + $0xec] sm:$0xf0] }
 0x1d3   :  { %1224 = vmatpush.bf16.msra.mxu1 %v2820_v36  ;;  %v2956_v36 = vor.u32 %v3511_v34, %v2955_v33 }
 0x1d5   :  { %v979_v37 = vpop.f32.mrf.mxu2 }
 0x1d6   :  { %v983_v39 = vsel %vm927_vm9, %v979_v37, -inf }
 0x1d7   :  { %984 = vmax.xlane.f32.xlu1 %v983_v39  ;;  %v925_v40 = vpop.f32.mrf.mxu0  ;;  %v2733_v39 = vld [vmem:[#allocation4 + $0x28] sm:$0xf0]  ;;  %1225 = vmatpush.bf16.msra.mxu1 %v2812_v52  ;;  %v3068_v52 = vor.u32 %v3539_v50, %v3067_v38  ;;  %v3491_v38 = vld [vmem:[#allocation6 + $0x4c] sm:$0xf0]  ;;  %v3003_v50 = vld [vmem:[#allocation6 + $0x140] sm:$0xf] }
 0x1d8   :  { %v3475_v40 = vld [vmem:[#allocation4 + $0xd4] sm:$0xf] }
 0x1d9   :  { %v2824_v43 = vor.u32 %v3475_v40, %v2821_v42  ;;  %v2957_v40 = vld [vmem:[#allocation6 + $0xf0] sm:$0xf0] }
 0x1db   :  { %1250 = vmatpush.bf16.msra.mxu3 %v2824_v43  ;;  %1226 = vmatpush.bf16.msra.mxu1 %v2804_v63  ;;  %v3541_v43 = vld [vmem:[#allocation6 + $0x1e4] sm:$0xf] }
 0x1dc   :  { %v3088_v47 = vor.u32 %v3541_v43, %v3085_v45  ;;  %v3501_v63 = vld [vmem:[#allocation6 + $0xa4] sm:$0xf] }
 0x1dd   :  { %v981_v41 = vpop.f32.mrf.mxu2 }
 0x1df   :  { %1251 = vmatpush.bf16.msra.mxu3 %v2816_v49 }
 0x1e3   :  { %1252 = vmatpush.bf16.msra.mxu3 %v2808_v6  ;;  %v3053_v6 = vld [vmem:[#allocation6 + $0x1b0] sm:$0xf0] }
 0x244   :  { %v930_v8 = vpop.xlane.xlu2 %929 }
 0x245   :  { %v931_v12 = vsub.f32 %v923_v35, %v930_v8  ;;  %v2732_v35 = vor.u32 %v3454_v32, %v2731_v30  ;;  %v2796_v8 = vor.u32 %v3470_v10, %v2795_v9  ;;  %v3052_v9 = vor.u32 %v3535_v62, %v3051_v61  ;;  %v2987_v61 = vld [vmem:[#allocation6 + $0x120] sm:$0xf] }
 0x246   :  { %v2928_v10 = vor.u32 %v3501_v63, %v2925_v44  ;;  %v3519_v63 = vld [vmem:[#allocation6 + $0x12c] sm:$0xf0]  ;;  %v2861_v44 = vld [vmem:[#allocation6 + $0x30] sm:$0xf0] }
 0x247   :  { %v932_v13 = vmul.f32 1.442695, %v931_v12  ;;  %1214 = vmatpush.bf16.msra.mxu0 %v2732_v35  ;;  %v2800_v12 = vor.u32 %v3469_v7, %v2797_v11  ;;  %1227 = vmatpush.bf16.msra.mxu1 %v2796_v8  ;;  %v3083_v35 = vld [vmem:[#allocation6 + $0x1e0] sm:$0xf]  ;;  %v3499_v8 = vld [vmem:[#allocation6 + $0x8c] sm:$0xf0] }
 0x248   :  { %v2907_v7 = vld [vmem:[#allocation6 + $0x80] sm:$0xf] }
 0x249   :  { %3623 = vpow2.f32 %v932_v13  ;;  %v2787_v13 = vld [vmem:[#allocation4 + $0x90] sm:$0xf]  ;;  %1253 = vmatpush.bf16.msra.mxu3 %v2800_v12  ;;  %v3035_v11 = vld [vmem:[#allocation6 + $0x180] sm:$0xf]  ;;  %v3056_v12 = vor.u32 %v3533_v4, %v3053_v6  ;;  %v2988_v4 = vor.u32 %v3519_v63, %v2987_v61  ;;  %v3532_v61 = vld [vmem:[#allocation6 + $0x194] sm:$0xf0] }
 0x24a   :  { %v985_v14 = vpop.xlane.xlu1 %984  ;;  %v2917_v63 = vld [vmem:[#allocation6 + $0x98] sm:$0xf0] }
 0x24b   :  { %v986_v15 = vsub.f32 %v979_v37, %v985_v14  ;;  %v3453_v37 = vld [vmem:[#allocation4 + $0x24] sm:$0xf]  ;;  %1215 = vmatpush.bf16.msra.mxu0 %v2724_v48  ;;  %v3468_v14 = vld [vmem:[#allocation4 + $0x94] sm:$0xf0]  ;;  %v3507_v48 = vld [vmem:[#allocation6 + $0xcc] sm:$0xf0] }
 0x24c   :  { %v2736_v41 = vor.u32 %v3453_v37, %v2733_v39  ;;  %v3543_v37 = vld [vmem:[#allocation6 + $0x1ec] sm:$0xf0]  ;;  %v3509_v39 = vld [vmem:[#allocation6 + $0xe4] sm:$0xf]  ;;  %v2940_v51 = vor.u32 %v3507_v48, %v2939_v46  ;;  %v2875_v48 = vld [vmem:[#allocation6 + $0x40] sm:$0xf] }
 0x24d   :  { %v987_v2 = vmul.f32 1.442695, %v986_v15  ;;  %v3467_v15 = vld [vmem:[#allocation4 + $0x94] sm:$0xf]  ;;  %v2960_v42 = vor.u32 %v3509_v39, %v2957_v40 }
 0x24e   :  { %1240 = vmatpush.bf16.msra.mxu2 %v2736_v41  ;;  %v3084_v41 = vor.u32 %v3543_v37, %v3083_v35 }
 0x24f   :  { %v3624_v16 = vpop.eup %3623  ;;  %3625 = vpow2.f32 %v987_v2  ;;  %1216 = vmatpush.bf16.msra.mxu0 %v2716_v59  ;;  %v2788_v2 = vor.u32 %v3468_v14, %v2787_v13  ;;  %v3503_v59 = vld [vmem:[#allocation6 + $0xac] sm:$0xf0]  ;;  %v3497_v14 = vld [vmem:[#allocation6 + $0x84] sm:$0xf] }
 0x250   :  { %v937_v5 = vpack.c.bf16 %v3624_v16, %v3624_v16  ;;  %v934_v17 = vsel %vm927_vm9, %v3624_v16, 0.0  ;;  %v2789_v16 = vld [vmem:[#allocation4 + $0x98] sm:$0xf0]  ;;  %v3531_v13 = vld [vmem:[#allocation6 + $0x18c] sm:$0xf0] }
 0x251   :  { %935 = vadd.xlane.f32.xlu2 %v934_v17  ;;  %1228 = vmatpush.bf16.msra.mxu1 %v2788_v2  ;;  %v2779_v17 = vld [vmem:[#allocation4 + $0x80] sm:$0xf]  ;;  %v3529_v2 = vld [vmem:[#allocation6 + $0x184] sm:$0xf] }
 0x252   :  { %2711 = vmatmul.msk.bf16.vlgmr.msrb.gmra.mxu1 %vm927_vm9, %v937_v5  ;;  %1241 = vmatpush.bf16.msra.mxu2 %v2728_v53  ;;  %v2792_v5 = vor.u32 %v3467_v15, %v2789_v16  ;;  %v3505_v53 = vld [vmem:[#allocation6 + $0xc4] sm:$0xf]  ;;  %v2909_v15 = vld [vmem:[#allocation6 + $0x90] sm:$0xf0] }
 0x253   :  { %1678 = vmatpush.bf16.msrb.mxu0 %v2956_v36  ;;  %v2944_v56 = vor.u32 %v3505_v53, %v2941_v54  ;;  %v3037_v16 = vld [vmem:[#allocation6 + $0x190] sm:$0xf0]  ;;  %v3641_v36 = vld [vmem:[%s4165_s1] sm:$0xff] }
 0x254   :  { %1254 = vmatpush.bf16.msra.mxu3 %v2792_v5  ;;  %v3489_v53 = vld [vmem:[#allocation6 + $0x44] sm:$0xf]  ;;  %v2877_v54 = vld [vmem:[#allocation6 + $0x50] sm:$0xf0] }
 0x255   :  { %v3626_v18 = vpop.eup %3625 }
 0x256   :  { %v992_v19 = vpack.c.bf16 %v3626_v18, %v3626_v18  ;;  %v989_v20 = vsel %vm927_vm9, %v3626_v18, 0.0  ;;  %1242 = vmatpush.bf16.msra.mxu2 %v2720_v3  ;;  %v3466_v18 = vld [vmem:[#allocation4 + $0x84] sm:$0xf0]  ;;  %v2924_v3 = vor.u32 %v3503_v59, %v2923_v58  ;;  %v2859_v59 = vld [vmem:[#allocation6 + $0x20] sm:$0xf] }
 0x257   :  { %990 = vadd.xlane.f32.xlu0 %v989_v20  ;;  %v2780_v20 = vor.u32 %v3466_v18, %v2779_v17  ;;  %1679 = vmatpush.bf16.msrb.mxu0 %v2940_v51  ;;  %v2908_v17 = vor.u32 %v3499_v8, %v2907_v7  ;;  %v3036_v18 = vor.u32 %v3531_v13, %v3035_v11  ;;  %v2843_v8 = vld [vmem:[#allocation6] sm:$0xf]  ;;  %v3483_v11 = vld [vmem:[#allocation6 + $0xc] sm:$0xf0] }
 0x258   :  { %2712 = vmatmul.msk.bf16.vlgmr.msrb.gmra.mxu3 %vm927_vm9, %v992_v19  ;;  %v3465_v19 = vld [vmem:[#allocation4 + $0x84] sm:$0xf]  ;;  %v2876_v51 = vor.u32 %v3491_v38, %v2875_v48  ;;  %v2844_v13 = vor.u32 %v3483_v11, %v2843_v8  ;;  %v3059_v48 = vld [vmem:[#allocation6 + $0x1a8] sm:$0xf] }
 0x259   :  { %v2784_v1 = vor.u32 %v3465_v19, %v2781_v0  ;;  %1229 = vmatpush.bf16.msra.mxu1 %v2780_v20  ;;  %v2912_v19 = vor.u32 %v3497_v14, %v2909_v15  ;;  %v2891_v20 = vld [vmem:[#allocation6 + $0x60] sm:$0xf]  ;;  %v3495_v0 = vld [vmem:[#allocation6 + $0x6c] sm:$0xf0]  ;;  %v3481_v15 = vld [vmem:[#allocation6 + $0x4] sm:$0xf] }
 0x25a   :  { %1704 = vmatpush.bf16.msrb.mxu2 %v2960_v42  ;;  %v3515_v14 = vld [vmem:[#allocation6 + $0x10c] sm:$0xf0]  ;;  %v3027_v8 = vld [vmem:[#allocation6 + $0x168] sm:$0xf] }
 0x25b   :  { %1255 = vmatpush.bf16.msra.mxu3 %v2784_v1  ;;  %1680 = vmatpush.bf16.msrb.mxu0 %v2924_v3  ;;  %v3019_v1 = vld [vmem:[#allocation6 + $0x160] sm:$0xf]  ;;  %v3485_v3 = vld [vmem:[#allocation6 + $0x24] sm:$0xf] }
 0x25c   :  { %v2864_v6 = vor.u32 %v3485_v3, %v2861_v44 }
 0x25d   :  { %1691 = vmatpush.bf16.msrb.mxu1 %v3084_v41  ;;  %v3642_v41 = vld [vmem:[%s4165_s1 + $0x8] sm:$0xff] }
 0x25e   :  { %1705 = vmatpush.bf16.msrb.mxu2 %v2944_v56  ;;  %v3521_v56 = vld [vmem:[#allocation6 + $0x144] sm:$0xf] }
 0x25f   :  { %1717 = vmatpush.bf16.msrb.mxu3 %v3088_v47  ;;  %1681 = vmatpush.bf16.msrb.mxu0 %v2908_v17  ;;  %v3008_v58 = vor.u32 %v3521_v56, %v3005_v57  ;;  %v3513_v17 = vld [vmem:[#allocation6 + $0x104] sm:$0xf]  ;;  %v2915_v57 = vld [vmem:[#allocation6 + $0x88] sm:$0xf] }
 0x261   :  { %1692 = vmatpush.bf16.msrb.mxu1 %v3068_v52  ;;  %v3523_v52 = vld [vmem:[#allocation6 + $0x14c] sm:$0xf0] }
 0x262   :  { %1706 = vmatpush.bf16.msrb.mxu2 %v2928_v10  ;;  %v3004_v55 = vor.u32 %v3523_v52, %v3003_v50  ;;  %v2989_v10 = vld [vmem:[#allocation6 + $0x130] sm:$0xf0]  ;;  %v3536_v50 = vld [vmem:[#allocation6 + $0x1b4] sm:$0xf0]  ;;  %v2933_v52 = vld [vmem:[#allocation6 + $0xb8] sm:$0xf0] }
 0x263   :  { %1718 = vmatpush.bf16.msrb.mxu3 %v3072_v60  ;;  %v3487_v60 = vld [vmem:[#allocation6 + $0x2c] sm:$0xf0] }
 0x264   :  { %v2860_v62 = vor.u32 %v3487_v60, %v2859_v59  ;;  %v3043_v59 = vld [vmem:[#allocation6 + $0x188] sm:$0xf] }
 0x265   :  { %1693 = vmatpush.bf16.msrb.mxu1 %v3052_v9  ;;  %v3517_v9 = vld [vmem:[#allocation6 + $0x124] sm:$0xf]  ;;  %v3044_v3 = vor.u32 %v3532_v61, %v3043_v59 }
 0x266   :  { %1707 = vmatpush.bf16.msrb.mxu2 %v2912_v19  ;;  %v2992_v7 = vor.u32 %v3517_v9, %v2989_v10  ;;  %v2963_v19 = vld [vmem:[#allocation6 + $0xe8] sm:$0xf] }
 0x267   :  { %1719 = vmatpush.bf16.msrb.mxu3 %v3056_v12  ;;  %v2971_v12 = vld [vmem:[#allocation6 + $0x100] sm:$0xf]  ;;  %v2899_v10 = vld [vmem:[#allocation6 + $0x68] sm:$0xf] }
 0x269   :  { %1694 = vmatpush.bf16.msrb.mxu1 %v3036_v18  ;;  %v2973_v18 = vld [vmem:[#allocation6 + $0x110] sm:$0xf0] }
 0x2c4   :  { %v936_v21 = vpop.xlane.xlu2 %935 }
 0x2c5   :  { %3627 = vrcp.f32 %v936_v21 }
 0x2ca   :  { %v991_v25 = vpop.xlane.xlu0 %990 }
 0x2cb   :  { %v3628_v22 = vpop.eup %3627  ;;  %3629 = vrcp.f32 %v991_v25  ;;  %v2893_v25 = vld [vmem:[#allocation6 + $0x70] sm:$0xf0] }
 0x2cf   :  { %v956_v23 = vpop.f32.mrf.mxu1 }
 0x2d0   :  { %v961_v24 = vmul.f32 %v3628_v22, %v956_v23  ;;  %v3040_v22 = vor.u32 %v3529_v2, %v3037_v16  ;;  %v3527_v23 = vld [vmem:[#allocation6 + $0x16c] sm:$0xf0]  ;;  %v2845_v2 = vld [vmem:[#allocation6 + $0x10] sm:$0xf0]  ;;  %v2972_v16 = vor.u32 %v3515_v14, %v2971_v12  ;;  %v3528_v12 = vld [vmem:[#allocation6 + $0x174] sm:$0xf0] }
 0x2d1   :  { %v3630_v28 = vpop.eup %3629  ;;  %v2901_v14 = vld [vmem:[#allocation6 + $0x78] sm:$0xf0] }
 0x2d2   :  { %v1015_v26 = vpack.c.bf16 %v961_v24, %v961_v24  ;;  %v3493_v24 = vld [vmem:[#allocation6 + $0x64] sm:$0xf]  ;;  %1720 = vmatpush.bf16.msrb.mxu3 %v3040_v22 }
 0x2d4   :  { %1217 = vmatmul.bf16.vlgmr.msra.gmra.mxu0 %v1015_v26  ;;  %1243 = vmatmul.bf16.vlgmr.msra.gmra.mxu2 %v1015_v26  ;;  %v3525_v26 = vld [vmem:[#allocation6 + $0x164] sm:$0xf] }
 0x2d7   :  { %v958_v27 = vpop.f32.mrf.mxu1 }
 0x2d8   :  { %v3021_v27 = vld [vmem:[#allocation6 + $0x170] sm:$0xf0] }
 0x2db   :  { %v1009_v29 = vpop.f32.mrf.mxu3 }
 0x2dc   :  { %v1014_v30 = vmul.f32 %v3630_v28, %v1009_v29  ;;  %v2892_v28 = vor.u32 %v3495_v0, %v2891_v20  ;;  %v3020_v29 = vor.u32 %v3527_v23, %v3019_v1  ;;  %v2976_v20 = vor.u32 %v3513_v17, %v2973_v18  ;;  %v3512_v0 = vld [vmem:[#allocation6 + $0xf4] sm:$0xf0]  ;;  %v3091_v1 = vld [vmem:[#allocation6 + $0x1e8] sm:$0xf] }
 0x2dd   :  { %v2964_v22 = vor.u32 %v3512_v0, %v2963_v19  ;;  %v2883_v17 = vld [vmem:[#allocation6 + $0x48] sm:$0xf]  ;;  %v3492_v19 = vld [vmem:[#allocation6 + $0x54] sm:$0xf0] }
 0x2de   :  { %v1016_v31 = vpack.c.bf16 %v1014_v30, %v1014_v30  ;;  %v2896_v30 = vor.u32 %v3493_v24, %v2893_v25  ;;  %1682 = vmatpush.bf16.msrb.mxu0 %v2892_v28  ;;  %1695 = vmatpush.bf16.msrb.mxu1 %v3020_v29  ;;  %v3510_v24 = vld [vmem:[#allocation6 + $0xec] sm:$0xf]  ;;  %v2965_v25 = vld [vmem:[#allocation6 + $0xf8] sm:$0xf0]  ;;  %v2947_v29 = vld [vmem:[#allocation6 + $0xc8] sm:$0xf] }
 0x2df   :  { %v3093_v28 = vld [vmem:[#allocation6 + $0x1f8] sm:$0xf0]  ;;  %v3524_v0 = vld [vmem:[#allocation6 + $0x154] sm:$0xf0] }
 0x2e0   :  { %1230 = vmatmul.bf16.vlgmr.msra.gmra.mxu1 %v1016_v31  ;;  %1256 = vmatmul.bf16.vlgmr.msra.gmra.mxu3 %v1016_v31 }
 0x2e1   :  { %1708 = vmatpush.bf16.msrb.mxu2 %v2896_v30  ;;  %v3508_v30 = vld [vmem:[#allocation6 + $0xd4] sm:$0xf0] }
 0x2e2   :  { %1683 = vmatpush.bf16.msrb.mxu0 %v2876_v51  ;;  %1696 = vmatpush.bf16.msrb.mxu1 %v3004_v55  ;;  %v3502_v51 = vld [vmem:[#allocation6 + $0xac] sm:$0xf] }
 0x2e3   :  { %v1011_v32 = vpop.f32.mrf.mxu3  ;;  %v3534_v55 = vld [vmem:[#allocation6 + $0x1ac] sm:$0xf] }
 0x2e4   :  { %v3024_v32 = vor.u32 %v3525_v26, %v3021_v27  ;;  %v3542_v26 = vld [vmem:[#allocation6 + $0x1ec] sm:$0xf]  ;;  %v2968_v27 = vor.u32 %v3510_v24, %v2965_v25  ;;  %v3013_v25 = vld [vmem:[#allocation6 + $0x158] sm:$0xf0] }
 0x2e6   :  { %1721 = vmatpush.bf16.msrb.mxu3 %v3024_v32  ;;  %1684 = vmatpush.bf16.msrb.mxu0 %v2860_v62  ;;  %v2948_v32 = vor.u32 %v3508_v30, %v2947_v29  ;;  %v3498_v62 = vld [vmem:[#allocation6 + $0x8c] sm:$0xf]  ;;  %v3488_v29 = vld [vmem:[#allocation6 + $0x34] sm:$0xf0]  ;;  %v2995_v30 = vld [vmem:[#allocation6 + $0x128] sm:$0xf] }
 0x2e7   :  { %1697 = vmatpush.bf16.msrb.mxu1 %v2988_v4  ;;  %v2920_v44 = vor.u32 %v3498_v62, %v2917_v63  ;;  %v3530_v4 = vld [vmem:[#allocation6 + $0x18c] sm:$0xf] }
 0x2ea   :  { %1722 = vmatpush.bf16.msrb.mxu3 %v3008_v58  ;;  %1685 = vmatpush.bf16.msrb.mxu0 %v2844_v13  ;;  %v3500_v58 = vld [vmem:[#allocation6 + $0x94] sm:$0xf0]  ;;  %v3494_v13 = vld [vmem:[#allocation6 + $0x6c] sm:$0xf] }
 0x2eb   :  { %1698 = vmatpush.bf16.msrb.mxu1 %v2972_v16  ;;  %v2916_v60 = vor.u32 %v3500_v58, %v2915_v57  ;;  %v3526_v16 = vld [vmem:[#allocation6 + $0x16c] sm:$0xf] }
 0x2ee   :  { %1723 = vmatpush.bf16.msrb.mxu3 %v2992_v7  ;;  %1730 = vmatpush.bf16.msra.mxu0 %v2964_v22  ;;  %v3496_v7 = vld [vmem:[#allocation6 + $0x74] sm:$0xf0]  ;;  %v3522_v22 = vld [vmem:[#allocation6 + $0x14c] sm:$0xf] }
 0x2ef   :  { %v2900_v11 = vor.u32 %v3496_v7, %v2899_v10 }
 0x2f2   :  { %1724 = vmatpush.bf16.msrb.mxu3 %v2976_v20  ;;  %1731 = vmatpush.bf16.msra.mxu0 %v2948_v32  ;;  %v3011_v20 = vld [vmem:[#allocation6 + $0x148] sm:$0xf] }
 0x2f3   :  { %v3012_v24 = vor.u32 %v3524_v0, %v3011_v20  ;;  %v3131_v0 = vld [vmem:[#allocation7 + $0x40] sm:$0xf] }
 0x351   :  { %v1218_v49 = vpop.f32.mrf.mxu0 }
 0x357   :  { %v1244_v5 = vpop.f32.mrf.mxu2 }
 0x359   :  { %v1220_v21 = vpop.f32.mrf.mxu0 }
 0x35a   :  { %v3544_v21 = vld [vmem:[#allocation6 + $0x1f4] sm:$0xf0] }
 0x35b   :  { %v3092_v23 = vor.u32 %v3544_v21, %v3091_v1  ;;  %v3490_v1 = vld [vmem:[#allocation6 + $0x4c] sm:$0xf]  ;;  %v2885_v21 = vld [vmem:[#allocation6 + $0x58] sm:$0xf0] }
 0x35d   :  { %v1231_v31 = vpop.f32.mrf.mxu1  ;;  %1743 = vmatpush.bf16.msra.mxu1 %v3092_v23  ;;  %v2884_v23 = vor.u32 %v3492_v19, %v2883_v17  ;;  %v3556_v19 = vld [vmem:[#allocation7 + $0x54] sm:$0xf0] }
 0x35e   :  { %v1232_v34 = vadd.f32 %v1231_v31, %v1218_v49  ;;  %v2880_v49 = vor.u32 %v3489_v53, %v2877_v54  ;;  %v3096_v31 = vor.u32 %v3542_v26, %v3093_v28  ;;  %v3060_v53 = vor.u32 %v3536_v50, %v3059_v48  ;;  %v2867_v26 = vld [vmem:[#allocation6 + $0x28] sm:$0xf] }
 0x35f   :  { %v1246_v33 = vpop.f32.mrf.mxu2  ;;  %v2936_v54 = vor.u32 %v3502_v51, %v2933_v52  ;;  %v2888_v28 = vor.u32 %v3490_v1, %v2885_v21  ;;  %v2979_v48 = vld [vmem:[#allocation6 + $0x108] sm:$0xf]  ;;  %v3482_v51 = vld [vmem:[#allocation6 + $0xc] sm:$0xf]  ;;  %v2853_v52 = vld [vmem:[#allocation6 + $0x18] sm:$0xf0] }
 0x360   :  { %v4110_v37 = vadd.f32 %v3641_v36, %v1232_v34  ;;  %1709 = vmatpush.bf16.msrb.mxu2 %v2880_v49  ;;  %v3075_v33 = vld [vmem:[#allocation6 + $0x1c8] sm:$0xf]  ;;  %v3540_v34 = vld [vmem:[#allocation6 + $0x1d4] sm:$0xf0]  ;;  %1769 = vmatpush.bf16.msra.mxu3 %v3096_v31  ;;  %v3061_v49 = vld [vmem:[#allocation6 + $0x1b8] sm:$0xf0] }
 0x361   :  { %v3076_v36 = vor.u32 %v3540_v34, %v3075_v33  ;;  %v3064_v56 = vor.u32 %v3534_v55, %v3061_v49  ;;  %v3520_v31 = vld [vmem:[#allocation6 + $0x134] sm:$0xf0]  ;;  %v3016_v33 = vor.u32 %v3522_v22, %v3013_v25  ;;  %v3486_v34 = vld [vmem:[#allocation6 + $0x2c] sm:$0xf]  ;;  %v3554_v1 = vld [vmem:[#allocation7 + $0x44] sm:$0xf0] }
 0x362   :  { %v1263_v43 = vmul.f32 %v4110_v37, %v4110_v37  ;;  %v3132_v21 = vor.u32 %v3554_v1, %v3131_v0  ;;  %v3203_v22 = vld [vmem:[#allocation7 + $0xd0] sm:$0xf]  ;;  %v3323_v0 = vld [vmem:[#allocation7 + $0x1c0] sm:$0xf] }
 0x363   :  { %v1257_v35 = vpop.f32.mrf.mxu3  ;;  %1744 = vmatpush.bf16.msra.mxu1 %v3076_v36  ;;  %v3518_v36 = vld [vmem:[#allocation6 + $0x12c] sm:$0xf]  ;;  %v3123_v25 = vld [vmem:[#allocation7 + $0x30] sm:$0xf] }
 0x364   :  { %v1258_v39 = vadd.f32 %v1257_v35, %v1244_v5  ;;  %1710 = vmatpush.bf16.msrb.mxu2 %v2864_v6  ;;  %v2848_v5 = vor.u32 %v3481_v15, %v2845_v2  ;;  %v3506_v35 = vld [vmem:[#allocation6 + $0xcc] sm:$0xf]  ;;  %v3045_v6 = vld [vmem:[#allocation6 + $0x198] sm:$0xf0]  ;;  %v3028_v15 = vor.u32 %v3528_v12, %v3027_v8  ;;  %v2904_v2 = vor.u32 %v3494_v13, %v2901_v14  ;;  %v3147_v13 = vld [vmem:[#allocation7 + $0x60] sm:$0xf] }
 0x365   :  { %v1233_v40 = vpop.f32.mrf.mxu1  ;;  %v3048_v9 = vor.u32 %v3530_v4, %v3045_v6  ;;  %v3560_v4 = vld [vmem:[#allocation7 + $0x74] sm:$0xf0]  ;;  %v3219_v6 = vld [vmem:[#allocation7 + $0xf0] sm:$0xf] }
 0x366   :  { %v4115_v42 = vadd.f32 %v3642_v41, %v1258_v39  ;;  %v2949_v39 = vld [vmem:[#allocation6 + $0xd8] sm:$0xf0]  ;;  %v3538_v40 = vld [vmem:[#allocation6 + $0x1cc] sm:$0xf] }
 0x367   :  { %v3077_v41 = vld [vmem:[#allocation6 + $0x1d8] sm:$0xf0]  ;;  %1745 = vmatpush.bf16.msra.mxu1 %v3060_v53  ;;  %v3514_v53 = vld [vmem:[#allocation6 + $0x10c] sm:$0xf] }
 0x368   :  { %v1264_v45 = vmul.f32 %v4115_v42, %v4115_v42  ;;  %1711 = vmatpush.bf16.msrb.mxu2 %v2848_v5  ;;  %v3029_v5 = vld [vmem:[#allocation6 + $0x178] sm:$0xf0] }
 0x369   :  { %v3032_v18 = vor.u32 %v3526_v16, %v3029_v5  ;;  %v3574_v16 = vld [vmem:[#allocation7 + $0xe4] sm:$0xf0] }
 0x36a   :  { %v1265_v46 = vadd.f32 %v1264_v45, %v1263_v43  ;;  %v2952_v43 = vor.u32 %v3506_v35, %v2949_v39  ;;  %v3080_v45 = vor.u32 %v3538_v40, %v3077_v41  ;;  %v2869_v35 = vld [vmem:[#allocation6 + $0x38] sm:$0xf0]  ;;  %v2868_v41 = vor.u32 %v3488_v29, %v2867_v26  ;;  %v3552_v26 = vld [vmem:[#allocation7 + $0x34] sm:$0xf0] }
 0x36b   :  { %v1259_v47 = vpop.f32.mrf.mxu3  ;;  %1746 = vmatpush.bf16.msra.mxu1 %v3044_v3  ;;  %v2997_v39 = vld [vmem:[#allocation6 + $0x138] sm:$0xf0]  ;;  %v3155_v3 = vld [vmem:[#allocation7 + $0x70] sm:$0xf]  ;;  %v3592_v29 = vld [vmem:[#allocation7 + $0x174] sm:$0xf0] }
 0x36c   :  { %1266 = vadd.xlane.f32.xlu1 %v1265_v46  ;;  %1756 = vmatpush.bf16.msra.mxu2 %v2968_v27  ;;  %v2931_v46 = vld [vmem:[#allocation6 + $0xa8] sm:$0xf]  ;;  %v3504_v47 = vld [vmem:[#allocation6 + $0xb4] sm:$0xf0]  ;;  %v3000_v50 = vor.u32 %v3518_v36, %v2997_v39  ;;  %v3156_v12 = vor.u32 %v3560_v4, %v3155_v3  ;;  %v3275_v36 = vld [vmem:[#allocation7 + $0x160] sm:$0xf] }
 0x36d   :  { %v2932_v38 = vor.u32 %v3504_v47, %v2931_v46  ;;  %1770 = vmatpush.bf16.msra.mxu3 %v3080_v45  ;;  %v2851_v45 = vld [vmem:[#allocation6 + $0x8] sm:$0xf]  ;;  %v2872_v46 = vor.u32 %v3486_v34, %v2869_v35  ;;  %v3484_v47 = vld [vmem:[#allocation6 + $0x14] sm:$0xf0]  ;;  %v3115_v34 = vld [vmem:[#allocation7 + $0x20] sm:$0xf] }
 0x36e   :  { %v2852_v55 = vor.u32 %v3484_v47, %v2851_v45  ;;  %v3550_v35 = vld [vmem:[#allocation7 + $0x24] sm:$0xf0]  ;;  %v3568_v45 = vld [vmem:[#allocation7 + $0xb4] sm:$0xf0]  ;;  %v3347_v47 = vld [vmem:[#allocation7 + $0x1f0] sm:$0xf] }
 0x36f   :  { %1732 = vmatpush.bf16.msra.mxu0 %v2932_v38  ;;  %1747 = vmatpush.bf16.msra.mxu1 %v3028_v15  ;;  %v3516_v38 = vld [vmem:[#allocation6 + $0x114] sm:$0xf0]  ;;  %v3558_v15 = vld [vmem:[#allocation7 + $0x64] sm:$0xf0]  ;;  %v3116_v39 = vor.u32 %v3550_v35, %v3115_v34  ;;  %v3559_v4 = vld [vmem:[#allocation7 + $0x74] sm:$0xf] }
 0x370   :  { %1757 = vmatpush.bf16.msra.mxu2 %v2952_v43  ;;  %v2996_v43 = vor.u32 %v3520_v31, %v2995_v30  ;;  %v2980_v49 = vor.u32 %v3516_v38, %v2979_v48  ;;  %v3148_v5 = vor.u32 %v3558_v15, %v3147_v13  ;;  %v3195_v31 = vld [vmem:[#allocation7 + $0xc0] sm:$0xf]  ;;  %v3608_v48 = vld [vmem:[#allocation7 + $0x1f4] sm:$0xf0]  ;;  %v3251_v15 = vld [vmem:[#allocation7 + $0x130] sm:$0xf] }
 0x371   :  { %1771 = vmatpush.bf16.msra.mxu3 %v3064_v56  ;;  %v2856_v56 = vor.u32 %v3482_v51, %v2853_v52  ;;  %v3348_v38 = vor.u32 %v3608_v48, %v3347_v47  ;;  %v3548_v51 = vld [vmem:[#allocation7 + $0x14] sm:$0xf0]  ;;  %v3267_v52 = vld [vmem:[#allocation7 + $0x150] sm:$0xf]  ;;  %v3573_v35 = vld [vmem:[#allocation7 + $0xe4] sm:$0xf] }
 0x372   :  { %v3604_v13 = vld [vmem:[#allocation7 + $0x1d4] sm:$0xf0]  ;;  %v3133_v47 = vld [vmem:[#allocation7 + $0x48] sm:$0xf0] }
 0x373   :  { %1733 = vmatpush.bf16.msra.mxu0 %v2916_v60  ;;  %1748 = vmatpush.bf16.msra.mxu1 %v3012_v24 }
 0x374   :  { %1758 = vmatpush.bf16.msra.mxu2 %v2936_v54  ;;  %v2981_v54 = vld [vmem:[#allocation6 + $0x118] sm:$0xf0] }
 0x375   :  { %1772 = vmatpush.bf16.msra.mxu3 %v3048_v9  ;;  %v2984_v57 = vor.u32 %v3514_v53, %v2981_v54  ;;  %v3576_v9 = vld [vmem:[#allocation7 + $0xf4] sm:$0xf0] }
 0x376   :  { %v3220_v14 = vor.u32 %v3576_v9, %v3219_v6  ;;  %v3588_v54 = vld [vmem:[#allocation7 + $0x154] sm:$0xf0]  ;;  %v3157_v6 = vld [vmem:[#allocation7 + $0x78] sm:$0xf0] }
 0x377   :  { %1734 = vmatpush.bf16.msra.mxu0 %v2900_v11  ;;  %1749 = vmatpush.bf16.msra.mxu1 %v2996_v43  ;;  %v3187_v43 = vld [vmem:[#allocation7 + $0xb0] sm:$0xf] }
 0x378   :  { %1759 = vmatpush.bf16.msra.mxu2 %v2920_v44 }
 0x379   :  { %1773 = vmatpush.bf16.msra.mxu3 %v3032_v18  ;;  %v3139_v18 = vld [vmem:[#allocation7 + $0x50] sm:$0xf] }
 0x37a   :  { %v3140_v20 = vor.u32 %v3556_v19, %v3139_v18  ;;  %v3163_v19 = vld [vmem:[#allocation7 + $0x80] sm:$0xf] }
 0x37b   :  { %1735 = vmatpush.bf16.msra.mxu0 %v2884_v23  ;;  %1750 = vmatpush.bf16.msra.mxu1 %v2980_v49  ;;  %v3572_v23 = vld [vmem:[#allocation7 + $0xd4] sm:$0xf0]  ;;  %v3179_v49 = vld [vmem:[#allocation7 + $0xa0] sm:$0xf] }
 0x37c   :  { %1760 = vmatpush.bf16.msra.mxu2 %v2904_v2  ;;  %v3211_v2 = vld [vmem:[#allocation7 + $0xe0] sm:$0xf]  ;;  %v3204_v24 = vor.u32 %v3572_v23, %v3203_v22  ;;  %v3575_v22 = vld [vmem:[#allocation7 + $0xf4] sm:$0xf]  ;;  %v3221_v23 = vld [vmem:[#allocation7 + $0xf8] sm:$0xf0] }
 0x37d   :  { %1774 = vmatpush.bf16.msra.mxu3 %v3016_v33  ;;  %v3212_v17 = vor.u32 %v3574_v16, %v3211_v2  ;;  %v3584_v2 = vld [vmem:[#allocation7 + $0x134] sm:$0xf0] }
 0x37e   :  { %v3252_v16 = vor.u32 %v3584_v2, %v3251_v15  ;;  %v3277_v2 = vld [vmem:[#allocation7 + $0x168] sm:$0xf0] }
 0x37f   :  { %1736 = vmatpush.bf16.msra.mxu0 %v2868_v41 }
 0x380   :  { %1761 = vmatpush.bf16.msra.mxu2 %v2888_v28  ;;  %v3124_v28 = vor.u32 %v3552_v26, %v3123_v25  ;;  %v3224_v25 = vor.u32 %v3575_v22, %v3221_v23  ;;  %v3243_v26 = vld [vmem:[#allocation7 + $0x120] sm:$0xf]  ;;  %v3349_v23 = vld [vmem:[#allocation7 + $0x1f8] sm:$0xf0] }
 0x381   :  { %1775 = vmatpush.bf16.msra.mxu3 %v3000_v50  ;;  %v3107_v50 = vld [vmem:[#allocation7 + $0x10] sm:$0xf] }
 0x382   :  { %v3108_v53 = vor.u32 %v3548_v51, %v3107_v50  ;;  %v3598_v50 = vld [vmem:[#allocation7 + $0x1a4] sm:$0xf0] }
 0x383   :  { %1737 = vmatpush.bf16.msra.mxu0 %v2852_v55  ;;  %v3268_v55 = vor.u32 %v3588_v54, %v3267_v52  ;;  %v3571_v52 = vld [vmem:[#allocation7 + $0xd4] sm:$0xf] }
 0x384   :  { %1762 = vmatpush.bf16.msra.mxu2 %v2872_v46  ;;  %v3188_v46 = vor.u32 %v3568_v45, %v3187_v43  ;;  %v4126_v43 = vld [vmem:[%s4170_s6] sm:$0xf] }
 0x385   :  { %1776 = vmatpush.bf16.msra.mxu3 %v2984_v57  ;;  %v3339_v57 = vld [vmem:[#allocation7 + $0x1e0] sm:$0xf]  ;;  %v1350_v54 = vperm.slane %v4126_v43, 0 }
 0x388   :  { %1763 = vmatpush.bf16.msra.mxu2 %v2856_v56  ;;  %v3566_v56 = vld [vmem:[#allocation7 + $0xa4] sm:$0xf0] }
 0x3df   :  { %v1267_v27 = vpop.xlane.xlu1 %1266 }
 0x3e0   :  { %v1268_v32 = vmul.f32 0.007575758, %v1267_v27  ;;  %v3283_v27 = vld [vmem:[#allocation7 + $0x170] sm:$0xf] }
 0x3e1   :  { %v3284_v30 = vor.u32 %v3592_v29, %v3283_v27  ;;  %v3582_v27 = vld [vmem:[#allocation7 + $0x124] sm:$0xf0]  ;;  %v3555_v29 = vld [vmem:[#allocation7 + $0x54] sm:$0xf] }
 0x3e2   :  { %v1269_v40 = vadd.f32 1e-06, %v1268_v32  ;;  %v3570_v32 = vld [vmem:[#allocation7 + $0xc4] sm:$0xf0] }
 0x3e3   :  { %v3196_v33 = vor.u32 %v3570_v32, %v3195_v31  ;;  %v3315_v32 = vld [vmem:[#allocation7 + $0x1b0] sm:$0xf] }
 0x3e4   :  { %3631 = vrsqrt.f32 %v1269_v40  ;;  %vm1276_vm11 = vweird.f32 %v1269_v40 }
 0x3ea   :  { %v3632_v58 = vpop.eup %3631 }
 0x3eb   :  { %v1271_v59 = vmul.f32 %v3632_v58, %v1269_v40  ;;  %vm1277_vm10 = vweird.f32 %v3632_v58  ;;  %v3590_v40 = vld [vmem:[#allocation7 + $0x164] sm:$0xf0] }
 0x3ec   :  { %vm1278_vm12 = vmor %vm1276_vm11, %vm1277_vm10  ;;  %v3276_v41 = vor.u32 %v3590_v40, %v3275_v36  ;;  %v3213_v36 = vld [vmem:[#allocation7 + $0xe8] sm:$0xf0]  ;;  %v3235_v40 = vld [vmem:[#allocation7 + $0x110] sm:$0xf] }
 0x3ed   :  { %v1272_v60 = vmul.f32 %v3632_v58, %v1271_v59  ;;  %v3606_v59 = vld [vmem:[#allocation7 + $0x1e4] sm:$0xf0] }
 0x3ef   :  { %v1273_v61 = vmul.f32 0.5, %v1272_v60  ;;  %v3340_v60 = vor.u32 %v3606_v59, %v3339_v57  ;;  %v3125_v59 = vld [vmem:[#allocation7 + $0x38] sm:$0xf0] }
 0x3f1   :  { %v1274_v62 = vsub.f32 1.5, %v1273_v61  ;;  %v3099_v61 = vld [vmem:[#allocation7] sm:$0xf] }
 0x3f3   :  { %v1275_v63 = vmul.f32 %v3632_v58, %v1274_v62  ;;  %v3546_v62 = vld [vmem:[#allocation7 + $0x4] sm:$0xf0] }
 0x3f4   :  { %v3100_v3 = vor.u32 %v3546_v62, %v3099_v61  ;;  %v3285_v62 = vld [vmem:[#allocation7 + $0x178] sm:$0xf0] }
 0x3f5   :  { %v1279_v44 = vsel %vm1278_vm12, %v3632_v58, %v1275_v63  ;;  %v3180_v58 = vor.u32 %v3566_v56, %v3179_v49  ;;  %v3259_v63 = vld [vmem:[#allocation7 + $0x140] sm:$0xf]  ;;  %v3578_v56 = vld [vmem:[#allocation7 + $0x104] sm:$0xf0] }
 0x3f6   :  { %v1280_v10 = vmul.f32 %v1279_v44, %v4110_v37  ;;  %v1281_v7 = vmul.f32 %v1279_v44, %v4115_v42  ;;  %v3586_v44 = vld [vmem:[#allocation7 + $0x144] sm:$0xf0]  ;;  %v3227_v49 = vld [vmem:[#allocation7 + $0x100] sm:$0xf] }
 0x3f7   :  { %v3260_v9 = vor.u32 %v3586_v44, %v3259_v63  ;;  %v3228_v57 = vor.u32 %v3578_v56, %v3227_v49  ;;  %v3299_v63 = vld [vmem:[#allocation7 + $0x190] sm:$0xf]  ;;  %v3563_v49 = vld [vmem:[#allocation7 + $0x94] sm:$0xf]  ;;  %v3173_v56 = vld [vmem:[#allocation7 + $0x98] sm:$0xf0] }
 0x3f8   :  { %v1282_v8 = vpack.c.bf16 %v1280_v10, %v1280_v10  ;;  %v1283_v11 = vpack.c.bf16 %v1281_v7, %v1281_v7  ;;  %v3160_v10 = vor.u32 %v3559_v4, %v3157_v6  ;;  %v3171_v7 = vld [vmem:[#allocation7 + $0x90] sm:$0xf]  ;;  %v3569_v6 = vld [vmem:[#allocation7 + $0xc4] sm:$0xf] }
 0x3fa   :  { %1686 = vmatmul.bf16.vlgmr.msrb.gmra.mxu0 %v1282_v8  ;;  %1699 = vmatmul.bf16.vlgmr.msrb.gmra.mxu1 %v1283_v11 }
 0x3fb   :  { %1712 = vmatmul.bf16.vlgmr.msrb.gmra.mxu2 %v1282_v8  ;;  %1725 = vmatmul.bf16.vlgmr.msrb.gmra.mxu3 %v1283_v11 }
 0x3fc   :  { %2212 = vmatpush.bf16.msrb.mxu0 %v3156_v12  ;;  %2225 = vmatpush.bf16.msrb.mxu1 %v3220_v14 }
 0x3fd   :  { %2238 = vmatpush.bf16.msrb.mxu2 %v3284_v30  ;;  %2251 = vmatpush.bf16.msrb.mxu3 %v3348_v38  ;;  %v3141_v30 = vld [vmem:[#allocation7 + $0x58] sm:$0xf0]  ;;  %v3307_v38 = vld [vmem:[#allocation7 + $0x1a0] sm:$0xf] }
 0x3fe   :  { %v3144_v31 = vor.u32 %v3555_v29, %v3141_v30  ;;  %v3308_v51 = vor.u32 %v3598_v50, %v3307_v38  ;;  %v3269_v30 = vld [vmem:[#allocation7 + $0x158] sm:$0xf0]  ;;  %v3101_v50 = vld [vmem:[#allocation7 + $0x8] sm:$0xf0] }
 0x400   :  { %2213 = vmatpush.bf16.msrb.mxu0 %v3148_v5  ;;  %2226 = vmatpush.bf16.msrb.mxu1 %v3212_v17  ;;  %v3557_v5 = vld [vmem:[#allocation7 + $0x64] sm:$0xf]  ;;  %v3149_v17 = vld [vmem:[#allocation7 + $0x68] sm:$0xf0] }
 0x401   :  { %2239 = vmatpush.bf16.msrb.mxu2 %v3276_v41  ;;  %2252 = vmatpush.bf16.msrb.mxu3 %v3340_v60  ;;  %v3152_v18 = vor.u32 %v3557_v5, %v3149_v17  ;;  %v3580_v41 = vld [vmem:[#allocation7 + $0x114] sm:$0xf0]  ;;  %v3591_v60 = vld [vmem:[#allocation7 + $0x174] sm:$0xf]  ;;  %v3594_v5 = vld [vmem:[#allocation7 + $0x184] sm:$0xf0] }
 0x402   :  { %v3236_v45 = vor.u32 %v3580_v41, %v3235_v40  ;;  %v3288_v44 = vor.u32 %v3591_v60, %v3285_v62  ;;  %v3605_v40 = vld [vmem:[#allocation7 + $0x1e4] sm:$0xf]  ;;  %v3341_v41 = vld [vmem:[#allocation7 + $0x1e8] sm:$0xf0]  ;;  %v3333_v60 = vld [vmem:[#allocation7 + $0x1d8] sm:$0xf0] }
 0x403   :  { %v3344_v38 = vor.u32 %v3605_v40, %v3341_v41 }
 0x404   :  { %2214 = vmatpush.bf16.msrb.mxu0 %v3140_v20  ;;  %2227 = vmatpush.bf16.msrb.mxu1 %v3204_v24  ;;  %v3562_v20 = vld [vmem:[#allocation7 + $0x84] sm:$0xf0] }
 0x405   :  { %2240 = vmatpush.bf16.msrb.mxu2 %v3268_v55  ;;  %v3164_v1 = vor.u32 %v3562_v20, %v3163_v19  ;;  %v3567_v20 = vld [vmem:[#allocation7 + $0xb4] sm:$0xf] }
 0x408   :  { %2215 = vmatpush.bf16.msrb.mxu0 %v3132_v21  ;;  %2228 = vmatpush.bf16.msrb.mxu1 %v3196_v33  ;;  %v3602_v21 = vld [vmem:[#allocation7 + $0x1c4] sm:$0xf0]  ;;  %v3600_v33 = vld [vmem:[#allocation7 + $0x1b4] sm:$0xf0] }
 0x409   :  { %2241 = vmatpush.bf16.msrb.mxu2 %v3260_v9  ;;  %v3324_v24 = vor.u32 %v3602_v21, %v3323_v0  ;;  %v3316_v34 = vor.u32 %v3600_v33, %v3315_v32  ;;  %v3197_v9 = vld [vmem:[#allocation7 + $0xc8] sm:$0xf0]  ;;  %v3189_v0 = vld [vmem:[#allocation7 + $0xb8] sm:$0xf0]  ;;  %v1351_v21 = vperm.slane %v4126_v43, 1 }
 0x40a   :  { %1738 = vmatmul.bf16.vlgmr.msra.gmra.mxu0 %v1282_v8  ;;  %1751 = vmatmul.bf16.vlgmr.msra.gmra.mxu1 %v1283_v11  ;;  %v3192_v22 = vor.u32 %v3567_v20, %v3189_v0  ;;  %v3181_v32 = vld [vmem:[#allocation7 + $0xa8] sm:$0xf0] }
 0x40b   :  { %1764 = vmatmul.bf16.vlgmr.msra.gmra.mxu2 %v1282_v8  ;;  %1777 = vmatmul.bf16.vlgmr.msra.gmra.mxu3 %v1283_v11  ;;  %v3564_v8 = vld [vmem:[#allocation7 + $0x94] sm:$0xf0]  ;;  %v3331_v11 = vld [vmem:[#allocation7 + $0x1d0] sm:$0xf] }
 0x40c   :  { %2216 = vmatpush.bf16.msrb.mxu0 %v3124_v28  ;;  %2229 = vmatpush.bf16.msrb.mxu1 %v3188_v46  ;;  %v3172_v12 = vor.u32 %v3564_v8, %v3171_v7  ;;  %v3332_v14 = vor.u32 %v3604_v13, %v3331_v11  ;;  %v3244_v28 = vor.u32 %v3582_v27, %v3243_v26  ;;  %v3553_v46 = vld [vmem:[#allocation7 + $0x44] sm:$0xf]  ;;  %v3117_v13 = vld [vmem:[#allocation7 + $0x28] sm:$0xf0]  ;;  %v3547_v26 = vld [vmem:[#allocation7 + $0x14] sm:$0xf] }
 0x40d   :  { %2242 = vmatpush.bf16.msrb.mxu2 %v3252_v16  ;;  %v3136_v48 = vor.u32 %v3553_v46, %v3133_v47  ;;  %v3200_v8 = vor.u32 %v3569_v6, %v3197_v9  ;;  %v3291_v16 = vld [vmem:[#allocation7 + $0x180] sm:$0xf]  ;;  %v3109_v27 = vld [vmem:[#allocation7 + $0x18] sm:$0xf0] }
 0x40e   :  { %2253 = vmatpush.bf16.msrb.mxu3 %v3332_v14  ;;  %v3589_v14 = vld [vmem:[#allocation7 + $0x164] sm:$0xf]  ;;  %v3292_v19 = vor.u32 %v3594_v5, %v3291_v16  ;;  %v3112_v29 = vor.u32 %v3547_v26, %v3109_v27  ;;  %v3253_v6 = vld [vmem:[#allocation7 + $0x138] sm:$0xf0]  ;;  %v3245_v16 = vld [vmem:[#allocation7 + $0x128] sm:$0xf0] }
 0x40f   :  { %v1353_v26 = vperm.slane %v4126_v43, 3 }
 0x410   :  { %2217 = vmatpush.bf16.msrb.mxu0 %v3116_v39  ;;  %2230 = vmatpush.bf16.msrb.mxu1 %v3180_v58  ;;  %v3216_v39 = vor.u32 %v3573_v35, %v3213_v36  ;;  %v3551_v58 = vld [vmem:[#allocation7 + $0x34] sm:$0xf] }
 0x411   :  { %2243 = vmatpush.bf16.msrb.mxu2 %v3244_v28  ;;  %v3128_v61 = vor.u32 %v3551_v58, %v3125_v59  ;;  %v3587_v28 = vld [vmem:[#allocation7 + $0x154] sm:$0xf]  ;;  %v3176_v58 = vor.u32 %v3563_v49, %v3173_v56 }
 0x412   :  { %2254 = vmatpush.bf16.msrb.mxu3 %v3324_v24  ;;  %v3272_v36 = vor.u32 %v3587_v28, %v3269_v30  ;;  %v3603_v59 = vld [vmem:[#allocation7 + $0x1d4] sm:$0xf] }
 0x413   :  { %v3336_v62 = vor.u32 %v3603_v59, %v3333_v60  ;;  %v3579_v30 = vld [vmem:[#allocation7 + $0x114] sm:$0xf] }
 0x414   :  { %2218 = vmatpush.bf16.msrb.mxu0 %v3108_v53  ;;  %2231 = vmatpush.bf16.msrb.mxu1 %v3172_v12  ;;  %v3205_v53 = vld [vmem:[#allocation7 + $0xd8] sm:$0xf0]  ;;  %v3549_v12 = vld [vmem:[#allocation7 + $0x24] sm:$0xf] }
 0x415   :  { %2244 = vmatpush.bf16.msrb.mxu2 %v3236_v45  ;;  %v3208_v55 = vor.u32 %v3571_v52, %v3205_v53  ;;  %v3120_v15 = vor.u32 %v3549_v12, %v3117_v13  ;;  %v3545_v45 = vld [vmem:[#allocation7 + $0x4] sm:$0xf]  ;;  %v3261_v52 = vld [vmem:[#allocation7 + $0x148] sm:$0xf0] }
 0x416   :  { %2255 = vmatpush.bf16.msrb.mxu3 %v3316_v34 }
 0x418   :  { %2219 = vmatpush.bf16.msrb.mxu0 %v3100_v3  ;;  %2232 = vmatpush.bf16.msrb.mxu1 %v3164_v1  ;;  %v3596_v3 = vld [vmem:[#allocation7 + $0x194] sm:$0xf0]  ;;  %v3607_v1 = vld [vmem:[#allocation7 + $0x1f4] sm:$0xf] }
 0x419   :  { %v3300_v4 = vor.u32 %v3596_v3, %v3299_v63  ;;  %2245 = vmatpush.bf16.msrb.mxu2 %v3228_v57  ;;  %v1352_v3 = vperm.slane %v4126_v43, 2 }
 0x41a   :  { %2256 = vmatpush.bf16.msrb.mxu3 %v3308_v51  ;;  %v3585_v51 = vld [vmem:[#allocation7 + $0x144] sm:$0xf] }
 0x41c   :  { %2264 = vmatpush.bf16.msra.mxu0 %v3160_v10  ;;  %2277 = vmatpush.bf16.msra.mxu1 %v3224_v25  ;;  %v3352_v25 = vor.u32 %v3607_v1, %v3349_v23  ;;  %v3599_v23 = vld [vmem:[#allocation7 + $0x1b4] sm:$0xf] }
 0x41d   :  { %2290 = vmatpush.bf16.msra.mxu2 %v3288_v44 }
 0x41e   :  { %2257 = vmatpush.bf16.msrb.mxu3 %v3300_v4  ;;  %v3583_v4 = vld [vmem:[#allocation7 + $0x134] sm:$0xf] }
 0x420   :  { %2265 = vmatpush.bf16.msra.mxu0 %v3152_v18  ;;  %2278 = vmatpush.bf16.msra.mxu1 %v3216_v39  ;;  %v3280_v18 = vor.u32 %v3589_v14, %v3277_v2  ;;  %v3581_v2 = vld [vmem:[#allocation7 + $0x124] sm:$0xf] }
 0x421   :  { %v3248_v1 = vor.u32 %v3581_v2, %v3245_v16 }
 0x422   :  { %2291 = vmatpush.bf16.msra.mxu2 %v3280_v18  ;;  %2258 = vmatpush.bf16.msrb.mxu3 %v3292_v19 }
 0x424   :  { %2266 = vmatpush.bf16.msra.mxu0 %v3144_v31  ;;  %2279 = vmatpush.bf16.msra.mxu1 %v3208_v55  ;;  %v3565_v31 = vld [vmem:[#allocation7 + $0xa4] sm:$0xf]  ;;  %v3264_v55 = vor.u32 %v3585_v51, %v3261_v52  ;;  %v3301_v51 = vld [vmem:[#allocation7 + $0x198] sm:$0xf0] }
 0x425   :  { %v3184_v39 = vor.u32 %v3565_v31, %v3181_v32  ;;  %v3237_v31 = vld [vmem:[#allocation7 + $0x118] sm:$0xf0]  ;;  %v3597_v32 = vld [vmem:[#allocation7 + $0x1a4] sm:$0xf] }
 0x426   :  { %2303 = vmatpush.bf16.msra.mxu3 %v3352_v25  ;;  %2292 = vmatpush.bf16.msra.mxu2 %v3272_v36  ;;  %v3577_v36 = vld [vmem:[#allocation7 + $0x104] sm:$0xf] }
 0x428   :  { %2267 = vmatpush.bf16.msra.mxu0 %v3136_v48  ;;  %2280 = vmatpush.bf16.msra.mxu1 %v3200_v8  ;;  %v3165_v8 = vld [vmem:[#allocation7 + $0x88] sm:$0xf0] }
 0x42a   :  { %2304 = vmatpush.bf16.msra.mxu3 %v3344_v38  ;;  %2293 = vmatpush.bf16.msra.mxu2 %v3264_v55 }
 0x42c   :  { %2268 = vmatpush.bf16.msra.mxu0 %v3128_v61  ;;  %2281 = vmatpush.bf16.msra.mxu1 %v3192_v22 }
 0x42e   :  { %2305 = vmatpush.bf16.msra.mxu3 %v3336_v62 }
 0x430   :  { %2269 = vmatpush.bf16.msra.mxu0 %v3120_v15  ;;  %2282 = vmatpush.bf16.msra.mxu1 %v3184_v39  ;;  %v3325_v15 = vld [vmem:[#allocation7 + $0x1c8] sm:$0xf0] }
 0x434   :  { %2270 = vmatpush.bf16.msra.mxu0 %v3112_v29  ;;  %2283 = vmatpush.bf16.msra.mxu1 %v3176_v58 }
 0x477   :  { %v1687_v10 = vpop.f32.mrf.mxu0  ;;  %v1700_v7 = vpop.f32.mrf.mxu1 }
 0x478   :  { %v1688_v11 = vadd.f32 %v1687_v10, %v1350_v54  ;;  %v3104_v54 = vor.u32 %v3545_v45, %v3101_v50  ;;  %v3256_v10 = vor.u32 %v3583_v4, %v3253_v6  ;;  %v3229_v45 = vld [vmem:[#allocation7 + $0x108] sm:$0xf0]  ;;  %v3595_v50 = vld [vmem:[#allocation7 + $0x194] sm:$0xf] }
 0x479   :  { %v3304_v56 = vor.u32 %v3595_v50, %v3301_v51 }
 0x47a   :  { %v4129_v17 = vadd.f32 %v1700_v7, %v1688_v11  ;;  %2271 = vmatpush.bf16.msra.mxu0 %v3104_v54  ;;  %v3561_v7 = vld [vmem:[#allocation7 + $0x84] sm:$0xf]  ;;  %2294 = vmatpush.bf16.msra.mxu2 %v3256_v10 }
 0x47b   :  { %v3601_v11 = vld [vmem:[#allocation7 + $0x1c4] sm:$0xf]  ;;  %v3168_v14 = vor.u32 %v3561_v7, %v3165_v8 }
 0x47c   :  { %v1782_v24 = vmul.f32 %v4129_v17, %v4129_v17  ;;  %v3328_v20 = vor.u32 %v3601_v11, %v3325_v15 }
 0x47d   :  { %2284 = vmatpush.bf16.msra.mxu1 %v3168_v14 }
 0x47e   :  { %v1786_v33 = vmul.f32 %v1782_v24, %v4129_v17  ;;  %v1713_v34 = vpop.f32.mrf.mxu2  ;;  %v1726_v35 = vpop.f32.mrf.mxu3  ;;  %2306 = vmatpush.bf16.msra.mxu3 %v3328_v20  ;;  %v3317_v24 = vld [vmem:[#allocation7 + $0x1b8] sm:$0xf0]  ;;  %2295 = vmatpush.bf16.msra.mxu2 %v3248_v1 }
 0x47f   :  { %v1714_v46 = vadd.f32 %v1713_v34, %v1351_v21  ;;  %v1689_v47 = vpop.f32.mrf.mxu0  ;;  %v1702_v48 = vpop.f32.mrf.mxu1  ;;  %v3320_v27 = vor.u32 %v3599_v23, %v3317_v24  ;;  %v3240_v34 = vor.u32 %v3579_v30, %v3237_v31 }
 0x480   :  { %v1790_v53 = vmul.f32 0.044715, %v1786_v33 }
 0x481   :  { %v4135_v57 = vadd.f32 %v1726_v35, %v1714_v46  ;;  %v3309_v35 = vld [vmem:[#allocation7 + $0x1a8] sm:$0xf0] }
 0x482   :  { %v1794_v61 = vadd.f32 %v1790_v53, %v4129_v17  ;;  %2307 = vmatpush.bf16.msra.mxu3 %v3320_v27  ;;  %v3312_v43 = vor.u32 %v3597_v32, %v3309_v35  ;;  %2296 = vmatpush.bf16.msra.mxu2 %v3240_v34  ;;  %v3232_v53 = vor.u32 %v3577_v36, %v3229_v45 }
 0x483   :  { %v1783_v63 = vmul.f32 %v4135_v57, %v4135_v57 }
 0x484   :  { %v1798_v44 = vmul.f32 0.7978846, %v1794_v61 }
 0x485   :  { %v1787_v9 = vmul.f32 %v1783_v63, %v4135_v57 }
 0x486   :  { %3633 = vtanh.f32 %v1798_v44  ;;  %v1715_v12 = vpop.f32.mrf.mxu2  ;;  %v1728_v13 = vpop.f32.mrf.mxu3  ;;  %2308 = vmatpush.bf16.msra.mxu3 %v3312_v43  ;;  %2297 = vmatpush.bf16.msra.mxu2 %v3232_v53  ;;  %v3293_v44 = vld [vmem:[#allocation7 + $0x188] sm:$0xf0] }
 0x487   :  { %v1791_v5 = vmul.f32 0.044715, %v1787_v9  ;;  %v1739_v18 = vpop.f32.mrf.mxu0  ;;  %v1752_v19 = vpop.f32.mrf.mxu1 }
 0x488   :  { %v1740_v0 = vadd.f32 %v1739_v18, %v1352_v3  ;;  %v3593_v3 = vld [vmem:[#allocation7 + $0x184] sm:$0xf] }
 0x489   :  { %v1795_v21 = vadd.f32 %v1791_v5, %v4135_v57 }
 0x48a   :  { %v4143_v22 = vadd.f32 %v1752_v19, %v1740_v0  ;;  %2309 = vmatpush.bf16.msra.mxu3 %v3304_v56 }
 0x48b   :  { %v1799_v25 = vmul.f32 0.7978846, %v1795_v21 }
 0x48c   :  { %v3634_v28 = vpop.eup %3633  ;;  %v1784_v29 = vmul.f32 %v4143_v22, %v4143_v22 }
 0x48d   :  { %3635 = vtanh.f32 %v1799_v25  ;;  %v1806_v33 = vadd.f32 1.0, %v3634_v28 }
 0x48e   :  { %v1788_v39 = vmul.f32 %v1784_v29, %v4143_v22  ;;  %v1765_v40 = vpop.f32.mrf.mxu2  ;;  %v1778_v41 = vpop.f32.mrf.mxu3 }
 0x48f   :  { %v1766_v46 = vadd.f32 %v1765_v40, %v1353_v26  ;;  %v1741_v47 = vpop.f32.mrf.mxu0  ;;  %v1754_v48 = vpop.f32.mrf.mxu1  ;;  %v1810_v38 = vmul.f32 0.5, %v1806_v33 }
 0x490   :  { %v1792_v52 = vmul.f32 0.044715, %v1788_v39 }
 0x491   :  { %v1779_v54 = vadd.f32 %v1778_v41, %v1766_v46  ;;  %v1814_v55 = vmul.f32 %v1810_v38, %v4129_v17  ;;  %v3296_v17 = vor.u32 %v3593_v3, %v3293_v44 }
 0x492   :  { %v1796_v49 = vadd.f32 %v1792_v52, %v4143_v22 }
 0x493   :  { %v3636_v58 = vpop.eup %3635  ;;  %v1785_v59 = vmul.f32 %v1779_v54, %v1779_v54  ;;  %v1818_v60 = vpack.c.bf16 %v1814_v55, %v1814_v55  ;;  %2310 = vmatpush.bf16.msra.mxu3 %v3296_v17 }
 0x494   :  { %v1800_v61 = vmul.f32 0.7978846, %v1796_v49  ;;  %v1807_v62 = vadd.f32 1.0, %v3636_v58 }
 0x495   :  { %v1789_v63 = vmul.f32 %v1785_v59, %v1779_v54  ;;  %2220 = vmatmul.bf16.vlgmr.msrb.gmra.mxu0 %v1818_v60 }
 0x496   :  { %3637 = vtanh.f32 %v1800_v61  ;;  %v1767_v4 = vpop.f32.mrf.mxu2  ;;  %v1780_v6 = vpop.f32.mrf.mxu3  ;;  %v1811_v9 = vmul.f32 0.5, %v1807_v62 }
 0x497   :  { %v1793_v10 = vmul.f32 0.044715, %v1789_v63 }
 0x498   :  { %v1815_v7 = vmul.f32 %v1811_v9, %v4135_v57 }
 0x499   :  { %v1797_v8 = vadd.f32 %v1793_v10, %v1779_v54 }
 0x49a   :  { %v1819_v11 = vpack.c.bf16 %v1815_v7, %v1815_v7 }
 0x49b   :  { %v1801_v12 = vmul.f32 0.7978846, %v1797_v8 }
 0x49c   :  { %v3638_v13 = vpop.eup %3637  ;;  %2233 = vmatmul.bf16.vlgmr.msrb.gmra.mxu1 %v1819_v11 }
 0x49d   :  { %3639 = vtanh.f32 %v1801_v12  ;;  %v1808_v14 = vadd.f32 1.0, %v3638_v13 }
 0x49f   :  { %v1812_v15 = vmul.f32 0.5, %v1808_v14 }
 0x4a1   :  { %v1816_v2 = vmul.f32 %v1812_v15, %v4143_v22  ;;  %v1886_v22 = vld [vmem:[%s4172_s8] sm:$0x3] }
 0x4a2   :  { %v1888_v25 = vperm.slane %v1886_v22, 0  ;;  %v1889_v39 = vperm.slane %v1886_v22, 1 }
 0x4a3   :  { %v3640_v16 = vpop.eup %3639  ;;  %v1820_v5 = vpack.c.bf16 %v1816_v2, %v1816_v2 }
 0x4a4   :  { %v1809_v18 = vadd.f32 1.0, %v3640_v16 }
 0x4a5   :  { %2246 = vmatmul.bf16.vlgmr.msrb.gmra.mxu2 %v1820_v5  ;;  %2272 = vmatmul.bf16.vlgmr.msra.gmra.mxu0 %v1818_v60 }
 0x4a6   :  { %v1813_v19 = vmul.f32 0.5, %v1809_v18 }
 0x4a8   :  { %v1817_v20 = vmul.f32 %v1813_v19, %v1779_v54 }
 0x4aa   :  { %v1821_v0 = vpack.c.bf16 %v1817_v20, %v1817_v20 }
 0x4ac   :  { %2259 = vmatmul.bf16.vlgmr.msrb.gmra.mxu3 %v1821_v0  ;;  %2285 = vmatmul.bf16.vlgmr.msra.gmra.mxu1 %v1819_v11 }
 0x4b5   :  { %2298 = vmatmul.bf16.vlgmr.msra.gmra.mxu2 %v1820_v5 }
 0x4bc   :  { %2311 = vmatmul.bf16.vlgmr.msra.gmra.mxu3 %v1821_v0 }
 0x512   :  { %v2221_v57 = vpop.f32.mrf.mxu0 }
 0x513   :  { %v2222_v28 = vadd.f32 %v2221_v57, %v1888_v25 }
 0x519   :  { %v2234_v1 = vpop.f32.mrf.mxu1 }
 0x51a   :  { %v2223_v21 = vpop.f32.mrf.mxu0  ;;  %v2235_v30 = vadd.f32 %v2234_v1, %v2222_v28 }
 0x521   :  { %v2236_v23 = vpop.f32.mrf.mxu1 }
 0x522   :  { %v2273_v24 = vpop.f32.mrf.mxu0 }
 0x523   :  { %v2274_v43 = vadd.f32 %v2273_v24, %v1889_v39 }
 0x528   :  { %v2247_v26 = vpop.f32.mrf.mxu2 }
 0x529   :  { %v2286_v27 = vpop.f32.mrf.mxu1  ;;  %v2248_v31 = vadd.f32 %v2247_v26, %v2235_v30 }
 0x52a   :  { %v2275_v29 = vpop.f32.mrf.mxu0  ;;  %v2287_v45 = vadd.f32 %v2286_v27, %v2274_v43 }
 0x52f   :  { %v2260_v32 = vpop.f32.mrf.mxu3 }
 0x530   :  { %v2261_v33 = vadd.f32 %v2260_v32, %v2248_v31  ;;  %v2249_v34 = vpop.f32.mrf.mxu2 }
 0x531   :  { %v2288_v35 = vpop.f32.mrf.mxu1 }
 0x532   :  { %v2316_v36 = vadd.f32 %v2261_v33, %v4110_v37 }
 0x534   :  { %2318 = vst [vmem:[%s4173_s9] sm:$0xff] %v2316_v36 }
 0x537   :  { %v2262_v40 = vpop.f32.mrf.mxu3 }
 0x538   :  { %v2299_v41 = vpop.f32.mrf.mxu2 }
 0x539   :  { %v2300_v46 = vadd.f32 %v2299_v41, %v2287_v45 }
 0x53f   :  { %v2312_v47 = vpop.f32.mrf.mxu3 }
 0x540   :  { %v2313_v48 = vadd.f32 %v2312_v47, %v2300_v46  ;;  %v2301_v38 = vpop.f32.mrf.mxu2 }
 0x542   :  { %v2317_v50 = vadd.f32 %v2313_v48, %v4115_v42 }
 0x544   :  { %2319 = vst [vmem:[%s4173_s9 + $0x8] sm:$0xff] %v2317_v50 }
 0x547   :  { %v2314_v37 = vpop.f32.mrf.mxu3 }
 0x548   :  { %2324 = vsyncpa [#allocation3], 1 }
 0x549   :  { %2325 = vsyncpa [#allocation5], 1 }
 0x54a   :  { %2326 = vsyncpa [#allocation8], 1 }

</bundles_post_ra>
